<compile_context>
chip_gen: v6e
topology: v6e:2x2x1
jax: 0.10.0
libtpu: 0.0.40
codegen_flags: <defaults>
</compile_context>

<pallas_src>
import functools
import math

import jax
import jax.numpy as jnp
from jax import lax
from jax.experimental import pallas as pl
from jax.experimental.pallas import tpu as pltpu


def _round_up(x, m):
    return ((x + m - 1) // m) * m


# --------------------------------------------------------------------------
# Fused kernel: branches -> HiddenDense -> pairwise max -> MLP -> sigmoid -> max
# --------------------------------------------------------------------------
def _deepnet_kernel(x_ref, wcat_ref, bcat_ref, wh_ref, bh_ref,
                    w1_ref, b1_ref, w2_ref, b2_ref, w3l_ref, b3l_ref,
                    score_ref, v_scr, *, s_real):
    """
    x_ref    : (Sp + 6, Bp, F)   zero-padded activations, seq-major (full block)
    wcat_ref : (7, Ts, F, 3N)    channel-concatenated per-tap weights, this block
    bcat_ref : (Ts, 1, 3N)       channel-concatenated per-position bias
    wh_ref   : (3N, C2)          HiddenDense weight      bh_ref: (1, C2)
    w1/b1    : (C2, H1)/(1, H1)  LastDense layer 1
    w2/b2    : (H1, H2)/(1, H2)  LastDense layer 2
    w3l/b3l  : (1, H2)/(1, 1)    LastDense layer 3 (out dim 1)
    score_ref: (Bp, 1)           final per-batch score
    v_scr    : (Sp, Bp, C2)      VMEM scratch holding h @ Wh for all positions
    """
    W, Ts, F, C3 = wcat_ref.shape
    Bp = x_ref.shape[1]
    Sp, _, C2 = v_scr.shape
    base = pl.multiple_of(pl.program_id(0) * Ts, Ts)

    # ---- PS_denseNet branches (windows 3/5/7 fused): one batched matmul per
    # tap produces all 3N concatenated output channels at once.  The
    # un-duplicated zero-padded x is sliced in-kernel (no window_size x
    # duplication in HBM, x read once for all three branches).
    acc = jnp.zeros((Ts, Bp, C3), jnp.float32)
    for t in range(W):
        x_slab = x_ref[pl.ds(base + t, Ts)]                       # (Ts, Bp, F)
        acc = acc + jnp.einsum("tbf,tfn->tbn", x_slab, wcat_ref[t],
                               preferred_element_type=jnp.float32)
    hc = jnp.maximum(acc + bcat_ref[...], 0.0)                     # (Ts, Bp, 3N)

    # ---- HiddenDense: single K = 3N matmul on the lane-concatenated channels.
    v = jnp.dot(hc.reshape(Ts * Bp, C3), wh_ref[...],
                preferred_element_type=jnp.float32)                # (Ts*Bp, C2)
    v_scr[pl.ds(base, Ts)] = v.reshape(Ts, Bp, C2)

    # ---- Head: runs once, at the last grid step, on the VMEM-resident v slab.
    @pl.when(pl.program_id(0) == pl.num_programs(0) - 1)
    def _():
        R = Sp * Bp
        v_all = v_scr[...]                                         # (Sp, Bp, C2)
        # Exact identity: max_i[(h_i+h_j)@Wh + bh] = max_i(h_i@Wh) + h_j@Wh + bh
        seq_id = lax.broadcasted_iota(jnp.int32, (Sp, Bp, C2), 0)
        vmax = jnp.max(jnp.where(seq_id < s_real, v_all, -1e30),
                       axis=0, keepdims=True)                      # (1, Bp, C2)
        h2 = v_all + vmax + bh_ref[...]                            # (Sp, Bp, C2)

        # LastDense MLP (Dropout is identity in eval mode).
        a = h2.reshape(R, C2)
        a = jnp.maximum(jnp.dot(a, w1_ref[...],
                                preferred_element_type=jnp.float32)
                        + b1_ref[...], 0.0)                        # (R, H1)
        a = jnp.maximum(jnp.dot(a, w2_ref[...],
                                preferred_element_type=jnp.float32)
                        + b2_ref[...], 0.0)                        # (R, H2)
        a = jnp.sum(a * w3l_ref[...], axis=-1, keepdims=True) + b3l_ref[...]  # (R, 1)

        # Sigmoid is monotone: take the masked sequence max on the
        # pre-activation, then apply sigmoid to just (Bp, 1) values.
        a3 = a.reshape(Sp, Bp, 1)
        seq1 = lax.broadcasted_iota(jnp.int32, (Sp, Bp, 1), 0)
        amax = jnp.max(jnp.where(seq1 < s_real, a3, -1e30), axis=0)    # (Bp, 1)
        score_ref[...] = (1.0 / (1.0 + jnp.exp(-amax))).astype(score_ref.dtype)


# --------------------------------------------------------------------------
# One-time parameter preprocessing (hoisted out of the jitted hot path)
# --------------------------------------------------------------------------
def prepare_deepnet_params(params, *, block_s=8):
    emb = params["emb"]
    F = emb.shape[1]
    S, N = params["ps"][3][1].shape
    W = 7
    Sp = _round_up(S, block_s)
    C3 = 3 * N

    # Channel-concatenated per-tap weights (W, Sp, F, 3N); tap t is relative
    # offset t - 3 of the W=7-padded input.  Windows 3 and 5 occupy the middle
    # taps and are zero elsewhere; output columns are [branch3|branch5|branch7]
    # so torch's channel concat order (and the unmodified Wh) is preserved.
    wcat = jnp.zeros((W, Sp, F, C3), jnp.float32)
    bcat = jnp.zeros((Sp, 1, C3), jnp.float32)
    for bi, ws in enumerate((3, 5, 7)):
        wts, bias = params["ps"][ws]                       # (S, ws*F, N), (S, N)
        w4 = wts.reshape(S, ws, F, N).transpose(1, 0, 2, 3)  # (ws, S, F, N)
        off = (W - ws) // 2
        wcat = wcat.at[off:off + ws, :S, :, bi * N:(bi + 1) * N].set(w4)
        bcat = bcat.at[:S, 0, bi * N:(bi + 1) * N].set(bias)

    return dict(
        emb=emb, wcat=wcat, bcat=bcat,
        wh=params["wh"], bh=params["bh"].reshape(1, -1),
        w1=params["w1"], b1=params["b1"].reshape(1, -1),
        w2=params["w2"], b2=params["b2"].reshape(1, -1),
        w3=params["w3"].reshape(1, -1), b3=params["b3"].reshape(1, 1),
    )


# --------------------------------------------------------------------------
# Full Deepnet forward (single pallas_call)
# --------------------------------------------------------------------------
def deepnet_forward(inds, prep, *, block_s=8):
    emb = prep["emb"]
    B, S = inds.shape
    F = emb.shape[1]
    W, Sp, _, C3 = prep["wcat"].shape
    C2 = prep["wh"].shape[1]
    H1 = prep["w1"].shape[1]
    H2 = prep["w2"].shape[1]
    pad = W // 2
    Ts = block_s
    assert Sp % Ts == 0
    n_blk = Sp // Ts
    Bp = _round_up(B, 8)

    h = jnp.take(emb, inds, axis=0)                       # (B, S, F) embedding
    x = jnp.transpose(h, (1, 0, 2))                       # seq-major, done once
    x = jnp.pad(x, ((pad, pad + Sp - S), (0, Bp - B), (0, 0)))   # (Sp+6, Bp, F)

    kernel = functools.partial(_deepnet_kernel, s_real=S)
    score = pl.pallas_call(
        kernel,
        out_shape=jax.ShapeDtypeStruct((Bp, 1), jnp.float32),
        grid=(n_blk,),
        in_specs=[
            pl.BlockSpec((Sp + 2 * pad, Bp, F), lambda i: (0, 0, 0)),
            pl.BlockSpec((W, Ts, F, C3), lambda i: (0, i, 0, 0)),
            pl.BlockSpec((Ts, 1, C3), lambda i: (i, 0, 0)),
            pl.BlockSpec((C3, C2), lambda i: (0, 0)),
            pl.BlockSpec((1, C2), lambda i: (0, 0)),
            pl.BlockSpec((C2, H1), lambda i: (0, 0)),
            pl.BlockSpec((1, H1), lambda i: (0, 0)),
            pl.BlockSpec((H1, H2), lambda i: (0, 0)),
            pl.BlockSpec((1, H2), lambda i: (0, 0)),
            pl.BlockSpec((1, H2), lambda i: (0, 0)),
            pl.BlockSpec((1, 1), lambda i: (0, 0)),
        ],
        out_specs=pl.BlockSpec((Bp, 1), lambda i: (0, 0)),
        scratch_shapes=[pltpu.VMEM((Sp, Bp, C2), jnp.float32)],
        compiler_params=pltpu.CompilerParams(
            dimension_semantics=("arbitrary",)),
    )(x, prep["wcat"], prep["bcat"], prep["wh"], prep["bh"],
      prep["w1"], prep["b1"], prep["w2"], prep["b2"],
      prep["w3"], prep["b3"])
    return score[:B]                                      # (B, 1)


# --------------------------------------------------------------------------
# Parameters (PyTorch-style init) and a literal pure-JAX reference
# --------------------------------------------------------------------------
def init_deepnet_params(key, *, feature, filter_num, seq_len):
    def linear(k, fan_in, fan_out):
        bound = 1.0 / math.sqrt(fan_in)
        kw, kb = jax.random.split(k)
        w = jax.random.uniform(kw, (fan_in, fan_out), jnp.float32, -bound, bound)
        b = jax.random.uniform(kb, (fan_out,), jnp.float32, -bound, bound)
        return w, b

    keys = jax.random.split(key, 9)
    emb = jax.random.normal(keys[0], (4, feature), jnp.float32)
    ps = {}
    for i, w_s in enumerate((3, 5, 7)):
        K = w_s * feature
        bound = 1.0 / math.sqrt(K)
        kw, kb = jax.random.split(keys[1 + i])
        wts = jax.random.uniform(kw, (seq_len, K, filter_num), jnp.float32, -bound, bound)
        bs = jax.random.uniform(kb, (seq_len, filter_num), jnp.float32, -bound, bound)
        ps[w_s] = (wts, bs)
    wh, bh = linear(keys[4], 3 * filter_num, 2 * filter_num)
    w1, b1 = linear(keys[5], 2 * filter_num, 128)
    w2, b2 = linear(keys[6], 128, 32)
    w3, b3 = linear(keys[7], 32, 1)
    return dict(emb=emb, ps=ps, wh=wh, bh=bh,
                w1=w1, b1=b1, w2=w2, b2=b2, w3=w3, b3=b3)


def deepnet_reference(inds, params):
    """Literal (pairwise-expand) pure-JAX mirror of the PyTorch forward."""
    h = params["emb"][inds]                               # (B, S, F)
    B, S, _ = h.shape
    branches = []
    for w_s in (3, 5, 7):
        wts, bs = params["ps"][w_s]
        pad = w_s // 2
        hp = jnp.pad(h, ((0, 0), (pad, pad), (0, 0)))
        cols = [jax.nn.relu(hp[:, s:s + w_s, :].reshape(B, -1) @ wts[s] + bs[s])
                for s in range(S)]
        branches.append(jnp.transpose(jnp.stack(cols, axis=0), (1, 0, 2)))
    hc = jnp.concatenate(branches, axis=2)                # (B, S, 3N)
    pair = hc[:, :, None, :] + hc[:, None, :, :]          # (B, S_i, S_j, 3N)
    hid = pair @ params["wh"] + params["bh"]              # (B, S_i, S_j, 2N)
    hmax = jnp.max(hid, axis=1)                           # (B, S, 2N)
    a = jax.nn.relu(hmax @ params["w1"] + params["b1"])
    a = jax.nn.relu(a @ params["w2"] + params["b2"])
    a = a @ params["w3"] + params["b3"]                   # (B, S, 1)
    p = jax.nn.sigmoid(a)
    return jnp.max(p, axis=1)                             # (B, 1)


if __name__ == "__main__":
    batch, seq_len, feature, filter_num = 4, 8, 32, 64

    key = jax.random.PRNGKey(0)
    k_idx, k_par = jax.random.split(key)
    inds = jax.random.randint(k_idx, (batch, seq_len), 0, 4, dtype=jnp.int32)
    params = init_deepnet_params(
        k_par, feature=feature, filter_num=filter_num, seq_len=seq_len)

    # One-time parameter preprocessing, outside the jitted hot path.
    prep = prepare_deepnet_params(params, block_s=8)

    fwd = jax.jit(functools.partial(deepnet_forward, block_s=8))
    score = jax.block_until_ready(fwd(inds, prep))
    assert score.shape == (batch, 1)

    # Full-model check against the literal reference.
    ref = deepnet_reference(inds, params)
    assert jnp.allclose(score, ref, atol=1e-4, rtol=1e-3), (score, ref)

    print("KERNEL_OK")
</pallas_src>

<mosaic_0001>
module attributes {stable_mosaic.version = 11 : i64} {
  func.func @_deepnet_kernel(%arg0: i32, %arg1: memref<14x8x32xf32, #tpu.memory_space<vmem>>, %arg2: memref<7x8x32x192xf32, #tpu.memory_space<vmem>>, %arg3: memref<8x1x192xf32, #tpu.memory_space<vmem>>, %arg4: memref<192x128xf32, #tpu.memory_space<vmem>>, %arg5: memref<1x128xf32, #tpu.memory_space<vmem>>, %arg6: memref<128x128xf32, #tpu.memory_space<vmem>>, %arg7: memref<1x128xf32, #tpu.memory_space<vmem>>, %arg8: memref<128x32xf32, #tpu.memory_space<vmem>>, %arg9: memref<1x32xf32, #tpu.memory_space<vmem>>, %arg10: memref<1x32xf32, #tpu.memory_space<vmem>>, %arg11: memref<1x1xf32, #tpu.memory_space<vmem>>, %arg12: memref<8x1xf32, #tpu.memory_space<vmem>>, %arg13: memref<8x8x128xf32, #tpu.memory_space<vmem>>) attributes {dimension_semantics = [#tpu.dimension_semantics<arbitrary>], iteration_bounds = array<i64: 1>, scalar_prefetch = 0 : i64, scratch_operands = 1 : i64, tpu.core_type = #tpu.core_type<tc>, window_params = [{pipeline_mode = #tpu.pipeline_mode<synchronous>, transform_indices = @transform_0, window_bounds = array<i64: 14, 8, 32>}, {transform_indices = @transform_1, window_bounds = array<i64: 7, 8, 32, 192>}, {transform_indices = @transform_2, window_bounds = array<i64: 8, 1, 192>}, {pipeline_mode = #tpu.pipeline_mode<synchronous>, transform_indices = @transform_3, window_bounds = array<i64: 192, 128>}, {pipeline_mode = #tpu.pipeline_mode<synchronous>, transform_indices = @transform_4, window_bounds = array<i64: 1, 128>}, {pipeline_mode = #tpu.pipeline_mode<synchronous>, transform_indices = @transform_5, window_bounds = array<i64: 128, 128>}, {pipeline_mode = #tpu.pipeline_mode<synchronous>, transform_indices = @transform_6, window_bounds = array<i64: 1, 128>}, {pipeline_mode = #tpu.pipeline_mode<synchronous>, transform_indices = @transform_7, window_bounds = array<i64: 128, 32>}, {pipeline_mode = #tpu.pipeline_mode<synchronous>, transform_indices = @transform_8, window_bounds = array<i64: 1, 32>}, {pipeline_mode = #tpu.pipeline_mode<synchronous>, transform_indices = @transform_9, window_bounds = array<i64: 1, 32>}, {pipeline_mode = #tpu.pipeline_mode<synchronous>, transform_indices = @transform_10, window_bounds = array<i64: 1, 1>}, {pipeline_mode = #tpu.pipeline_mode<synchronous>, transform_indices = @transform_11, window_bounds = array<i64: 8, 1>}]} {
    %c8_i32 = arith.constant 8 : i32
    %0 = arith.muli %arg0, %c8_i32 : i32
    %1 = tpu.assume_multiple %0, 8 : i32
    %cst = arith.constant 0.000000e+00 : f32
    %2 = vector.broadcast %cst : f32 to vector<8x8x192xf32>
    %c0_i32 = arith.constant 0 : i32
    %3 = arith.addi %1, %c0_i32 : i32
    %4 = arith.index_cast %3 : i32 to index
    %c0 = arith.constant 0 : index
    %c0_0 = arith.constant 0 : index
    %5 = vector.load %arg1[%4, %c0, %c0_0] : memref<14x8x32xf32, #tpu.memory_space<vmem>>, vector<8x8x32xf32>
    %c0_1 = arith.constant 0 : index
    %c0_2 = arith.constant 0 : index
    %c0_3 = arith.constant 0 : index
    %c0_4 = arith.constant 0 : index
    %6 = vector.load %arg2[%c0_1, %c0_2, %c0_3, %c0_4] : memref<7x8x32x192xf32, #tpu.memory_space<vmem>>, vector<1x8x32x192xf32>
    %7 = vector.shape_cast %6 : vector<1x8x32x192xf32> to vector<8x32x192xf32>
    "tpu.trace_start"() <{level = 10 : i32, message = "tbf,tfn->tbn"}> : () -> ()
    %cst_5 = arith.constant dense<0.000000e+00> : vector<8x8x192xf32>
    %8 = tpu.matmul %5, %7, %cst_5 {dimension_numbers = #tpu.dot_dimension_numbers<[2], [1], [1], [2], [0, 0, 0, 1, 1, 2], [0], [0]>} : vector<8x8x32xf32>, vector<8x32x192xf32>, vector<8x8x192xf32> -> vector<8x8x192xf32>
    "tpu.trace_stop"() : () -> ()
    %9 = arith.addf %2, %8 : vector<8x8x192xf32>
    %c1_i32 = arith.constant 1 : i32
    %10 = arith.addi %1, %c1_i32 : i32
    %11 = arith.index_cast %10 : i32 to index
    %c0_6 = arith.constant 0 : index
    %c0_7 = arith.constant 0 : index
    %12 = vector.load %arg1[%11, %c0_6, %c0_7] : memref<14x8x32xf32, #tpu.memory_space<vmem>>, vector<8x8x32xf32>
    %c1 = arith.constant 1 : index
    %c0_8 = arith.constant 0 : index
    %c0_9 = arith.constant 0 : index
    %c0_10 = arith.constant 0 : index
    %13 = vector.load %arg2[%c1, %c0_8, %c0_9, %c0_10] : memref<7x8x32x192xf32, #tpu.memory_space<vmem>>, vector<1x8x32x192xf32>
    %14 = vector.shape_cast %13 : vector<1x8x32x192xf32> to vector<8x32x192xf32>
    "tpu.trace_start"() <{level = 10 : i32, message = "tbf,tfn->tbn"}> : () -> ()
    %cst_11 = arith.constant dense<0.000000e+00> : vector<8x8x192xf32>
    %15 = tpu.matmul %12, %14, %cst_11 {dimension_numbers = #tpu.dot_dimension_numbers<[2], [1], [1], [2], [0, 0, 0, 1, 1, 2], [0], [0]>} : vector<8x8x32xf32>, vector<8x32x192xf32>, vector<8x8x192xf32> -> vector<8x8x192xf32>
    "tpu.trace_stop"() : () -> ()
    %16 = arith.addf %9, %15 : vector<8x8x192xf32>
    %c2_i32 = arith.constant 2 : i32
    %17 = arith.addi %1, %c2_i32 : i32
    %18 = arith.index_cast %17 : i32 to index
    %c0_12 = arith.constant 0 : index
    %c0_13 = arith.constant 0 : index
    %19 = vector.load %arg1[%18, %c0_12, %c0_13] : memref<14x8x32xf32, #tpu.memory_space<vmem>>, vector<8x8x32xf32>
    %c2 = arith.constant 2 : index
    %c0_14 = arith.constant 0 : index
    %c0_15 = arith.constant 0 : index
    %c0_16 = arith.constant 0 : index
    %20 = vector.load %arg2[%c2, %c0_14, %c0_15, %c0_16] : memref<7x8x32x192xf32, #tpu.memory_space<vmem>>, vector<1x8x32x192xf32>
    %21 = vector.shape_cast %20 : vector<1x8x32x192xf32> to vector<8x32x192xf32>
    "tpu.trace_start"() <{level = 10 : i32, message = "tbf,tfn->tbn"}> : () -> ()
    %cst_17 = arith.constant dense<0.000000e+00> : vector<8x8x192xf32>
    %22 = tpu.matmul %19, %21, %cst_17 {dimension_numbers = #tpu.dot_dimension_numbers<[2], [1], [1], [2], [0, 0, 0, 1, 1, 2], [0], [0]>} : vector<8x8x32xf32>, vector<8x32x192xf32>, vector<8x8x192xf32> -> vector<8x8x192xf32>
    "tpu.trace_stop"() : () -> ()
    %23 = arith.addf %16, %22 : vector<8x8x192xf32>
    %c3_i32 = arith.constant 3 : i32
    %24 = arith.addi %1, %c3_i32 : i32
    %25 = arith.index_cast %24 : i32 to index
    %c0_18 = arith.constant 0 : index
    %c0_19 = arith.constant 0 : index
    %26 = vector.load %arg1[%25, %c0_18, %c0_19] : memref<14x8x32xf32, #tpu.memory_space<vmem>>, vector<8x8x32xf32>
    %c3 = arith.constant 3 : index
    %c0_20 = arith.constant 0 : index
    %c0_21 = arith.constant 0 : index
    %c0_22 = arith.constant 0 : index
    %27 = vector.load %arg2[%c3, %c0_20, %c0_21, %c0_22] : memref<7x8x32x192xf32, #tpu.memory_space<vmem>>, vector<1x8x32x192xf32>
    %28 = vector.shape_cast %27 : vector<1x8x32x192xf32> to vector<8x32x192xf32>
    "tpu.trace_start"() <{level = 10 : i32, message = "tbf,tfn->tbn"}> : () -> ()
    %cst_23 = arith.constant dense<0.000000e+00> : vector<8x8x192xf32>
    %29 = tpu.matmul %26, %28, %cst_23 {dimension_numbers = #tpu.dot_dimension_numbers<[2], [1], [1], [2], [0, 0, 0, 1, 1, 2], [0], [0]>} : vector<8x8x32xf32>, vector<8x32x192xf32>, vector<8x8x192xf32> -> vector<8x8x192xf32>
    "tpu.trace_stop"() : () -> ()
    %30 = arith.addf %23, %29 : vector<8x8x192xf32>
    %c4_i32 = arith.constant 4 : i32
    %31 = arith.addi %1, %c4_i32 : i32
    %32 = arith.index_cast %31 : i32 to index
    %c0_24 = arith.constant 0 : index
    %c0_25 = arith.constant 0 : index
    %33 = vector.load %arg1[%32, %c0_24, %c0_25] : memref<14x8x32xf32, #tpu.memory_space<vmem>>, vector<8x8x32xf32>
    %c4 = arith.constant 4 : index
    %c0_26 = arith.constant 0 : index
    %c0_27 = arith.constant 0 : index
    %c0_28 = arith.constant 0 : index
    %34 = vector.load %arg2[%c4, %c0_26, %c0_27, %c0_28] : memref<7x8x32x192xf32, #tpu.memory_space<vmem>>, vector<1x8x32x192xf32>
    %35 = vector.shape_cast %34 : vector<1x8x32x192xf32> to vector<8x32x192xf32>
    "tpu.trace_start"() <{level = 10 : i32, message = "tbf,tfn->tbn"}> : () -> ()
    %cst_29 = arith.constant dense<0.000000e+00> : vector<8x8x192xf32>
    %36 = tpu.matmul %33, %35, %cst_29 {dimension_numbers = #tpu.dot_dimension_numbers<[2], [1], [1], [2], [0, 0, 0, 1, 1, 2], [0], [0]>} : vector<8x8x32xf32>, vector<8x32x192xf32>, vector<8x8x192xf32> -> vector<8x8x192xf32>
    "tpu.trace_stop"() : () -> ()
    %37 = arith.addf %30, %36 : vector<8x8x192xf32>
    %c5_i32 = arith.constant 5 : i32
    %38 = arith.addi %1, %c5_i32 : i32
    %39 = arith.index_cast %38 : i32 to index
    %c0_30 = arith.constant 0 : index
    %c0_31 = arith.constant 0 : index
    %40 = vector.load %arg1[%39, %c0_30, %c0_31] : memref<14x8x32xf32, #tpu.memory_space<vmem>>, vector<8x8x32xf32>
    %c5 = arith.constant 5 : index
    %c0_32 = arith.constant 0 : index
    %c0_33 = arith.constant 0 : index
    %c0_34 = arith.constant 0 : index
    %41 = vector.load %arg2[%c5, %c0_32, %c0_33, %c0_34] : memref<7x8x32x192xf32, #tpu.memory_space<vmem>>, vector<1x8x32x192xf32>
    %42 = vector.shape_cast %41 : vector<1x8x32x192xf32> to vector<8x32x192xf32>
    "tpu.trace_start"() <{level = 10 : i32, message = "tbf,tfn->tbn"}> : () -> ()
    %cst_35 = arith.constant dense<0.000000e+00> : vector<8x8x192xf32>
    %43 = tpu.matmul %40, %42, %cst_35 {dimension_numbers = #tpu.dot_dimension_numbers<[2], [1], [1], [2], [0, 0, 0, 1, 1, 2], [0], [0]>} : vector<8x8x32xf32>, vector<8x32x192xf32>, vector<8x8x192xf32> -> vector<8x8x192xf32>
    "tpu.trace_stop"() : () -> ()
    %44 = arith.addf %37, %43 : vector<8x8x192xf32>
    %c6_i32 = arith.constant 6 : i32
    %45 = arith.addi %1, %c6_i32 : i32
    %46 = arith.index_cast %45 : i32 to index
    %c0_36 = arith.constant 0 : index
    %c0_37 = arith.constant 0 : index
    %47 = vector.load %arg1[%46, %c0_36, %c0_37] : memref<14x8x32xf32, #tpu.memory_space<vmem>>, vector<8x8x32xf32>
    %c6 = arith.constant 6 : index
    %c0_38 = arith.constant 0 : index
    %c0_39 = arith.constant 0 : index
    %c0_40 = arith.constant 0 : index
    %48 = vector.load %arg2[%c6, %c0_38, %c0_39, %c0_40] : memref<7x8x32x192xf32, #tpu.memory_space<vmem>>, vector<1x8x32x192xf32>
    %49 = vector.shape_cast %48 : vector<1x8x32x192xf32> to vector<8x32x192xf32>
    "tpu.trace_start"() <{level = 10 : i32, message = "tbf,tfn->tbn"}> : () -> ()
    %cst_41 = arith.constant dense<0.000000e+00> : vector<8x8x192xf32>
    %50 = tpu.matmul %47, %49, %cst_41 {dimension_numbers = #tpu.dot_dimension_numbers<[2], [1], [1], [2], [0, 0, 0, 1, 1, 2], [0], [0]>} : vector<8x8x32xf32>, vector<8x32x192xf32>, vector<8x8x192xf32> -> vector<8x8x192xf32>
    "tpu.trace_stop"() : () -> ()
    %51 = arith.addf %44, %50 : vector<8x8x192xf32>
    %c0_42 = arith.constant 0 : index
    %c0_43 = arith.constant 0 : index
    %c0_44 = arith.constant 0 : index
    %52 = vector.load %arg3[%c0_42, %c0_43, %c0_44] : memref<8x1x192xf32, #tpu.memory_space<vmem>>, vector<8x1x192xf32>
    %53 = vector.broadcast %52 : vector<8x1x192xf32> to vector<8x8x192xf32>
    %54 = arith.addf %51, %53 : vector<8x8x192xf32>
    %cst_45 = arith.constant 0.000000e+00 : f32
    %55 = vector.broadcast %cst_45 : f32 to vector<8x8x192xf32>
    %56 = arith.maximumf %54, %55 : vector<8x8x192xf32>
    %57 = vector.shape_cast %56 : vector<8x8x192xf32> to vector<64x192xf32>
    %c0_46 = arith.constant 0 : index
    %c0_47 = arith.constant 0 : index
    %58 = vector.load %arg4[%c0_46, %c0_47] : memref<192x128xf32, #tpu.memory_space<vmem>>, vector<192x128xf32>
    %cst_48 = arith.constant dense<0.000000e+00> : vector<64x128xf32>
    %59 = tpu.matmul %57, %58, %cst_48 {dimension_numbers = #tpu.dot_dimension_numbers<[1], [0], [0], [1], [0, 0, 1, 1], [], []>} : vector<64x192xf32>, vector<192x128xf32>, vector<64x128xf32> -> vector<64x128xf32>
    %60 = vector.shape_cast %59 : vector<64x128xf32> to vector<8x8x128xf32>
    %61 = arith.index_cast %1 : i32 to index
    %c0_49 = arith.constant 0 : index
    %c0_50 = arith.constant 0 : index
    %62 = vector.load %arg13[%61, %c0_49, %c0_50] : memref<8x8x128xf32, #tpu.memory_space<vmem>>, vector<8x8x128xf32>
    tpu.vector_store %arg13[%61, %c0_49, %c0_50], %60 {strides = array<i32>} : memref<8x8x128xf32, #tpu.memory_space<vmem>>, vector<8x8x128xf32>,
    %c0_i32_51 = arith.constant 0 : i32
    %63 = arith.cmpi eq, %arg0, %c0_i32_51 : i32
    %64 = arith.extui %63 : i1 to i32
    %c0_i32_52 = arith.constant 0 : i32
    %65 = arith.cmpi ne, %64, %c0_i32_52 : i32
    scf.if %65 {
      %c0_53 = arith.constant 0 : index
      %c0_54 = arith.constant 0 : index
      %c0_55 = arith.constant 0 : index
      %66 = vector.load %arg13[%c0_53, %c0_54, %c0_55] : memref<8x8x128xf32, #tpu.memory_space<vmem>>, vector<8x8x128xf32>
      %67 = tpu.iota {dimensions = array<i32: 0>} : vector<8x8x128xi32>
      %c8_i32_56 = arith.constant 8 : i32
      %68 = vector.broadcast %c8_i32_56 : i32 to vector<8x8x128xi32>
      %69 = arith.cmpi slt, %67, %68 : vector<8x8x128xi32>
      %cst_57 = arith.constant -1.000000e+30 : f32
      %70 = vector.broadcast %cst_57 : f32 to vector<8x8x128xf32>
      %71 = arith.select %69, %66, %70 : vector<8x8x128xi1>, vector<8x8x128xf32>
      %cst_58 = arith.constant dense<0xFF800000> : vector<8x128xf32>
      %72 = vector.multi_reduction <maximumf>, %71, %cst_58 [0] : vector<8x8x128xf32> to vector<8x128xf32>
      %73 = vector.shape_cast %72 : vector<8x128xf32> to vector<1x8x128xf32>
      %74 = vector.broadcast %73 : vector<1x8x128xf32> to vector<8x8x128xf32>
      %75 = arith.addf %66, %74 : vector<8x8x128xf32>
      %c0_59 = arith.constant 0 : index
      %c0_60 = arith.constant 0 : index
      %76 = vector.load %arg5[%c0_59, %c0_60] : memref<1x128xf32, #tpu.memory_space<vmem>>, vector<1x128xf32>
      %77 = vector.shape_cast %76 : vector<1x128xf32> to vector<1x1x128xf32>
      %78 = vector.broadcast %77 : vector<1x1x128xf32> to vector<8x8x128xf32>
      %79 = arith.addf %75, %78 : vector<8x8x128xf32>
      %80 = vector.shape_cast %79 : vector<8x8x128xf32> to vector<64x128xf32>
      %c0_61 = arith.constant 0 : index
      %c0_62 = arith.constant 0 : index
      %81 = vector.load %arg6[%c0_61, %c0_62] : memref<128x128xf32, #tpu.memory_space<vmem>>, vector<128x128xf32>
      %cst_63 = arith.constant dense<0.000000e+00> : vector<64x128xf32>
      %82 = tpu.matmul %80, %81, %cst_63 {dimension_numbers = #tpu.dot_dimension_numbers<[1], [0], [0], [1], [0, 0, 1, 1], [], []>} : vector<64x128xf32>, vector<128x128xf32>, vector<64x128xf32> -> vector<64x128xf32>
      %c0_64 = arith.constant 0 : index
      %c0_65 = arith.constant 0 : index
      %83 = vector.load %arg7[%c0_64, %c0_65] : memref<1x128xf32, #tpu.memory_space<vmem>>, vector<1x128xf32>
      %84 = vector.broadcast %83 : vector<1x128xf32> to vector<64x128xf32>
      %85 = arith.addf %82, %84 : vector<64x128xf32>
      %cst_66 = arith.constant 0.000000e+00 : f32
      %86 = vector.broadcast %cst_66 : f32 to vector<64x128xf32>
      %87 = arith.maximumf %85, %86 : vector<64x128xf32>
      %c0_67 = arith.constant 0 : index
      %c0_68 = arith.constant 0 : index
      %88 = vector.load %arg8[%c0_67, %c0_68] : memref<128x32xf32, #tpu.memory_space<vmem>>, vector<128x32xf32>
      %cst_69 = arith.constant dense<0.000000e+00> : vector<64x32xf32>
      %89 = tpu.matmul %87, %88, %cst_69 {dimension_numbers = #tpu.dot_dimension_numbers<[1], [0], [0], [1], [0, 0, 1, 1], [], []>} : vector<64x128xf32>, vector<128x32xf32>, vector<64x32xf32> -> vector<64x32xf32>
      %c0_70 = arith.constant 0 : index
      %c0_71 = arith.constant 0 : index
      %90 = vector.load %arg9[%c0_70, %c0_71] : memref<1x32xf32, #tpu.memory_space<vmem>>, vector<1x32xf32>
      %91 = vector.broadcast %90 : vector<1x32xf32> to vector<64x32xf32>
      %92 = arith.addf %89, %91 : vector<64x32xf32>
      %cst_72 = arith.constant 0.000000e+00 : f32
      %93 = vector.broadcast %cst_72 : f32 to vector<64x32xf32>
      %94 = arith.maximumf %92, %93 : vector<64x32xf32>
      %c0_73 = arith.constant 0 : index
      %c0_74 = arith.constant 0 : index
      %95 = vector.load %arg10[%c0_73, %c0_74] : memref<1x32xf32, #tpu.memory_space<vmem>>, vector<1x32xf32>
      %96 = vector.broadcast %95 : vector<1x32xf32> to vector<64x32xf32>
      %97 = arith.mulf %94, %96 : vector<64x32xf32>
      %cst_75 = arith.constant dense<0.000000e+00> : vector<64xf32>
      %98 = vector.multi_reduction <add>, %97, %cst_75 [1] : vector<64x32xf32> to vector<64xf32>
      %99 = vector.shape_cast %98 : vector<64xf32> to vector<64x1xf32>
      %c0_76 = arith.constant 0 : index
      %c0_77 = arith.constant 0 : index
      %100 = vector.load %arg11[%c0_76, %c0_77] : memref<1x1xf32, #tpu.memory_space<vmem>>, vector<1x1xf32>
      %101 = vector.broadcast %100 : vector<1x1xf32> to vector<64x1xf32>
      %102 = arith.addf %99, %101 : vector<64x1xf32>
      %103 = vector.shape_cast %102 : vector<64x1xf32> to vector<8x8x1xf32>
      %104 = tpu.iota {dimensions = array<i32: 0>} : vector<8x8x1xi32>
      %c8_i32_78 = arith.constant 8 : i32
      %105 = vector.broadcast %c8_i32_78 : i32 to vector<8x8x1xi32>
      %106 = arith.cmpi slt, %104, %105 : vector<8x8x1xi32>
      %cst_79 = arith.constant -1.000000e+30 : f32
      %107 = vector.broadcast %cst_79 : f32 to vector<8x8x1xf32>
      %108 = arith.select %106, %103, %107 : vector<8x8x1xi1>, vector<8x8x1xf32>
      %cst_80 = arith.constant dense<0xFF800000> : vector<8x1xf32>
      %109 = vector.multi_reduction <maximumf>, %108, %cst_80 [0] : vector<8x8x1xf32> to vector<8x1xf32>
      %cst_81 = arith.constant 0.000000e+00 : f32
      %110 = vector.broadcast %cst_81 : f32 to vector<8x1xf32>
      %111 = arith.subf %110, %109 : vector<8x1xf32>
      %112 = math.exp %111 : vector<8x1xf32>
      %cst_82 = arith.constant 1.000000e+00 : f32
      %113 = vector.broadcast %cst_82 : f32 to vector<8x1xf32>
      %114 = arith.addf %113, %112 : vector<8x1xf32>
      %cst_83 = arith.constant 1.000000e+00 : f32
      %115 = vector.broadcast %cst_83 : f32 to vector<8x1xf32>
      %116 = arith.divf %115, %114 : vector<8x1xf32>
      %c0_84 = arith.constant 0 : index
      %c0_85 = arith.constant 0 : index
      %117 = vector.load %arg12[%c0_84, %c0_85] : memref<8x1xf32, #tpu.memory_space<vmem>>, vector<8x1xf32>
      tpu.vector_store %arg12[%c0_84, %c0_85], %116 {strides = array<i32>} : memref<8x1xf32, #tpu.memory_space<vmem>>, vector<8x1xf32>,
    } else {
    }
    return
  }
  func.func @transform_0(%arg0: i32) -> (i32, i32, i32) {
    %c0_i32 = arith.constant 0 : i32
    %c0_i32_0 = arith.constant 0 : i32
    %c0_i32_1 = arith.constant 0 : i32
    %c0_i32_2 = arith.constant 0 : i32
    return %c0_i32, %c0_i32_0, %c0_i32_1 : i32, i32, i32
  }
  func.func @transform_1(%arg0: i32) -> (i32, i32, i32, i32) {
    %c0_i32 = arith.constant 0 : i32
    %c0_i32_0 = arith.constant 0 : i32
    %c0_i32_1 = arith.constant 0 : i32
    %c0_i32_2 = arith.constant 0 : i32
    return %c0_i32, %arg0, %c0_i32_0, %c0_i32_1 : i32, i32, i32, i32
  }
  func.func @transform_2(%arg0: i32) -> (i32, i32, i32) {
    %c0_i32 = arith.constant 0 : i32
    %c0_i32_0 = arith.constant 0 : i32
    %c0_i32_1 = arith.constant 0 : i32
    return %arg0, %c0_i32, %c0_i32_0 : i32, i32, i32
  }
  func.func @transform_3(%arg0: i32) -> (i32, i32) {
    %c0_i32 = arith.constant 0 : i32
    %c0_i32_0 = arith.constant 0 : i32
    %c0_i32_1 = arith.constant 0 : i32
    return %c0_i32, %c0_i32_0 : i32, i32
  }
  func.func @transform_4(%arg0: i32) -> (i32, i32) {
    %c0_i32 = arith.constant 0 : i32
    %c0_i32_0 = arith.constant 0 : i32
    %c0_i32_1 = arith.constant 0 : i32
    return %c0_i32, %c0_i32_0 : i32, i32
  }
  func.func @transform_5(%arg0: i32) -> (i32, i32) {
    %c0_i32 = arith.constant 0 : i32
    %c0_i32_0 = arith.constant 0 : i32
    %c0_i32_1 = arith.constant 0 : i32
    return %c0_i32, %c0_i32_0 : i32, i32
  }
  func.func @transform_6(%arg0: i32) -> (i32, i32) {
    %c0_i32 = arith.constant 0 : i32
    %c0_i32_0 = arith.constant 0 : i32
    %c0_i32_1 = arith.constant 0 : i32
    return %c0_i32, %c0_i32_0 : i32, i32
  }
  func.func @transform_7(%arg0: i32) -> (i32, i32) {
    %c0_i32 = arith.constant 0 : i32
    %c0_i32_0 = arith.constant 0 : i32
    %c0_i32_1 = arith.constant 0 : i32
    return %c0_i32, %c0_i32_0 : i32, i32
  }
  func.func @transform_8(%arg0: i32) -> (i32, i32) {
    %c0_i32 = arith.constant 0 : i32
    %c0_i32_0 = arith.constant 0 : i32
    %c0_i32_1 = arith.constant 0 : i32
    return %c0_i32, %c0_i32_0 : i32, i32
  }
  func.func @transform_9(%arg0: i32) -> (i32, i32) {
    %c0_i32 = arith.constant 0 : i32
    %c0_i32_0 = arith.constant 0 : i32
    %c0_i32_1 = arith.constant 0 : i32
    return %c0_i32, %c0_i32_0 : i32, i32
  }
  func.func @transform_10(%arg0: i32) -> (i32, i32) {
    %c0_i32 = arith.constant 0 : i32
    %c0_i32_0 = arith.constant 0 : i32
    %c0_i32_1 = arith.constant 0 : i32
    return %c0_i32, %c0_i32_0 : i32, i32
  }
  func.func @transform_11(%arg0: i32) -> (i32, i32) {
    %c0_i32 = arith.constant 0 : i32
    %c0_i32_0 = arith.constant 0 : i32
    %c0_i32_1 = arith.constant 0 : i32
    return %c0_i32, %c0_i32_0 : i32, i32
  }
}

</mosaic_0001>

<bundles_post_ra>
// kernel: deepnet_forward.1
= control target key start
LH: loop header
LB: loop body
LE: loop exit
PB: predicated region body
PF: predicated region fallthrough
CT: control target
= control target key end

     0   :  { %s6779_s0 = inlined_call_operand.vmem [shape: f32[14,8,32], index: 0, kind: input, shape index: {}]   ;;  %s6780_s1 = inlined_call_operand.hbm [shape: f32[7,8,32,192], index: 1, kind: input, shape index: {}]   ;;  %s6781_s2 = inlined_call_operand.hbm [shape: f32[8,1,192], index: 2, kind: input, shape index: {}]   ;;  %s6782_s3 = inlined_call_operand.hbm [shape: f32[192,128], index: 3, kind: input, shape index: {}]   ;;  %s6783_s4 = inlined_call_operand.hbm [shape: f32[1,128], index: 4, kind: input, shape index: {}]   ;;  %s6784_s5 = inlined_call_operand.hbm [shape: f32[128,128], index: 5, kind: input, shape index: {}]   ;;  %s6785_s6 = inlined_call_operand.hbm [shape: f32[1,128], index: 6, kind: input, shape index: {}]   ;;  %s6786_s7 = inlined_call_operand.vmem [shape: f32[128,32], index: 7, kind: input, shape index: {}]   ;;  %s6787_s8 = inlined_call_operand.hbm [shape: f32[1,32], index: 8, kind: input, shape index: {}]   ;;  %s6788_s9 = inlined_call_operand.hbm [shape: f32[1,32], index: 9, kind: input, shape index: {}]   ;;  %s6789_s10 = inlined_call_operand.<no memory space> [shape: f32[1,1], index: 10, kind: input, shape index: {}]   ;;  %s6790_s11 = inlined_call_operand.vmem [shape: f32[8,1], index: 11, kind: output, shape index: {}]  }
   0x1   :  { %v16_v0 = vstv %s6789_s10 }
   0x2   :  { %17 = vst [vmem:[#allocation3] sm:$0x1] %v16_v0 }
   0x3   :  { %18 = vsyncpa [#allocation5], 0 }
   0x4   :  { %19 = vsyncpa [#allocation7], 0 }
   0x5   :  { %20 = vsyncpa [#allocation10], 0 }
   0x6   :  { %21 = vsyncpa [#allocation13], 0 }
   0x7   :  { %22 = vsyncpa [#allocation16], 0  ;;  %s6052_s19 = smov [#allocation6]  }
   0x8   :  { %s42_s20 = sshll.u32 %s6052_s19, 4  ;;  %s43_s20 = int_to_ptr.vmem [resolvable:$true] %s42_s20 }
   0x9   :  { %s5890_s21 = scalar_lea.vmem %s43_s20, 256  ;;  %p5895_p1 = scmp.lt.s32.totalorder %s43_s20, %s43_s20 }
   0xa   :  { %p5891_p0 = scmp.ne.s32.totalorder %s43_s20, %s5890_s21  ;;  %p5896_p2 = scmp.lt.s32.totalorder %s5890_s21, %s5890_s21 }
   0xc   :  { %p5897_p3 = por %p5896_p2, %p5895_p1 }
   0xe   :  { %p5898_p4 = pnand %p5897_p3, %p5891_p0 }
  0x10   :  { %5901 = shalt.err (!%p5898_p4)
}
  0x11   :  { %s6053_s22 = smov 32   ;;  %s6054_s23 = smov 2  }
  0x12   :  { %48 = dma.hbm_to_vmem [thread:$0]  %s6781_s2, 256, %s43_s20, [#allocation7], %s6053_s22, %s6053_s22, %s6054_s23  }
  0x13   :  { %s6055_s25 = smov [#allocation9]   ;;  %s6056_s27 = smov [#allocation12]  }
  0x14   :  { %s67_s26 = sshll.u32 %s6055_s25, 4  ;;  %s89_s28 = sshll.u32 %s6056_s27, 4  ;;  %s68_s26 = int_to_ptr.vmem [resolvable:$true] %s67_s26  ;;  %s90_s28 = int_to_ptr.vmem [resolvable:$true] %s89_s28 }
  0x15   :  { %s5910_s29 = scalar_lea.vmem %s68_s26, 16  ;;  %s5914_s30 = scalar_lea.vmem %s68_s26, 32 }
  0x16   :  { %p5911_p5 = scmp.ne.s32.totalorder %s68_s26, %s5910_s29  ;;  %p5915_p6 = scmp.lt.s32.totalorder %s68_s26, %s68_s26 }
  0x17   :  { %p5916_p7 = scmp.lt.s32.totalorder %s5914_s30, %s5910_s29 }
  0x19   :  { %p5917_p8 = por %p5916_p7, %p5915_p6 }
  0x1b   :  { %p5918_p9 = pnand %p5917_p8, %p5911_p5 }
  0x1d   :  { %5921 = shalt.err (!%p5918_p9)
}
  0x1e   :  { %70 = dma.hbm_to_vmem [thread:$0]  %s6783_s4, 16, %s68_s26, [#allocation10]  }
  0x1f   :  { %s5930_s14 = scalar_lea.vmem %s90_s28, 16  ;;  %s5934_s2 = scalar_lea.vmem %s90_s28, 32 }
  0x20   :  { %p5931_p10 = scmp.ne.s32.totalorder %s90_s28, %s5930_s14  ;;  %p5935_p11 = scmp.lt.s32.totalorder %s90_s28, %s90_s28 }
  0x21   :  { %p5936_p12 = scmp.lt.s32.totalorder %s5934_s2, %s5930_s14 }
  0x23   :  { %p5937_p13 = por %p5936_p12, %p5935_p11 }
  0x25   :  { %p5938_p0 = pnand %p5937_p13, %p5931_p10 }
  0x27   :  { %5941 = shalt.err (!%p5938_p0)
}
  0x28   :  { %92 = dma.hbm_to_vmem [thread:$0]  %s6785_s6, 16, %s90_s28, [#allocation13]  }
  0x29   :  { %s6057_s17 = smov [#allocation4]  }
  0x2a   :  { %s30_s18 = sshll.u32 %s6057_s17, 4  ;;  %s31_s18 = int_to_ptr.vmem [resolvable:$true] %s30_s18 }
  0x2b   :  { %s5950_s19 = scalar_lea.vmem %s31_s18, 57344  ;;  %p5955_p2 = scmp.lt.s32.totalorder %s31_s18, %s31_s18 }
  0x2c   :  { %p5951_p1 = scmp.ne.s32.totalorder %s31_s18, %s5950_s19  ;;  %p5956_p3 = scmp.lt.s32.totalorder %s5950_s19, %s5950_s19 }
  0x2e   :  { %p5957_p4 = por %p5956_p3, %p5955_p2 }
  0x30   :  { %p5958_p5 = pnand %p5957_p4, %p5951_p1 }
  0x32   :  { %5961 = shalt.err (!%p5958_p5)
}
  0x33   :  { %s6058_s4 = smov 256   ;;  %s6059_s20 = smov 16  }
  0x34   :  { %36 = dma.hbm_to_vmem [thread:$0]  %s6780_s1, 57344, %s31_s18, [#allocation5], %s6058_s4, %s6058_s4, %s6059_s20  }
  0x35   :  { %s6060_s23 = smov [#allocation8]  }
  0x36   :  { %s54_s24 = sshll.u32 %s6060_s23, 4  ;;  %s55_s24 = int_to_ptr.vmem [resolvable:$true] %s54_s24 }
  0x37   :  { %s5970_s6 = scalar_lea.vmem %s55_s24, 3072  ;;  %p5975_p7 = scmp.lt.s32.totalorder %s55_s24, %s55_s24 }
  0x38   :  { %p5971_p6 = scmp.ne.s32.totalorder %s55_s24, %s5970_s6  ;;  %p5976_p8 = scmp.lt.s32.totalorder %s5970_s6, %s5970_s6 }
  0x3a   :  { %p5977_p9 = por %p5976_p8, %p5975_p7 }
  0x3c   :  { %p5978_p10 = pnand %p5977_p9, %p5971_p6 }
  0x3e   :  { %5981 = shalt.err (!%p5978_p10)
}
  0x3f   :  { %s6061_s10 = smov 128   ;;  %s6062_s25 = smov 8  }
  0x40   :  { %60 = dma.hbm_to_vmem [thread:$0]  %s6782_s3, 3072, %s55_s24, [#allocation7], %s6061_s10, %s6061_s10, %s6062_s25  }
  0x41   :  { %s6063_s28 = smov [#allocation11]   ;;  %s6064_s1 = smov [#allocation14]  }
  0x42   :  { %s76_s29 = sshll.u32 %s6063_s28, 4  ;;  %s101_s30 = sshll.u32 %s6064_s1, 4  ;;  %s77_s29 = int_to_ptr.vmem [resolvable:$true] %s76_s29  ;;  %s102_s30 = int_to_ptr.vmem [resolvable:$true] %s101_s30 }
  0x43   :  { %s5990_s12 = scalar_lea.vmem %s77_s29, 2048  ;;  %p5995_p12 = scmp.lt.s32.totalorder %s77_s29, %s77_s29 }
  0x44   :  { %p5991_p11 = scmp.ne.s32.totalorder %s77_s29, %s5990_s12  ;;  %p5996_p13 = scmp.lt.s32.totalorder %s5990_s12, %s5990_s12 }
  0x46   :  { %p5997_p0 = por %p5996_p13, %p5995_p12 }
  0x48   :  { %p5998_p1 = pnand %p5997_p0, %p5991_p11 }
  0x4a   :  { %6001 = shalt.err (!%p5998_p1)
}
  0x4b   :  { %82 = dma.hbm_to_vmem [thread:$0]  %s6784_s5, 2048, %s77_s29, [#allocation10], %s6061_s10, %s6061_s10, %s6062_s25  }
  0x4c   :  { %s6010_s2 = scalar_lea.vmem %s102_s30, 16  ;;  %s6014_s3 = scalar_lea.vmem %s102_s30, 32 }
  0x4d   :  { %p6011_p2 = scmp.ne.s32.totalorder %s102_s30, %s6010_s2  ;;  %p6015_p3 = scmp.lt.s32.totalorder %s102_s30, %s102_s30 }
  0x4e   :  { %p6016_p4 = scmp.lt.s32.totalorder %s6014_s3, %s6010_s2 }
  0x50   :  { %p6017_p5 = por %p6016_p4, %p6015_p3 }
  0x52   :  { %p6018_p6 = pnand %p6017_p5, %p6011_p2 }
  0x54   :  { %6021 = shalt.err (!%p6018_p6)
}
  0x55   :  { %104 = dma.hbm_to_vmem [thread:$0]  %s6787_s8, 16, %s102_s30, [#allocation13]  }
  0x56   :  { %s6065_s17 = smov [#allocation15]  }
  0x57   :  { %s111_s18 = sshll.u32 %s6065_s17, 4  ;;  %s112_s18 = int_to_ptr.vmem [resolvable:$true] %s111_s18 }
  0x58   :  { %s6030_s19 = scalar_lea.vmem %s112_s18, 16  ;;  %s6034_s4 = scalar_lea.vmem %s112_s18, 32 }
  0x59   :  { %p6031_p7 = scmp.ne.s32.totalorder %s112_s18, %s6030_s19  ;;  %p6035_p8 = scmp.lt.s32.totalorder %s112_s18, %s112_s18 }
  0x5a   :  { %p6036_p9 = scmp.lt.s32.totalorder %s6034_s4, %s6030_s19 }
  0x5c   :  { %p6037_p10 = por %p6036_p9, %p6035_p8 }
  0x5e   :  { %p6038_p11 = pnand %p6037_p10, %p6031_p7 }
  0x60   :  { %6041 = shalt.err (!%p6038_p11)
}
  0x61   :  { %114 = dma.hbm_to_vmem [thread:$0]  %s6788_s9, 16, %s112_s18, [#allocation16]  }
  0x62   :  { %6042 = dma.done.wait [#allocation5], 57344  }
  0x63   :  { %6043 = vsyncadd [#allocation5], 4294909952 }
  0x64   :  { %6044 = dma.done.wait [#allocation7], 3328  }
  0x65   :  { %6045 = vsyncadd [#allocation7], 4294963968 }
  0x66   :  { %6046 = dma.done.wait [#allocation10], 2064  }
  0x67   :  { %6047 = vsyncadd [#allocation10], 4294965232 }
  0x68   :  { %6048 = dma.done.wait [#allocation13], 32  }
  0x69   :  { %6049 = vsyncadd [#allocation13], 4294967264 }
  0x6a   :  { %6050 = dma.done.wait [#allocation16], 16  }
  0x6b   :  { %6051 = vsyncadd [#allocation16], 4294967280  ;;  %v6066_v1 = vmov 0.0   ;;  %v235_v2 = vld [vmem:[#allocation4 + $0x238] sm:$0xff]  ;;  %v234_v4 = vld [vmem:[#allocation4 + $0x230] sm:$0xff]  ;;  %vm292_vm0 = vcmask 261120  }
  0x6c   :  { %360 = vmatprep.mubr.f32.mxu0 %v6066_v1  ;;  %434 = vmatprep.mubr.f32.mxu1 %v6066_v1  ;;  %v243_v3 = vld [vmem:[#allocation4 + $0x278] sm:$0xff]  ;;  %v242_v5 = vld [vmem:[#allocation4 + $0x270] sm:$0xff]  ;;  %v233_v6 = vld [vmem:[#allocation4 + $0x228] sm:$0xff]  ;;  %vm5049_vm1 = vcmask 523264   ;;  %vm5572_vm2 = vcmask 7168  }
  0x6d   :  { %320 = vmatprep.subr.mxu0 %v235_v2  ;;  %394 = vmatprep.subr.mxu1 %v243_v3  ;;  %v241_v7 = vld [vmem:[#allocation4 + $0x268] sm:$0xff]  ;;  %v232_v8 = vld [vmem:[#allocation4 + $0x220] sm:$0xff]  ;;  %v231_v10 = vld [vmem:[#allocation4 + $0x218] sm:$0xff] }
  0x6e   :  { %321 = vmatpush1.msra.mxu0 %v234_v4  ;;  %395 = vmatpush1.msra.mxu1 %v242_v5  ;;  %v240_v9 = vld [vmem:[#allocation4 + $0x260] sm:$0xff]  ;;  %v239_v11 = vld [vmem:[#allocation4 + $0x258] sm:$0xff]  ;;  %v230_v12 = vld [vmem:[#allocation4 + $0x210] sm:$0xff] }
  0x6f   :  { %322 = vmatprep.subr.mxu0 %v233_v6  ;;  %396 = vmatprep.subr.mxu1 %v241_v7  ;;  %v238_v13 = vld [vmem:[#allocation4 + $0x250] sm:$0xff]  ;;  %v229_v14 = vld [vmem:[#allocation4 + $0x208] sm:$0xff]  ;;  %v228_v16 = vld [vmem:[#allocation4 + $0x200] sm:$0xff] }
  0x70   :  { %323 = vmatpush1.msra.mxu0 %v232_v8  ;;  %397 = vmatpush1.msra.mxu1 %v240_v9  ;;  %v237_v15 = vld [vmem:[#allocation4 + $0x248] sm:$0xff]  ;;  %v236_v17 = vld [vmem:[#allocation4 + $0x240] sm:$0xff]  ;;  %v251_v19 = vld [vmem:[#allocation4 + $0x2b8] sm:$0xff] }
  0x71   :  { %324 = vmatprep.subr.mxu0 %v231_v10  ;;  %398 = vmatprep.subr.mxu1 %v239_v11  ;;  %v6159_v18 = vld [vmem:[%s6779_s0 + $0x8] sm:$0xff]  ;;  %v259_v20 = vld [vmem:[#allocation4 + $0x2f8] sm:$0xff]  ;;  %v6164_v21 = vld [vmem:[%s6779_s0 + $0x10] sm:$0xff] }
  0x72   :  { %325 = vmatpush1.msra.mxu0 %v230_v12  ;;  %399 = vmatpush1.msra.mxu1 %v238_v13  ;;  %v250_v22 = vld [vmem:[#allocation4 + $0x2b0] sm:$0xff]  ;;  %v249_v24 = vld [vmem:[#allocation4 + $0x2a8] sm:$0xff]  ;;  %v248_v26 = vld [vmem:[#allocation4 + $0x2a0] sm:$0xff] }
  0x73   :  { %326 = vmatprep.subr.mxu0 %v229_v14  ;;  %400 = vmatprep.subr.mxu1 %v237_v15  ;;  %v258_v23 = vld [vmem:[#allocation4 + $0x2f0] sm:$0xff]  ;;  %v257_v25 = vld [vmem:[#allocation4 + $0x2e8] sm:$0xff]  ;;  %v256_v27 = vld [vmem:[#allocation4 + $0x2e0] sm:$0xff] }
  0x74   :  { %327 = vmatpush1.msra.mxu0 %v228_v16  ;;  %401 = vmatpush1.msra.mxu1 %v236_v17  ;;  %v247_v28 = vld [vmem:[#allocation4 + $0x298] sm:$0xff]  ;;  %v246_v30 = vld [vmem:[#allocation4 + $0x290] sm:$0xff]  ;;  %v245_v32 = vld [vmem:[#allocation4 + $0x288] sm:$0xff] }
  0x75   :  { %5618 = vmatmul.mubr.msk.f32.vlgmr.msra.gmra.mxu0 %vm292_vm0, %v6159_v18  ;;  %468 = vmatprep.subr.mxu0 %v251_v19  ;;  %v255_v29 = vld [vmem:[#allocation4 + $0x2d8] sm:$0xff]  ;;  %v254_v31 = vld [vmem:[#allocation4 + $0x2d0] sm:$0xff]  ;;  %v253_v33 = vld [vmem:[#allocation4 + $0x2c8] sm:$0xff] }
  0x76   :  { %542 = vmatprep.subr.mxu1 %v259_v20  ;;  %5619 = vmatmul.mubr.msk.f32.vlgmr.msra.gmra.mxu1 %vm292_vm0, %v6164_v21  ;;  %v244_v34 = vld [vmem:[#allocation4 + $0x280] sm:$0xff]  ;;  %v6173_v36 = vld [vmem:[%s6779_s0 + $0x18] sm:$0xff]  ;;  %v265_v42 = vld [vmem:[#allocation4 + $0x328] sm:$0xff] }
  0x77   :  { %469 = vmatpush1.msra.mxu0 %v250_v22  ;;  %543 = vmatpush1.msra.mxu1 %v258_v23  ;;  %v252_v35 = vld [vmem:[#allocation4 + $0x2c0] sm:$0xff]  ;;  %v267_v37 = vld [vmem:[#allocation4 + $0x338] sm:$0xff]  ;;  %v266_v40 = vld [vmem:[#allocation4 + $0x330] sm:$0xff] }
  0x78   :  { %470 = vmatprep.subr.mxu0 %v249_v24  ;;  %544 = vmatprep.subr.mxu1 %v257_v25  ;;  %v275_v38 = vld [vmem:[#allocation4 + $0x378] sm:$0xff]  ;;  %v274_v41 = vld [vmem:[#allocation4 + $0x370] sm:$0xff]  ;;  %v273_v43 = vld [vmem:[#allocation4 + $0x368] sm:$0xff] }
  0x79   :  { %471 = vmatpush1.msra.mxu0 %v248_v26  ;;  %545 = vmatpush1.msra.mxu1 %v256_v27  ;;  %v6179_v39 = vld [vmem:[%s6779_s0 + $0x20] sm:$0xff]  ;;  %v262_v48 = vld [vmem:[#allocation4 + $0x310] sm:$0xff]  ;;  %v261_v50 = vld [vmem:[#allocation4 + $0x308] sm:$0xff] }
  0x7a   :  { %472 = vmatprep.subr.mxu0 %v247_v28  ;;  %546 = vmatprep.subr.mxu1 %v255_v29  ;;  %v264_v44 = vld [vmem:[#allocation4 + $0x320] sm:$0xff]  ;;  %v263_v46 = vld [vmem:[#allocation4 + $0x318] sm:$0xff]  ;;  %v270_v49 = vld [vmem:[#allocation4 + $0x350] sm:$0xff] }
  0x7b   :  { %473 = vmatpush1.msra.mxu0 %v246_v30  ;;  %547 = vmatpush1.msra.mxu1 %v254_v31  ;;  %v272_v45 = vld [vmem:[#allocation4 + $0x360] sm:$0xff]  ;;  %v271_v47 = vld [vmem:[#allocation4 + $0x358] sm:$0xff]  ;;  %v269_v51 = vld [vmem:[#allocation4 + $0x348] sm:$0xff] }
  0x7c   :  { %474 = vmatprep.subr.mxu0 %v245_v32  ;;  %548 = vmatprep.subr.mxu1 %v253_v33  ;;  %v260_v52 = vld [vmem:[#allocation4 + $0x300] sm:$0xff]  ;;  %v283_v55 = vld [vmem:[#allocation4 + $0x3b8] sm:$0xff]  ;;  %v6195_v57 = vld [vmem:[%s6779_s0 + $0x30] sm:$0xff] }
  0x7d   :  { %475 = vmatpush1.msra.mxu0 %v244_v34  ;;  %508 = vmatprep.mubr.f32.mxu0 %v6066_v1  ;;  %v268_v53 = vld [vmem:[#allocation4 + $0x340] sm:$0xff]  ;;  %v291_v56 = vld [vmem:[#allocation4 + $0x3f8] sm:$0xff]  ;;  %v282_v58 = vld [vmem:[#allocation4 + $0x3b0] sm:$0xff] }
  0x7e   :  { %549 = vmatpush1.msra.mxu1 %v252_v35  ;;  %5620 = vmatmul.mubr.msk.f32.vlgmr.msra.gmra.mxu0 %vm292_vm0, %v6173_v36  ;;  %v6189_v54 = vld [vmem:[%s6779_s0 + $0x28] sm:$0xff]  ;;  %v290_v59 = vld [vmem:[#allocation4 + $0x3f0] sm:$0xff]  ;;  %v279_v0 = vld [vmem:[#allocation4 + $0x398] sm:$0xff] }
  0x7f   :  { %582 = vmatprep.mubr.f32.mxu1 %v6066_v1  ;;  %616 = vmatprep.subr.mxu0 %v267_v37  ;;  %v281_v60 = vld [vmem:[#allocation4 + $0x3a8] sm:$0xff]  ;;  %v280_v62 = vld [vmem:[#allocation4 + $0x3a0] sm:$0xff]  ;;  %v287_v2 = vld [vmem:[#allocation4 + $0x3d8] sm:$0xff] }
  0x80   :  { %690 = vmatprep.subr.mxu1 %v275_v38  ;;  %5621 = vmatmul.mubr.msk.f32.vlgmr.msra.gmra.mxu1 %vm292_vm0, %v6179_v39  ;;  %v289_v61 = vld [vmem:[#allocation4 + $0x3e8] sm:$0xff]  ;;  %v288_v63 = vld [vmem:[#allocation4 + $0x3e0] sm:$0xff]  ;;  %v278_v3 = vld [vmem:[#allocation4 + $0x390] sm:$0xff] }
  0x81   :  { %617 = vmatpush1.msra.mxu0 %v266_v40  ;;  %691 = vmatpush1.msra.mxu1 %v274_v41  ;;  %v286_v4 = vld [vmem:[#allocation4 + $0x3d0] sm:$0xff]  ;;  %v277_v5 = vld [vmem:[#allocation4 + $0x388] sm:$0xff]  ;;  %v276_v7 = vld [vmem:[#allocation4 + $0x380] sm:$0xff] }
  0x82   :  { %618 = vmatprep.subr.mxu0 %v265_v42  ;;  %692 = vmatprep.subr.mxu1 %v273_v43  ;;  %v285_v6 = vld [vmem:[#allocation4 + $0x3c8] sm:$0xff]  ;;  %v284_v8 = vld [vmem:[#allocation4 + $0x3c0] sm:$0xff]  ;;  %v6205_v9 = vld [vmem:[%s6779_s0 + $0x38] sm:$0xff] }
  0x83   :  { %619 = vmatpush1.msra.mxu0 %v264_v44  ;;  %693 = vmatpush1.msra.mxu1 %v272_v45  ;;  %v159_v10 = vld [vmem:[#allocation4 + $0x38] sm:$0xff]  ;;  %v158_v13 = vld [vmem:[#allocation4 + $0x30] sm:$0xff]  ;;  %v157_v15 = vld [vmem:[#allocation4 + $0x28] sm:$0xff] }
  0x84   :  { %620 = vmatprep.subr.mxu0 %v263_v46  ;;  %694 = vmatprep.subr.mxu1 %v271_v47  ;;  %v167_v11 = vld [vmem:[#allocation4 + $0x78] sm:$0xff]  ;;  %v166_v14 = vld [vmem:[#allocation4 + $0x70] sm:$0xff]  ;;  %v165_v16 = vld [vmem:[#allocation4 + $0x68] sm:$0xff] }
  0x85   :  { %621 = vmatpush1.msra.mxu0 %v262_v48  ;;  %695 = vmatpush1.msra.mxu1 %v270_v49  ;;  %v6211_v12 = vld [vmem:[%s6779_s0 + $0x40] sm:$0xff]  ;;  %v154_v23 = vld [vmem:[#allocation4 + $0x10] sm:$0xff]  ;;  %v153_v25 = vld [vmem:[#allocation4 + $0x8] sm:$0xff] }
  0x86   :  { %622 = vmatprep.subr.mxu0 %v261_v50  ;;  %696 = vmatprep.subr.mxu1 %v269_v51  ;;  %v156_v17 = vld [vmem:[#allocation4 + $0x20] sm:$0xff]  ;;  %v155_v20 = vld [vmem:[#allocation4 + $0x18] sm:$0xff]  ;;  %v162_v24 = vld [vmem:[#allocation4 + $0x50] sm:$0xff] }
  0x87   :  { %623 = vmatpush1.msra.mxu0 %v260_v52  ;;  %656 = vmatprep.mubr.f32.mxu0 %v6066_v1  ;;  %v164_v19 = vld [vmem:[#allocation4 + $0x60] sm:$0xff]  ;;  %v163_v22 = vld [vmem:[#allocation4 + $0x58] sm:$0xff]  ;;  %v161_v26 = vld [vmem:[#allocation4 + $0x48] sm:$0xff] }
  0x88   :  { %697 = vmatpush1.msra.mxu1 %v268_v53  ;;  %5622 = vmatmul.mubr.msk.f32.vlgmr.msra.gmra.mxu0 %vm292_vm0, %v6189_v54  ;;  %v152_v27 = vld [vmem:[#allocation4] sm:$0xff]  ;;  %v175_v30 = vld [vmem:[#allocation4 + $0xb8] sm:$0xff]  ;;  %v174_v32 = vld [vmem:[#allocation4 + $0xb0] sm:$0xff] }
  0x89   :  { %730 = vmatprep.mubr.f32.mxu1 %v6066_v1  ;;  %764 = vmatprep.subr.mxu0 %v283_v55  ;;  %v160_v28 = vld [vmem:[#allocation4 + $0x40] sm:$0xff]  ;;  %v183_v31 = vld [vmem:[#allocation4 + $0xf8] sm:$0xff]  ;;  %v182_v33 = vld [vmem:[#allocation4 + $0xf0] sm:$0xff] }
  0x8a   :  { %838 = vmatprep.subr.mxu1 %v291_v56  ;;  %5623 = vmatmul.mubr.msk.f32.vlgmr.msra.gmra.mxu1 %vm292_vm0, %v6195_v57  ;;  %v144_v29 = vld [vmem:[%s6779_s0] sm:$0xff]  ;;  %v173_v34 = vld [vmem:[#allocation4 + $0xa8] sm:$0xff]  ;;  %v170_v42 = vld [vmem:[#allocation4 + $0x90] sm:$0xff] }
  0x8b   :  { %765 = vmatpush1.msra.mxu0 %v282_v58  ;;  %839 = vmatpush1.msra.mxu1 %v290_v59  ;;  %v181_v35 = vld [vmem:[#allocation4 + $0xe8] sm:$0xff]  ;;  %v172_v37 = vld [vmem:[#allocation4 + $0xa0] sm:$0xff]  ;;  %v171_v40 = vld [vmem:[#allocation4 + $0x98] sm:$0xff] }
  0x8c   :  { %766 = vmatprep.subr.mxu0 %v281_v60  ;;  %840 = vmatprep.subr.mxu1 %v289_v61  ;;  %v180_v38 = vld [vmem:[#allocation4 + $0xe0] sm:$0xff]  ;;  %v179_v41 = vld [vmem:[#allocation4 + $0xd8] sm:$0xff]  ;;  %v178_v43 = vld [vmem:[#allocation4 + $0xd0] sm:$0xff] }
  0x8d   :  { %767 = vmatpush1.msra.mxu0 %v280_v62  ;;  %841 = vmatpush1.msra.mxu1 %v288_v63  ;;  %v169_v44 = vld [vmem:[#allocation4 + $0x88] sm:$0xff]  ;;  %v176_v46 = vld [vmem:[#allocation4 + $0xc0] sm:$0xff]  ;;  %v191_v47 = vld [vmem:[#allocation4 + $0x138] sm:$0xff] }
  0x8e   :  { %768 = vmatprep.subr.mxu0 %v279_v0  ;;  %842 = vmatprep.subr.mxu1 %v287_v2  ;;  %v177_v45 = vld [vmem:[#allocation4 + $0xc8] sm:$0xff]  ;;  %v199_v48 = vld [vmem:[#allocation4 + $0x178] sm:$0xff]  ;;  %v190_v49 = vld [vmem:[#allocation4 + $0x130] sm:$0xff] }
  0x8f   :  { %769 = vmatpush1.msra.mxu0 %v278_v3  ;;  %843 = vmatpush1.msra.mxu1 %v286_v4  ;;  %v198_v50 = vld [vmem:[#allocation4 + $0x170] sm:$0xff]  ;;  %v189_v51 = vld [vmem:[#allocation4 + $0x128] sm:$0xff]  ;;  %v188_v53 = vld [vmem:[#allocation4 + $0x120] sm:$0xff] }
  0x90   :  { %770 = vmatprep.subr.mxu0 %v277_v5  ;;  %844 = vmatprep.subr.mxu1 %v285_v6  ;;  %v197_v52 = vld [vmem:[#allocation4 + $0x168] sm:$0xff]  ;;  %v196_v55 = vld [vmem:[#allocation4 + $0x160] sm:$0xff]  ;;  %v187_v56 = vld [vmem:[#allocation4 + $0x118] sm:$0xff] }
  0x91   :  { %771 = vmatpush1.msra.mxu0 %v276_v7  ;;  %804 = vmatprep.mubr.f32.mxu0 %v6066_v1  ;;  %v195_v58 = vld [vmem:[#allocation4 + $0x158] sm:$0xff]  ;;  %v186_v59 = vld [vmem:[#allocation4 + $0x110] sm:$0xff]  ;;  %v185_v61 = vld [vmem:[#allocation4 + $0x108] sm:$0xff] }
  0x92   :  { %845 = vmatpush1.msra.mxu1 %v284_v8  ;;  %5624 = vmatmul.mubr.msk.f32.vlgmr.msra.gmra.mxu0 %vm292_vm0, %v6205_v9  ;;  %v194_v60 = vld [vmem:[#allocation4 + $0x150] sm:$0xff]  ;;  %v193_v62 = vld [vmem:[#allocation4 + $0x148] sm:$0xff]  ;;  %v184_v63 = vld [vmem:[#allocation4 + $0x100] sm:$0xff] }
  0x93   :  { %878 = vmatprep.mubr.f32.mxu1 %v6066_v1  ;;  %912 = vmatprep.subr.mxu0 %v159_v10  ;;  %v192_v0 = vld [vmem:[#allocation4 + $0x140] sm:$0xff]  ;;  %v207_v2 = vld [vmem:[#allocation4 + $0x1b8] sm:$0xff]  ;;  %v206_v4 = vld [vmem:[#allocation4 + $0x1b0] sm:$0xff] }
  0x94   :  { %986 = vmatprep.subr.mxu1 %v167_v11  ;;  %5625 = vmatmul.mubr.msk.f32.vlgmr.msra.gmra.mxu1 %vm292_vm0, %v6211_v12  ;;  %v215_v3 = vld [vmem:[#allocation4 + $0x1f8] sm:$0xff]  ;;  %v214_v5 = vld [vmem:[#allocation4 + $0x1f0] sm:$0xff]  ;;  %v205_v6 = vld [vmem:[#allocation4 + $0x1a8] sm:$0xff] }
  0x95   :  { %913 = vmatpush1.msra.mxu0 %v158_v13  ;;  %987 = vmatpush1.msra.mxu1 %v166_v14  ;;  %v213_v7 = vld [vmem:[#allocation4 + $0x1e8] sm:$0xff]  ;;  %v204_v8 = vld [vmem:[#allocation4 + $0x1a0] sm:$0xff]  ;;  %v203_v11 = vld [vmem:[#allocation4 + $0x198] sm:$0xff] }
  0x96   :  { %914 = vmatprep.subr.mxu0 %v157_v15  ;;  %988 = vmatprep.subr.mxu1 %v165_v16  ;;  %v212_v10 = vld [vmem:[#allocation4 + $0x1e0] sm:$0xff]  ;;  %v211_v13 = vld [vmem:[#allocation4 + $0x1d8] sm:$0xff]  ;;  %v202_v14 = vld [vmem:[#allocation4 + $0x190] sm:$0xff] }
  0x97   :  { %915 = vmatpush1.msra.mxu0 %v156_v17  ;;  %989 = vmatpush1.msra.mxu1 %v164_v19  ;;  %v210_v15 = vld [vmem:[#allocation4 + $0x1d0] sm:$0xff]  ;;  %v201_v16 = vld [vmem:[#allocation4 + $0x188] sm:$0xff]  ;;  %v200_v19 = vld [vmem:[#allocation4 + $0x180] sm:$0xff] }
  0x98   :  { %916 = vmatprep.subr.mxu0 %v155_v20  ;;  %990 = vmatprep.subr.mxu1 %v163_v22  ;;  %v209_v17 = vld [vmem:[#allocation4 + $0x1c8] sm:$0xff]  ;;  %v208_v20 = vld [vmem:[#allocation4 + $0x1c0] sm:$0xff]  ;;  %v1496_v22 = vld [vmem:[#allocation4 + $0x438] sm:$0xff] }
  0x99   :  { %917 = vmatpush1.msra.mxu0 %v154_v23  ;;  %991 = vmatpush1.msra.mxu1 %v162_v24  ;;  %v1504_v23 = vld [vmem:[#allocation4 + $0x478] sm:$0xff]  ;;  %v1495_v24 = vld [vmem:[#allocation4 + $0x430] sm:$0xff] }
  0x9a   :  { %918 = vmatprep.subr.mxu0 %v153_v25  ;;  %992 = vmatprep.subr.mxu1 %v161_v26  ;;  %v1503_v25 = vld [vmem:[#allocation4 + $0x470] sm:$0xff]  ;;  %v1494_v26 = vld [vmem:[#allocation4 + $0x428] sm:$0xff] }
  0x9b   :  { %919 = vmatpush1.msra.mxu0 %v152_v27  ;;  %952 = vmatprep.mubr.f32.mxu0 %v6066_v1  ;;  %v1502_v27 = vld [vmem:[#allocation4 + $0x468] sm:$0xff] }
  0x9c   :  { %993 = vmatpush1.msra.mxu1 %v160_v28  ;;  %1026 = vmatprep.mubr.f32.mxu1 %v6066_v1  ;;  %v1493_v28 = vld [vmem:[#allocation4 + $0x420] sm:$0xff] }
  0x9d   :  { %5626 = vmatmul.mubr.msk.f32.vlgmr.msra.gmra.mxu0 %vm292_vm0, %v144_v29  ;;  %5627 = vmatmul.mubr.msk.f32.vlgmr.msra.gmra.mxu1 %vm292_vm0, %v6159_v18  ;;  %v168_v18 = vld [vmem:[#allocation4 + $0x80] sm:$0xff] }
  0x9e   :  { %1060 = vmatprep.subr.mxu0 %v175_v30  ;;  %1134 = vmatprep.subr.mxu1 %v183_v31  ;;  %v1501_v29 = vld [vmem:[#allocation4 + $0x460] sm:$0xff]  ;;  %v1492_v30 = vld [vmem:[#allocation4 + $0x418] sm:$0xff] }
  0x9f   :  { %1061 = vmatpush1.msra.mxu0 %v174_v32  ;;  %1135 = vmatpush1.msra.mxu1 %v182_v33  ;;  %v1500_v31 = vld [vmem:[#allocation4 + $0x458] sm:$0xff]  ;;  %v1491_v32 = vld [vmem:[#allocation4 + $0x410] sm:$0xff] }
  0xa0   :  { %1062 = vmatprep.subr.mxu0 %v173_v34  ;;  %1136 = vmatprep.subr.mxu1 %v181_v35  ;;  %v1499_v33 = vld [vmem:[#allocation4 + $0x450] sm:$0xff]  ;;  %v1490_v34 = vld [vmem:[#allocation4 + $0x408] sm:$0xff] }
  0xa1   :  { %1063 = vmatpush1.msra.mxu0 %v172_v37  ;;  %1137 = vmatpush1.msra.mxu1 %v180_v38  ;;  %v1498_v35 = vld [vmem:[#allocation4 + $0x448] sm:$0xff]  ;;  %v1489_v37 = vld [vmem:[#allocation4 + $0x400] sm:$0xff] }
  0xa2   :  { %1064 = vmatprep.subr.mxu0 %v171_v40  ;;  %1138 = vmatprep.subr.mxu1 %v179_v41  ;;  %v1497_v38 = vld [vmem:[#allocation4 + $0x440] sm:$0xff]  ;;  %v1512_v40 = vld [vmem:[#allocation4 + $0x4b8] sm:$0xff] }
  0xa3   :  { %1065 = vmatpush1.msra.mxu0 %v170_v42  ;;  %1139 = vmatpush1.msra.mxu1 %v178_v43  ;;  %v1520_v41 = vld [vmem:[#allocation4 + $0x4f8] sm:$0xff]  ;;  %v1511_v42 = vld [vmem:[#allocation4 + $0x4b0] sm:$0xff] }
  0xa4   :  { %1066 = vmatprep.subr.mxu0 %v169_v44  ;;  %1140 = vmatprep.subr.mxu1 %v177_v45  ;;  %v1519_v43 = vld [vmem:[#allocation4 + $0x4f0] sm:$0xff]  ;;  %v1510_v44 = vld [vmem:[#allocation4 + $0x4a8] sm:$0xff] }
  0xa5   :  { %1067 = vmatpush1.msra.mxu0 %v168_v18  ;;  %1100 = vmatprep.mubr.f32.mxu0 %v6066_v1  ;;  %v1518_v45 = vld [vmem:[#allocation4 + $0x4e8] sm:$0xff]  ;;  %v1509_v18 = vld [vmem:[#allocation4 + $0x4a0] sm:$0xff] }
  0xa6   :  { %1141 = vmatpush1.msra.mxu1 %v176_v46  ;;  %1174 = vmatprep.mubr.f32.mxu1 %v6066_v1  ;;  %v1517_v46 = vld [vmem:[#allocation4 + $0x4e0] sm:$0xff] }
  0xa7   :  { %5628 = vmatmul.mubr.msk.f32.vlgmr.msra.gmra.mxu0 %vm292_vm0, %v6164_v21  ;;  %5629 = vmatmul.mubr.msk.f32.vlgmr.msra.gmra.mxu1 %vm292_vm0, %v6173_v36 }
  0xa8   :  { %1208 = vmatprep.subr.mxu0 %v191_v47  ;;  %1282 = vmatprep.subr.mxu1 %v199_v48  ;;  %v1508_v47 = vld [vmem:[#allocation4 + $0x498] sm:$0xff] }
  0xa9   :  { %1209 = vmatpush1.msra.mxu0 %v190_v49  ;;  %1283 = vmatpush1.msra.mxu1 %v198_v50  ;;  %v1516_v48 = vld [vmem:[#allocation4 + $0x4d8] sm:$0xff]  ;;  %v1507_v49 = vld [vmem:[#allocation4 + $0x490] sm:$0xff] }
  0xaa   :  { %1210 = vmatprep.subr.mxu0 %v189_v51  ;;  %1284 = vmatprep.subr.mxu1 %v197_v52  ;;  %v1515_v50 = vld [vmem:[#allocation4 + $0x4d0] sm:$0xff]  ;;  %v1514_v51 = vld [vmem:[#allocation4 + $0x4c8] sm:$0xff]  ;;  %v1505_v52 = vld [vmem:[#allocation4 + $0x480] sm:$0xff] }
  0xab   :  { %1211 = vmatpush1.msra.mxu0 %v188_v53  ;;  %1285 = vmatpush1.msra.mxu1 %v196_v55  ;;  %v1513_v53 = vld [vmem:[#allocation4 + $0x4c0] sm:$0xff]  ;;  %v1528_v55 = vld [vmem:[#allocation4 + $0x538] sm:$0xff] }
  0xac   :  { %1212 = vmatprep.subr.mxu0 %v187_v56  ;;  %1286 = vmatprep.subr.mxu1 %v195_v58  ;;  %v1536_v56 = vld [vmem:[#allocation4 + $0x578] sm:$0xff]  ;;  %v1527_v58 = vld [vmem:[#allocation4 + $0x530] sm:$0xff] }
  0xad   :  { %1213 = vmatpush1.msra.mxu0 %v186_v59  ;;  %1287 = vmatpush1.msra.mxu1 %v194_v60  ;;  %v1535_v59 = vld [vmem:[#allocation4 + $0x570] sm:$0xff]  ;;  %v1526_v60 = vld [vmem:[#allocation4 + $0x528] sm:$0xff] }
  0xae   :  { %1214 = vmatprep.subr.mxu0 %v185_v61  ;;  %1288 = vmatprep.subr.mxu1 %v193_v62  ;;  %v1534_v61 = vld [vmem:[#allocation4 + $0x568] sm:$0xff]  ;;  %v1525_v62 = vld [vmem:[#allocation4 + $0x520] sm:$0xff] }
  0xaf   :  { %1215 = vmatpush1.msra.mxu0 %v184_v63  ;;  %1248 = vmatprep.mubr.f32.mxu0 %v6066_v1  ;;  %v1533_v63 = vld [vmem:[#allocation4 + $0x560] sm:$0xff] }
  0xb0   :  { %1289 = vmatpush1.msra.mxu1 %v192_v0  ;;  %1322 = vmatprep.mubr.f32.mxu1 %v6066_v1  ;;  %v1524_v0 = vld [vmem:[#allocation4 + $0x518] sm:$0xff] }
  0xb1   :  { %5630 = vmatmul.mubr.msk.f32.vlgmr.msra.gmra.mxu0 %vm292_vm0, %v6179_v39  ;;  %5631 = vmatmul.mubr.msk.f32.vlgmr.msra.gmra.mxu1 %vm292_vm0, %v6189_v54 }
  0xb2   :  { %1356 = vmatprep.subr.mxu0 %v207_v2  ;;  %1430 = vmatprep.subr.mxu1 %v215_v3  ;;  %v1532_v2 = vld [vmem:[#allocation4 + $0x558] sm:$0xff]  ;;  %v1523_v3 = vld [vmem:[#allocation4 + $0x510] sm:$0xff] }
  0xb3   :  { %1357 = vmatpush1.msra.mxu0 %v206_v4  ;;  %1431 = vmatpush1.msra.mxu1 %v214_v5  ;;  %v1531_v4 = vld [vmem:[#allocation4 + $0x550] sm:$0xff]  ;;  %v1522_v5 = vld [vmem:[#allocation4 + $0x508] sm:$0xff] }
  0xb4   :  { %1358 = vmatprep.subr.mxu0 %v205_v6  ;;  %1432 = vmatprep.subr.mxu1 %v213_v7  ;;  %v1530_v6 = vld [vmem:[#allocation4 + $0x548] sm:$0xff]  ;;  %v1521_v7 = vld [vmem:[#allocation4 + $0x500] sm:$0xff] }
  0xb5   :  { %1359 = vmatpush1.msra.mxu0 %v204_v8  ;;  %1433 = vmatpush1.msra.mxu1 %v212_v10  ;;  %v1529_v8 = vld [vmem:[#allocation4 + $0x540] sm:$0xff]  ;;  %v1544_v10 = vld [vmem:[#allocation4 + $0x5b8] sm:$0xff] }
  0xb6   :  { %1360 = vmatprep.subr.mxu0 %v203_v11  ;;  %1434 = vmatprep.subr.mxu1 %v211_v13  ;;  %v1552_v11 = vld [vmem:[#allocation4 + $0x5f8] sm:$0xff]  ;;  %v1543_v13 = vld [vmem:[#allocation4 + $0x5b0] sm:$0xff] }
  0xb7   :  { %1361 = vmatpush1.msra.mxu0 %v202_v14  ;;  %1435 = vmatpush1.msra.mxu1 %v210_v15  ;;  %v1551_v14 = vld [vmem:[#allocation4 + $0x5f0] sm:$0xff]  ;;  %v1542_v15 = vld [vmem:[#allocation4 + $0x5a8] sm:$0xff] }
  0xb8   :  { %1362 = vmatprep.subr.mxu0 %v201_v16  ;;  %1436 = vmatprep.subr.mxu1 %v209_v17  ;;  %v1550_v16 = vld [vmem:[#allocation4 + $0x5e8] sm:$0xff]  ;;  %v1541_v17 = vld [vmem:[#allocation4 + $0x5a0] sm:$0xff] }
  0xb9   :  { %1363 = vmatpush1.msra.mxu0 %v200_v19  ;;  %1396 = vmatprep.mubr.f32.mxu0 %v6066_v1  ;;  %v1549_v19 = vld [vmem:[#allocation4 + $0x5e0] sm:$0xff] }
  0xba   :  { %1437 = vmatpush1.msra.mxu1 %v208_v20  ;;  %1470 = vmatprep.mubr.f32.mxu1 %v6066_v1  ;;  %v1540_v20 = vld [vmem:[#allocation4 + $0x598] sm:$0xff] }
  0xbb   :  { %5632 = vmatmul.mubr.msk.f32.vlgmr.msra.gmra.mxu0 %vm292_vm0, %v6195_v57  ;;  %5633 = vmatmul.mubr.msk.f32.vlgmr.msra.gmra.mxu1 %vm292_vm0, %v6205_v9 }
  0xbc   :  { %1580 = vmatprep.subr.mxu0 %v1496_v22  ;;  %1654 = vmatprep.subr.mxu1 %v1504_v23  ;;  %v1548_v22 = vld [vmem:[#allocation4 + $0x5d8] sm:$0xff]  ;;  %v1539_v23 = vld [vmem:[#allocation4 + $0x590] sm:$0xff] }
  0xbd   :  { %1581 = vmatpush1.msra.mxu0 %v1495_v24  ;;  %1655 = vmatpush1.msra.mxu1 %v1503_v25  ;;  %v1547_v24 = vld [vmem:[#allocation4 + $0x5d0] sm:$0xff]  ;;  %v1538_v25 = vld [vmem:[#allocation4 + $0x588] sm:$0xff] }
  0xbe   :  { %1582 = vmatprep.subr.mxu0 %v1494_v26  ;;  %1656 = vmatprep.subr.mxu1 %v1502_v27  ;;  %v1546_v26 = vld [vmem:[#allocation4 + $0x5c8] sm:$0xff]  ;;  %v1537_v27 = vld [vmem:[#allocation4 + $0x580] sm:$0xff] }
  0xbf   :  { %1583 = vmatpush1.msra.mxu0 %v1493_v28  ;;  %1657 = vmatpush1.msra.mxu1 %v1501_v29  ;;  %v1545_v28 = vld [vmem:[#allocation4 + $0x5c0] sm:$0xff] }
  0xc0   :  { %1584 = vmatprep.subr.mxu0 %v1492_v30  ;;  %1658 = vmatprep.subr.mxu1 %v1500_v31  ;;  %v6265_v29 = vld [vmem:[%s6779_s0 + $0x48] sm:$0xff]  ;;  %v2180_v30 = vld [vmem:[#allocation4 + $0x638] sm:$0xff] }
  0xc1   :  { %1585 = vmatpush1.msra.mxu0 %v1491_v32  ;;  %1659 = vmatpush1.msra.mxu1 %v1499_v33  ;;  %v2188_v31 = vld [vmem:[#allocation4 + $0x678] sm:$0xff]  ;;  %v2179_v32 = vld [vmem:[#allocation4 + $0x630] sm:$0xff] }
  0xc2   :  { %1586 = vmatprep.subr.mxu0 %v1490_v34  ;;  %1660 = vmatprep.subr.mxu1 %v1498_v35  ;;  %v2187_v33 = vld [vmem:[#allocation4 + $0x670] sm:$0xff]  ;;  %v2178_v34 = vld [vmem:[#allocation4 + $0x628] sm:$0xff] }
  0xc3   :  { %1587 = vmatpush1.msra.mxu0 %v1489_v37  ;;  %1620 = vmatprep.mubr.f32.mxu0 %v6066_v1  ;;  %v2186_v35 = vld [vmem:[#allocation4 + $0x668] sm:$0xff]  ;;  %v2177_v37 = vld [vmem:[#allocation4 + $0x620] sm:$0xff] }
  0xc4   :  { %1661 = vmatpush1.msra.mxu1 %v1497_v38  ;;  %1694 = vmatprep.mubr.f32.mxu1 %v6066_v1  ;;  %v2185_v38 = vld [vmem:[#allocation4 + $0x660] sm:$0xff] }
  0xc5   :  { %5642 = vmatmul.mubr.msk.f32.vlgmr.msra.gmra.mxu0 %vm292_vm0, %v6164_v21  ;;  %5643 = vmatmul.mubr.msk.f32.vlgmr.msra.gmra.mxu1 %vm292_vm0, %v6173_v36  ;;  %v1506_v21 = vld [vmem:[#allocation4 + $0x488] sm:$0xff] }
  0xc6   :  { %1728 = vmatprep.subr.mxu0 %v1512_v40  ;;  %1802 = vmatprep.subr.mxu1 %v1520_v41  ;;  %v2176_v40 = vld [vmem:[#allocation4 + $0x618] sm:$0xff] }
  0xc7   :  { %1729 = vmatpush1.msra.mxu0 %v1511_v42  ;;  %1803 = vmatpush1.msra.mxu1 %v1519_v43  ;;  %v2184_v41 = vld [vmem:[#allocation4 + $0x658] sm:$0xff]  ;;  %v2175_v42 = vld [vmem:[#allocation4 + $0x610] sm:$0xff] }
  0xc8   :  { %1730 = vmatprep.subr.mxu0 %v1510_v44  ;;  %1804 = vmatprep.subr.mxu1 %v1518_v45  ;;  %v2183_v43 = vld [vmem:[#allocation4 + $0x650] sm:$0xff]  ;;  %v2174_v44 = vld [vmem:[#allocation4 + $0x608] sm:$0xff] }
  0xc9   :  { %1731 = vmatpush1.msra.mxu0 %v1509_v18  ;;  %1805 = vmatpush1.msra.mxu1 %v1517_v46  ;;  %v2182_v45 = vld [vmem:[#allocation4 + $0x648] sm:$0xff]  ;;  %v2173_v18 = vld [vmem:[#allocation4 + $0x600] sm:$0xff] }
  0xca   :  { %1732 = vmatprep.subr.mxu0 %v1508_v47  ;;  %1806 = vmatprep.subr.mxu1 %v1516_v48  ;;  %v2181_v46 = vld [vmem:[#allocation4 + $0x640] sm:$0xff]  ;;  %v2196_v47 = vld [vmem:[#allocation4 + $0x6b8] sm:$0xff] }
  0xcb   :  { %1733 = vmatpush1.msra.mxu0 %v1507_v49  ;;  %1807 = vmatpush1.msra.mxu1 %v1515_v50  ;;  %v2204_v48 = vld [vmem:[#allocation4 + $0x6f8] sm:$0xff]  ;;  %v2195_v49 = vld [vmem:[#allocation4 + $0x6b0] sm:$0xff] }
  0xcc   :  { %1734 = vmatprep.subr.mxu0 %v1506_v21  ;;  %1808 = vmatprep.subr.mxu1 %v1514_v51  ;;  %v2203_v50 = vld [vmem:[#allocation4 + $0x6f0] sm:$0xff]  ;;  %v2194_v21 = vld [vmem:[#allocation4 + $0x6a8] sm:$0xff] }
  0xcd   :  { %1735 = vmatpush1.msra.mxu0 %v1505_v52  ;;  %1768 = vmatprep.mubr.f32.mxu0 %v6066_v1  ;;  %v2202_v51 = vld [vmem:[#allocation4 + $0x6e8] sm:$0xff]  ;;  %v2193_v52 = vld [vmem:[#allocation4 + $0x6a0] sm:$0xff] }
  0xce   :  { %1809 = vmatpush1.msra.mxu1 %v1513_v53  ;;  %1842 = vmatprep.mubr.f32.mxu1 %v6066_v1  ;;  %v2201_v53 = vld [vmem:[#allocation4 + $0x6e0] sm:$0xff] }
  0xcf   :  { %5644 = vmatmul.mubr.msk.f32.vlgmr.msra.gmra.mxu0 %vm292_vm0, %v6179_v39  ;;  %5645 = vmatmul.mubr.msk.f32.vlgmr.msra.gmra.mxu1 %vm292_vm0, %v6189_v54 }
  0xd0   :  { %1876 = vmatprep.subr.mxu0 %v1528_v55  ;;  %1950 = vmatprep.subr.mxu1 %v1536_v56  ;;  %v2192_v55 = vld [vmem:[#allocation4 + $0x698] sm:$0xff] }
  0xd1   :  { %1877 = vmatpush1.msra.mxu0 %v1527_v58  ;;  %1951 = vmatpush1.msra.mxu1 %v1535_v59  ;;  %v2200_v56 = vld [vmem:[#allocation4 + $0x6d8] sm:$0xff]  ;;  %v2191_v58 = vld [vmem:[#allocation4 + $0x690] sm:$0xff] }
  0xd2   :  { %1878 = vmatprep.subr.mxu0 %v1526_v60  ;;  %1952 = vmatprep.subr.mxu1 %v1534_v61  ;;  %v2199_v59 = vld [vmem:[#allocation4 + $0x6d0] sm:$0xff]  ;;  %v2198_v60 = vld [vmem:[#allocation4 + $0x6c8] sm:$0xff]  ;;  %v2197_v61 = vld [vmem:[#allocation4 + $0x6c0] sm:$0xff] }
  0xd3   :  { %1879 = vmatpush1.msra.mxu0 %v1525_v62  ;;  %1953 = vmatpush1.msra.mxu1 %v1533_v63  ;;  %v2212_v62 = vld [vmem:[#allocation4 + $0x738] sm:$0xff] }
  0xd4   :  { %1880 = vmatprep.subr.mxu0 %v1524_v0  ;;  %1954 = vmatprep.subr.mxu1 %v1532_v2  ;;  %v2220_v63 = vld [vmem:[#allocation4 + $0x778] sm:$0xff]  ;;  %v2211_v0 = vld [vmem:[#allocation4 + $0x730] sm:$0xff] }
  0xd5   :  { %1881 = vmatpush1.msra.mxu0 %v1523_v3  ;;  %1955 = vmatpush1.msra.mxu1 %v1531_v4  ;;  %v2219_v2 = vld [vmem:[#allocation4 + $0x770] sm:$0xff]  ;;  %v2210_v3 = vld [vmem:[#allocation4 + $0x728] sm:$0xff] }
  0xd6   :  { %1882 = vmatprep.subr.mxu0 %v1522_v5  ;;  %1956 = vmatprep.subr.mxu1 %v1530_v6  ;;  %v2218_v4 = vld [vmem:[#allocation4 + $0x768] sm:$0xff]  ;;  %v2209_v5 = vld [vmem:[#allocation4 + $0x720] sm:$0xff] }
  0xd7   :  { %1883 = vmatpush1.msra.mxu0 %v1521_v7  ;;  %1916 = vmatprep.mubr.f32.mxu0 %v6066_v1  ;;  %v2217_v6 = vld [vmem:[#allocation4 + $0x760] sm:$0xff]  ;;  %v2208_v7 = vld [vmem:[#allocation4 + $0x718] sm:$0xff] }
  0xd8   :  { %1957 = vmatpush1.msra.mxu1 %v1529_v8  ;;  %1990 = vmatprep.mubr.f32.mxu1 %v6066_v1  ;;  %v2216_v8 = vld [vmem:[#allocation4 + $0x758] sm:$0xff] }
  0xd9   :  { %5646 = vmatmul.mubr.msk.f32.vlgmr.msra.gmra.mxu0 %vm292_vm0, %v6195_v57  ;;  %5647 = vmatmul.mubr.msk.f32.vlgmr.msra.gmra.mxu1 %vm292_vm0, %v6205_v9 }
  0xda   :  { %2024 = vmatprep.subr.mxu0 %v1544_v10  ;;  %2098 = vmatprep.subr.mxu1 %v1552_v11  ;;  %v2207_v10 = vld [vmem:[#allocation4 + $0x710] sm:$0xff] }
  0xdb   :  { %2025 = vmatpush1.msra.mxu0 %v1543_v13  ;;  %2099 = vmatpush1.msra.mxu1 %v1551_v14  ;;  %v2215_v11 = vld [vmem:[#allocation4 + $0x750] sm:$0xff]  ;;  %v2214_v13 = vld [vmem:[#allocation4 + $0x748] sm:$0xff]  ;;  %v2213_v14 = vld [vmem:[#allocation4 + $0x740] sm:$0xff] }
  0xdc   :  { %2026 = vmatprep.subr.mxu0 %v1542_v15  ;;  %2100 = vmatprep.subr.mxu1 %v1550_v16  ;;  %v2228_v15 = vld [vmem:[#allocation4 + $0x7b8] sm:$0xff] }
  0xdd   :  { %2027 = vmatpush1.msra.mxu0 %v1541_v17  ;;  %2101 = vmatpush1.msra.mxu1 %v1549_v19  ;;  %v2236_v16 = vld [vmem:[#allocation4 + $0x7f8] sm:$0xff]  ;;  %v2227_v17 = vld [vmem:[#allocation4 + $0x7b0] sm:$0xff] }
  0xde   :  { %2028 = vmatprep.subr.mxu0 %v1540_v20  ;;  %2102 = vmatprep.subr.mxu1 %v1548_v22  ;;  %v2235_v19 = vld [vmem:[#allocation4 + $0x7f0] sm:$0xff]  ;;  %v2226_v20 = vld [vmem:[#allocation4 + $0x7a8] sm:$0xff] }
  0xdf   :  { %2029 = vmatpush1.msra.mxu0 %v1539_v23  ;;  %2103 = vmatpush1.msra.mxu1 %v1547_v24  ;;  %v2234_v22 = vld [vmem:[#allocation4 + $0x7e8] sm:$0xff]  ;;  %v2225_v23 = vld [vmem:[#allocation4 + $0x7a0] sm:$0xff] }
  0xe0   :  { %2030 = vmatprep.subr.mxu0 %v1538_v25  ;;  %2104 = vmatprep.subr.mxu1 %v1546_v26  ;;  %v2233_v24 = vld [vmem:[#allocation4 + $0x7e0] sm:$0xff]  ;;  %v2224_v25 = vld [vmem:[#allocation4 + $0x798] sm:$0xff] }
  0xe1   :  { %2031 = vmatpush1.msra.mxu0 %v1537_v27  ;;  %2064 = vmatprep.mubr.f32.mxu0 %v6066_v1  ;;  %v2232_v26 = vld [vmem:[#allocation4 + $0x7d8] sm:$0xff]  ;;  %v2223_v27 = vld [vmem:[#allocation4 + $0x790] sm:$0xff] }
  0xe2   :  { %2105 = vmatpush1.msra.mxu1 %v1545_v28  ;;  %2138 = vmatprep.mubr.f32.mxu1 %v6066_v1  ;;  %v2231_v28 = vld [vmem:[#allocation4 + $0x7d0] sm:$0xff] }
  0xe3   :  { %5648 = vmatmul.mubr.msk.f32.vlgmr.msra.gmra.mxu0 %vm292_vm0, %v6211_v12  ;;  %5649 = vmatmul.mubr.msk.f32.vlgmr.msra.gmra.mxu1 %vm292_vm0, %v6265_v29 }
  0xe4   :  { %2264 = vmatprep.subr.mxu0 %v2180_v30  ;;  %2338 = vmatprep.subr.mxu1 %v2188_v31  ;;  %v2230_v30 = vld [vmem:[#allocation4 + $0x7c8] sm:$0xff]  ;;  %v2229_v31 = vld [vmem:[#allocation4 + $0x7c0] sm:$0xff] }
  0xe5   :  { %2265 = vmatpush1.msra.mxu0 %v2179_v32  ;;  %2339 = vmatpush1.msra.mxu1 %v2187_v33  ;;  %v6294_v32 = vld [vmem:[%s6779_s0 + $0x50] sm:$0xff]  ;;  %v2864_v33 = vld [vmem:[#allocation4 + $0x838] sm:$0xff] }
  0xe6   :  { %2266 = vmatprep.subr.mxu0 %v2178_v34  ;;  %2340 = vmatprep.subr.mxu1 %v2186_v35  ;;  %v2872_v34 = vld [vmem:[#allocation4 + $0x878] sm:$0xff]  ;;  %v2863_v35 = vld [vmem:[#allocation4 + $0x830] sm:$0xff] }
  0xe7   :  { %2267 = vmatpush1.msra.mxu0 %v2177_v37  ;;  %2341 = vmatpush1.msra.mxu1 %v2185_v38  ;;  %v2871_v37 = vld [vmem:[#allocation4 + $0x870] sm:$0xff]  ;;  %v2862_v38 = vld [vmem:[#allocation4 + $0x828] sm:$0xff] }
  0xe8   :  { %2268 = vmatprep.subr.mxu0 %v2176_v40  ;;  %2342 = vmatprep.subr.mxu1 %v2184_v41  ;;  %v2870_v40 = vld [vmem:[#allocation4 + $0x868] sm:$0xff]  ;;  %v2861_v41 = vld [vmem:[#allocation4 + $0x820] sm:$0xff] }
  0xe9   :  { %2269 = vmatpush1.msra.mxu0 %v2175_v42  ;;  %2343 = vmatpush1.msra.mxu1 %v2183_v43  ;;  %v2869_v42 = vld [vmem:[#allocation4 + $0x860] sm:$0xff]  ;;  %v2860_v43 = vld [vmem:[#allocation4 + $0x818] sm:$0xff] }
  0xea   :  { %2270 = vmatprep.subr.mxu0 %v2174_v44  ;;  %2344 = vmatprep.subr.mxu1 %v2182_v45  ;;  %v2868_v44 = vld [vmem:[#allocation4 + $0x858] sm:$0xff]  ;;  %v2859_v45 = vld [vmem:[#allocation4 + $0x810] sm:$0xff] }
  0xeb   :  { %2271 = vmatpush1.msra.mxu0 %v2173_v18  ;;  %2304 = vmatprep.mubr.f32.mxu0 %v6066_v1  ;;  %v2867_v18 = vld [vmem:[#allocation4 + $0x850] sm:$0xff] }
  0xec   :  { %2345 = vmatpush1.msra.mxu1 %v2181_v46  ;;  %2378 = vmatprep.mubr.f32.mxu1 %v6066_v1  ;;  %v2858_v46 = vld [vmem:[#allocation4 + $0x808] sm:$0xff] }
  0xed   :  { %5658 = vmatmul.mubr.msk.f32.vlgmr.msra.gmra.mxu0 %vm292_vm0, %v6173_v36  ;;  %5659 = vmatmul.mubr.msk.f32.vlgmr.msra.gmra.mxu1 %vm292_vm0, %v6179_v39  ;;  %v2190_v36 = vld [vmem:[#allocation4 + $0x688] sm:$0xff]  ;;  %v2189_v39 = vld [vmem:[#allocation4 + $0x680] sm:$0xff] }
  0xee   :  { %2412 = vmatprep.subr.mxu0 %v2196_v47  ;;  %2486 = vmatprep.subr.mxu1 %v2204_v48  ;;  %v2866_v47 = vld [vmem:[#allocation4 + $0x848] sm:$0xff]  ;;  %v2857_v48 = vld [vmem:[#allocation4 + $0x800] sm:$0xff] }
  0xef   :  { %2413 = vmatpush1.msra.mxu0 %v2195_v49  ;;  %2487 = vmatpush1.msra.mxu1 %v2203_v50  ;;  %v2865_v49 = vld [vmem:[#allocation4 + $0x840] sm:$0xff] }
  0xf0   :  { %2414 = vmatprep.subr.mxu0 %v2194_v21  ;;  %2488 = vmatprep.subr.mxu1 %v2202_v51  ;;  %v5666_v50 = vld [vmem:[%s6779_s0 + $0x20] sm:$0xff]  ;;  %v6308_v21 = vld [vmem:[%s6779_s0 + $0x28] sm:$0xff] }
  0xf1   :  { %2415 = vmatpush1.msra.mxu0 %v2193_v52  ;;  %2489 = vmatpush1.msra.mxu1 %v2201_v53  ;;  %v2880_v51 = vld [vmem:[#allocation4 + $0x8b8] sm:$0xff]  ;;  %v2879_v53 = vld [vmem:[#allocation4 + $0x8b0] sm:$0xff] }
  0xf2   :  { %2416 = vmatprep.subr.mxu0 %v2192_v55  ;;  %2490 = vmatprep.subr.mxu1 %v2200_v56  ;;  %v2888_v52 = vld [vmem:[#allocation4 + $0x8f8] sm:$0xff]  ;;  %v2887_v55 = vld [vmem:[#allocation4 + $0x8f0] sm:$0xff]  ;;  %v2878_v56 = vld [vmem:[#allocation4 + $0x8a8] sm:$0xff] }
  0xf3   :  { %2417 = vmatpush1.msra.mxu0 %v2191_v58  ;;  %2491 = vmatpush1.msra.mxu1 %v2199_v59  ;;  %v2886_v58 = vld [vmem:[#allocation4 + $0x8e8] sm:$0xff]  ;;  %v2877_v59 = vld [vmem:[#allocation4 + $0x8a0] sm:$0xff] }
  0xf4   :  { %2418 = vmatprep.subr.mxu0 %v2190_v36  ;;  %2492 = vmatprep.subr.mxu1 %v2198_v60  ;;  %v2885_v36 = vld [vmem:[#allocation4 + $0x8e0] sm:$0xff]  ;;  %v2876_v60 = vld [vmem:[#allocation4 + $0x898] sm:$0xff] }
  0xf5   :  { %2419 = vmatpush1.msra.mxu0 %v2189_v39  ;;  %2452 = vmatprep.mubr.f32.mxu0 %v6066_v1  ;;  %v2884_v39 = vld [vmem:[#allocation4 + $0x8d8] sm:$0xff] }
  0xf6   :  { %2493 = vmatpush1.msra.mxu1 %v2197_v61  ;;  %2526 = vmatprep.mubr.f32.mxu1 %v6066_v1  ;;  %v2875_v61 = vld [vmem:[#allocation4 + $0x890] sm:$0xff] }
  0xf7   :  { %5660 = vmatmul.mubr.msk.f32.vlgmr.msra.gmra.mxu0 %vm292_vm0, %v6189_v54  ;;  %5661 = vmatmul.mubr.msk.f32.vlgmr.msra.gmra.mxu1 %vm292_vm0, %v6195_v57  ;;  %v2206_v54 = vld [vmem:[#allocation4 + $0x708] sm:$0xff]  ;;  %v2205_v57 = vld [vmem:[#allocation4 + $0x700] sm:$0xff] }
  0xf8   :  { %2560 = vmatprep.subr.mxu0 %v2212_v62  ;;  %2634 = vmatprep.subr.mxu1 %v2220_v63  ;;  %v2883_v62 = vld [vmem:[#allocation4 + $0x8d0] sm:$0xff]  ;;  %v2874_v63 = vld [vmem:[#allocation4 + $0x888] sm:$0xff] }
  0xf9   :  { %2561 = vmatpush1.msra.mxu0 %v2211_v0  ;;  %2635 = vmatpush1.msra.mxu1 %v2219_v2  ;;  %v2882_v0 = vld [vmem:[#allocation4 + $0x8c8] sm:$0xff]  ;;  %v2873_v2 = vld [vmem:[#allocation4 + $0x880] sm:$0xff] }
  0xfa   :  { %2562 = vmatprep.subr.mxu0 %v2210_v3  ;;  %2636 = vmatprep.subr.mxu1 %v2218_v4  ;;  %v2881_v3 = vld [vmem:[#allocation4 + $0x8c0] sm:$0xff]  ;;  %v6318_v4 = vld [vmem:[%s6779_s0 + $0x30] sm:$0xff] }
  0xfb   :  { %2563 = vmatpush1.msra.mxu0 %v2209_v5  ;;  %2637 = vmatpush1.msra.mxu1 %v2217_v6  ;;  %v6323_v5 = vld [vmem:[%s6779_s0 + $0x38] sm:$0xff] }
  0xfc   :  { %2564 = vmatprep.subr.mxu0 %v2208_v7  ;;  %2638 = vmatprep.subr.mxu1 %v2216_v8  ;;  %v2896_v6 = vld [vmem:[#allocation4 + $0x938] sm:$0xff]  ;;  %v2895_v8 = vld [vmem:[#allocation4 + $0x930] sm:$0xff] }
  0xfd   :  { %2565 = vmatpush1.msra.mxu0 %v2207_v10  ;;  %2639 = vmatpush1.msra.mxu1 %v2215_v11  ;;  %v2904_v7 = vld [vmem:[#allocation4 + $0x978] sm:$0xff]  ;;  %v2903_v10 = vld [vmem:[#allocation4 + $0x970] sm:$0xff]  ;;  %v2894_v11 = vld [vmem:[#allocation4 + $0x928] sm:$0xff] }
  0xfe   :  { %2566 = vmatprep.subr.mxu0 %v2206_v54  ;;  %2640 = vmatprep.subr.mxu1 %v2214_v13  ;;  %v2902_v54 = vld [vmem:[#allocation4 + $0x968] sm:$0xff]  ;;  %v2893_v13 = vld [vmem:[#allocation4 + $0x920] sm:$0xff] }
  0xff   :  { %2567 = vmatpush1.msra.mxu0 %v2205_v57  ;;  %2600 = vmatprep.mubr.f32.mxu0 %v6066_v1  ;;  %v2901_v57 = vld [vmem:[#allocation4 + $0x960] sm:$0xff] }
 0x100   :  { %2641 = vmatpush1.msra.mxu1 %v2213_v14  ;;  %2674 = vmatprep.mubr.f32.mxu1 %v6066_v1  ;;  %v2892_v14 = vld [vmem:[#allocation4 + $0x918] sm:$0xff] }
 0x101   :  { %5662 = vmatmul.mubr.msk.f32.vlgmr.msra.gmra.mxu0 %vm292_vm0, %v6205_v9  ;;  %5663 = vmatmul.mubr.msk.f32.vlgmr.msra.gmra.mxu1 %vm292_vm0, %v6211_v12  ;;  %v2222_v9 = vld [vmem:[#allocation4 + $0x788] sm:$0xff]  ;;  %v2221_v12 = vld [vmem:[#allocation4 + $0x780] sm:$0xff] }
 0x102   :  { %2708 = vmatprep.subr.mxu0 %v2228_v15  ;;  %2782 = vmatprep.subr.mxu1 %v2236_v16  ;;  %v2900_v15 = vld [vmem:[#allocation4 + $0x958] sm:$0xff]  ;;  %v2891_v16 = vld [vmem:[#allocation4 + $0x910] sm:$0xff] }
 0x103   :  { %2709 = vmatpush1.msra.mxu0 %v2227_v17  ;;  %2783 = vmatpush1.msra.mxu1 %v2235_v19  ;;  %v2899_v17 = vld [vmem:[#allocation4 + $0x950] sm:$0xff]  ;;  %v2890_v19 = vld [vmem:[#allocation4 + $0x908] sm:$0xff] }
 0x104   :  { %2710 = vmatprep.subr.mxu0 %v2226_v20  ;;  %2784 = vmatprep.subr.mxu1 %v2234_v22  ;;  %v2898_v20 = vld [vmem:[#allocation4 + $0x948] sm:$0xff]  ;;  %v2889_v22 = vld [vmem:[#allocation4 + $0x900] sm:$0xff] }
 0x105   :  { %2711 = vmatpush1.msra.mxu0 %v2225_v23  ;;  %2785 = vmatpush1.msra.mxu1 %v2233_v24  ;;  %v2897_v23 = vld [vmem:[#allocation4 + $0x940] sm:$0xff] }
 0x106   :  { %2712 = vmatprep.subr.mxu0 %v2224_v25  ;;  %2786 = vmatprep.subr.mxu1 %v2232_v26  ;;  %v6334_v24 = vld [vmem:[%s6779_s0 + $0x40] sm:$0xff] }
 0x107   :  { %2713 = vmatpush1.msra.mxu0 %v2223_v27  ;;  %2787 = vmatpush1.msra.mxu1 %v2231_v28  ;;  %v2912_v25 = vld [vmem:[#allocation4 + $0x9b8] sm:$0xff]  ;;  %v2911_v27 = vld [vmem:[#allocation4 + $0x9b0] sm:$0xff] }
 0x108   :  { %2714 = vmatprep.subr.mxu0 %v2222_v9  ;;  %2788 = vmatprep.subr.mxu1 %v2230_v30  ;;  %v2920_v26 = vld [vmem:[#allocation4 + $0x9f8] sm:$0xff]  ;;  %v2919_v28 = vld [vmem:[#allocation4 + $0x9f0] sm:$0xff]  ;;  %v2910_v9 = vld [vmem:[#allocation4 + $0x9a8] sm:$0xff] }
 0x109   :  { %2715 = vmatpush1.msra.mxu0 %v2221_v12  ;;  %2748 = vmatprep.mubr.f32.mxu0 %v6066_v1  ;;  %v2918_v30 = vld [vmem:[#allocation4 + $0x9e8] sm:$0xff]  ;;  %v2909_v12 = vld [vmem:[#allocation4 + $0x9a0] sm:$0xff] }
 0x10a   :  { %2789 = vmatpush1.msra.mxu1 %v2229_v31  ;;  %2822 = vmatprep.mubr.f32.mxu1 %v6066_v1  ;;  %v2917_v31 = vld [vmem:[#allocation4 + $0x9e0] sm:$0xff] }
 0x10b   :  { %5664 = vmatmul.mubr.msk.f32.vlgmr.msra.gmra.mxu0 %vm292_vm0, %v6265_v29  ;;  %5665 = vmatmul.mubr.msk.f32.vlgmr.msra.gmra.mxu1 %vm292_vm0, %v6294_v32 }
 0x10c   :  { %2948 = vmatprep.subr.mxu0 %v2864_v33  ;;  %3022 = vmatprep.subr.mxu1 %v2872_v34  ;;  %v2908_v33 = vld [vmem:[#allocation4 + $0x998] sm:$0xff] }
 0x10d   :  { %2949 = vmatpush1.msra.mxu0 %v2863_v35  ;;  %3023 = vmatpush1.msra.mxu1 %v2871_v37  ;;  %v2916_v34 = vld [vmem:[#allocation4 + $0x9d8] sm:$0xff]  ;;  %v2907_v35 = vld [vmem:[#allocation4 + $0x990] sm:$0xff] }
 0x10e   :  { %2950 = vmatprep.subr.mxu0 %v2862_v38  ;;  %3024 = vmatprep.subr.mxu1 %v2870_v40  ;;  %v2915_v37 = vld [vmem:[#allocation4 + $0x9d0] sm:$0xff]  ;;  %v2906_v38 = vld [vmem:[#allocation4 + $0x988] sm:$0xff] }
 0x10f   :  { %2951 = vmatpush1.msra.mxu0 %v2861_v41  ;;  %3025 = vmatpush1.msra.mxu1 %v2869_v42  ;;  %v2914_v40 = vld [vmem:[#allocation4 + $0x9c8] sm:$0xff]  ;;  %v2905_v41 = vld [vmem:[#allocation4 + $0x980] sm:$0xff] }
 0x110   :  { %2952 = vmatprep.subr.mxu0 %v2860_v43  ;;  %3026 = vmatprep.subr.mxu1 %v2868_v44  ;;  %v2913_v42 = vld [vmem:[#allocation4 + $0x9c0] sm:$0xff]  ;;  %v6345_v43 = vld [vmem:[%s6779_s0 + $0x58] sm:$0xff] }
 0x111   :  { %2953 = vmatpush1.msra.mxu0 %v2859_v45  ;;  %3027 = vmatpush1.msra.mxu1 %v2867_v18  ;;  %v3548_v44 = vld [vmem:[#allocation4 + $0xa38] sm:$0xff]  ;;  %v3547_v18 = vld [vmem:[#allocation4 + $0xa30] sm:$0xff] }
 0x112   :  { %2954 = vmatprep.subr.mxu0 %v2858_v46  ;;  %3028 = vmatprep.subr.mxu1 %v2866_v47  ;;  %v3556_v45 = vld [vmem:[#allocation4 + $0xa78] sm:$0xff]  ;;  %v3555_v46 = vld [vmem:[#allocation4 + $0xa70] sm:$0xff]  ;;  %v3546_v47 = vld [vmem:[#allocation4 + $0xa28] sm:$0xff] }
 0x113   :  { %2955 = vmatpush1.msra.mxu0 %v2857_v48  ;;  %2988 = vmatprep.mubr.f32.mxu0 %v6066_v1  ;;  %v3554_v48 = vld [vmem:[#allocation4 + $0xa68] sm:$0xff] }
 0x114   :  { %3029 = vmatpush1.msra.mxu1 %v2865_v49  ;;  %3062 = vmatprep.mubr.f32.mxu1 %v6066_v1  ;;  %v3545_v49 = vld [vmem:[#allocation4 + $0xa20] sm:$0xff] }
 0x115   :  { %5674 = vmatmul.mubr.msk.f32.vlgmr.msra.gmra.mxu0 %vm292_vm0, %v5666_v50  ;;  %5675 = vmatmul.mubr.msk.f32.vlgmr.msra.gmra.mxu1 %vm292_vm0, %v6308_v21  ;;  %v3553_v50 = vld [vmem:[#allocation4 + $0xa60] sm:$0xff] }
 0x116   :  { %3096 = vmatprep.subr.mxu0 %v2880_v51  ;;  %3170 = vmatprep.subr.mxu1 %v2888_v52  ;;  %v3544_v51 = vld [vmem:[#allocation4 + $0xa18] sm:$0xff] }
 0x117   :  { %3097 = vmatpush1.msra.mxu0 %v2879_v53  ;;  %3171 = vmatpush1.msra.mxu1 %v2887_v55  ;;  %v3552_v52 = vld [vmem:[#allocation4 + $0xa58] sm:$0xff]  ;;  %v3543_v53 = vld [vmem:[#allocation4 + $0xa10] sm:$0xff] }
 0x118   :  { %3098 = vmatprep.subr.mxu0 %v2878_v56  ;;  %3172 = vmatprep.subr.mxu1 %v2886_v58  ;;  %v3551_v55 = vld [vmem:[#allocation4 + $0xa50] sm:$0xff]  ;;  %v3542_v56 = vld [vmem:[#allocation4 + $0xa08] sm:$0xff] }
 0x119   :  { %3099 = vmatpush1.msra.mxu0 %v2877_v59  ;;  %3173 = vmatpush1.msra.mxu1 %v2885_v36  ;;  %v3550_v58 = vld [vmem:[#allocation4 + $0xa48] sm:$0xff]  ;;  %v3541_v59 = vld [vmem:[#allocation4 + $0xa00] sm:$0xff] }
 0x11a   :  { %3100 = vmatprep.subr.mxu0 %v2876_v60  ;;  %3174 = vmatprep.subr.mxu1 %v2884_v39  ;;  %v3549_v36 = vld [vmem:[#allocation4 + $0xa40] sm:$0xff]  ;;  %v3564_v60 = vld [vmem:[#allocation4 + $0xab8] sm:$0xff] }
 0x11b   :  { %3101 = vmatpush1.msra.mxu0 %v2875_v61  ;;  %3175 = vmatpush1.msra.mxu1 %v2883_v62  ;;  %v3572_v39 = vld [vmem:[#allocation4 + $0xaf8] sm:$0xff]  ;;  %v3563_v61 = vld [vmem:[#allocation4 + $0xab0] sm:$0xff] }
 0x11c   :  { %3102 = vmatprep.subr.mxu0 %v2874_v63  ;;  %3176 = vmatprep.subr.mxu1 %v2882_v0  ;;  %v3571_v62 = vld [vmem:[#allocation4 + $0xaf0] sm:$0xff]  ;;  %v3562_v63 = vld [vmem:[#allocation4 + $0xaa8] sm:$0xff] }
 0x11d   :  { %3103 = vmatpush1.msra.mxu0 %v2873_v2  ;;  %3136 = vmatprep.mubr.f32.mxu0 %v6066_v1  ;;  %v3570_v0 = vld [vmem:[#allocation4 + $0xae8] sm:$0xff]  ;;  %v3561_v2 = vld [vmem:[#allocation4 + $0xaa0] sm:$0xff] }
 0x11e   :  { %3177 = vmatpush1.msra.mxu1 %v2881_v3  ;;  %3210 = vmatprep.mubr.f32.mxu1 %v6066_v1  ;;  %v3569_v3 = vld [vmem:[#allocation4 + $0xae0] sm:$0xff] }
 0x11f   :  { %5676 = vmatmul.mubr.msk.f32.vlgmr.msra.gmra.mxu0 %vm292_vm0, %v6318_v4  ;;  %5677 = vmatmul.mubr.msk.f32.vlgmr.msra.gmra.mxu1 %vm292_vm0, %v6323_v5 }
 0x120   :  { %3244 = vmatprep.subr.mxu0 %v2896_v6  ;;  %3318 = vmatprep.subr.mxu1 %v2904_v7  ;;  %v3560_v6 = vld [vmem:[#allocation4 + $0xa98] sm:$0xff] }
 0x121   :  { %3245 = vmatpush1.msra.mxu0 %v2895_v8  ;;  %3319 = vmatpush1.msra.mxu1 %v2903_v10  ;;  %v3568_v7 = vld [vmem:[#allocation4 + $0xad8] sm:$0xff]  ;;  %v3559_v8 = vld [vmem:[#allocation4 + $0xa90] sm:$0xff] }
 0x122   :  { %3246 = vmatprep.subr.mxu0 %v2894_v11  ;;  %3320 = vmatprep.subr.mxu1 %v2902_v54  ;;  %v3567_v10 = vld [vmem:[#allocation4 + $0xad0] sm:$0xff]  ;;  %v3566_v11 = vld [vmem:[#allocation4 + $0xac8] sm:$0xff]  ;;  %v3557_v54 = vld [vmem:[#allocation4 + $0xa80] sm:$0xff] }
 0x123   :  { %3247 = vmatpush1.msra.mxu0 %v2893_v13  ;;  %3321 = vmatpush1.msra.mxu1 %v2901_v57  ;;  %v3565_v13 = vld [vmem:[#allocation4 + $0xac0] sm:$0xff] }
 0x124   :  { %3248 = vmatprep.subr.mxu0 %v2892_v14  ;;  %3322 = vmatprep.subr.mxu1 %v2900_v15  ;;  %v3580_v14 = vld [vmem:[#allocation4 + $0xb38] sm:$0xff] }
 0x125   :  { %3249 = vmatpush1.msra.mxu0 %v2891_v16  ;;  %3323 = vmatpush1.msra.mxu1 %v2899_v17  ;;  %v3588_v15 = vld [vmem:[#allocation4 + $0xb78] sm:$0xff]  ;;  %v3579_v17 = vld [vmem:[#allocation4 + $0xb30] sm:$0xff] }
 0x126   :  { %3250 = vmatprep.subr.mxu0 %v2890_v19  ;;  %3324 = vmatprep.subr.mxu1 %v2898_v20  ;;  %v3587_v19 = vld [vmem:[#allocation4 + $0xb70] sm:$0xff]  ;;  %v3578_v20 = vld [vmem:[#allocation4 + $0xb28] sm:$0xff] }
 0x127   :  { %3251 = vmatpush1.msra.mxu0 %v2889_v22  ;;  %3284 = vmatprep.mubr.f32.mxu0 %v6066_v1  ;;  %v3586_v22 = vld [vmem:[#allocation4 + $0xb68] sm:$0xff] }
 0x128   :  { %3325 = vmatpush1.msra.mxu1 %v2897_v23  ;;  %3358 = vmatprep.mubr.f32.mxu1 %v6066_v1 }
 0x129   :  { %5678 = vmatmul.mubr.msk.f32.vlgmr.msra.gmra.mxu0 %vm292_vm0, %v6334_v24  ;;  %5679 = vmatmul.mubr.msk.f32.vlgmr.msra.gmra.mxu1 %vm292_vm0, %v6265_v29 }
 0x12a   :  { %3392 = vmatprep.subr.mxu0 %v2912_v25  ;;  %3466 = vmatprep.subr.mxu1 %v2920_v26  ;;  %v3577_v25 = vld [vmem:[#allocation4 + $0xb20] sm:$0xff] }
 0x12b   :  { %3393 = vmatpush1.msra.mxu0 %v2911_v27  ;;  %3467 = vmatpush1.msra.mxu1 %v2919_v28  ;;  %v3585_v26 = vld [vmem:[#allocation4 + $0xb60] sm:$0xff]  ;;  %v3576_v27 = vld [vmem:[#allocation4 + $0xb18] sm:$0xff] }
 0x12c   :  { %3394 = vmatprep.subr.mxu0 %v2910_v9  ;;  %3468 = vmatprep.subr.mxu1 %v2918_v30  ;;  %v3584_v28 = vld [vmem:[#allocation4 + $0xb58] sm:$0xff] }
 0x12d   :  { %3395 = vmatpush1.msra.mxu0 %v2909_v12  ;;  %3469 = vmatpush1.msra.mxu1 %v2917_v31  ;;  %v3575_v12 = vld [vmem:[#allocation4 + $0xb10] sm:$0xff] }
 0x12e   :  { %3396 = vmatprep.subr.mxu0 %v2908_v33  ;;  %3470 = vmatprep.subr.mxu1 %v2916_v34  ;;  %v3583_v31 = vld [vmem:[#allocation4 + $0xb50] sm:$0xff]  ;;  %v3574_v33 = vld [vmem:[#allocation4 + $0xb08] sm:$0xff] }
 0x12f   :  { %3397 = vmatpush1.msra.mxu0 %v2907_v35  ;;  %3471 = vmatpush1.msra.mxu1 %v2915_v37  ;;  %v3582_v34 = vld [vmem:[#allocation4 + $0xb48] sm:$0xff]  ;;  %v3573_v37 = vld [vmem:[#allocation4 + $0xb00] sm:$0xff] }
 0x130   :  { %3398 = vmatprep.subr.mxu0 %v2906_v38  ;;  %3472 = vmatprep.subr.mxu1 %v2914_v40  ;;  %v3581_v38 = vld [vmem:[#allocation4 + $0xb40] sm:$0xff] }
 0x131   :  { %3399 = vmatpush1.msra.mxu0 %v2905_v41  ;;  %3432 = vmatprep.mubr.f32.mxu0 %v6066_v1  ;;  %v3596_v41 = vld [vmem:[#allocation4 + $0xbb8] sm:$0xff] }
 0x132   :  { %3473 = vmatpush1.msra.mxu1 %v2913_v42  ;;  %3506 = vmatprep.mubr.f32.mxu1 %v6066_v1  ;;  %v3604_v42 = vld [vmem:[#allocation4 + $0xbf8] sm:$0xff] }
 0x133   :  { %5680 = vmatmul.mubr.msk.f32.vlgmr.msra.gmra.mxu0 %vm292_vm0, %v6294_v32  ;;  %5681 = vmatmul.mubr.msk.f32.vlgmr.msra.gmra.mxu1 %vm292_vm0, %v6345_v43 }
 0x134   :  { %3632 = vmatprep.subr.mxu0 %v3548_v44  ;;  %3706 = vmatprep.subr.mxu1 %v3556_v45 }
 0x135   :  { %3633 = vmatpush1.msra.mxu0 %v3547_v18  ;;  %3707 = vmatpush1.msra.mxu1 %v3555_v46  ;;  %v6362_v16 = vpop.f32.mrf.mxu0  ;;  %v3595_v18 = vld [vmem:[#allocation4 + $0xbb0] sm:$0xff] }
 0x136   :  { %3634 = vmatprep.subr.mxu0 %v3546_v47  ;;  %3708 = vmatprep.subr.mxu1 %v3554_v48  ;;  %v6359_v57 = vpop.f32.mrf.mxu1  ;;  %v3603_v46 = vld [vmem:[#allocation4 + $0xbf0] sm:$0xff]  ;;  %v3594_v47 = vld [vmem:[#allocation4 + $0xba8] sm:$0xff] }
 0x137   :  { %3635 = vmatpush1.msra.mxu0 %v3545_v49  ;;  %3709 = vmatpush1.msra.mxu1 %v3553_v50  ;;  %v6371_v9 = vpop.f32.mrf.mxu0  ;;  %v3602_v48 = vld [vmem:[#allocation4 + $0xbe8] sm:$0xff]  ;;  %v3593_v50 = vld [vmem:[#allocation4 + $0xba0] sm:$0xff] }
 0x138   :  { %3636 = vmatprep.subr.mxu0 %v3544_v51  ;;  %3710 = vmatprep.subr.mxu1 %v3552_v52  ;;  %v6369_v23 = vpop.f32.mrf.mxu1  ;;  %v3601_v51 = vld [vmem:[#allocation4 + $0xbe0] sm:$0xff]  ;;  %v3592_v52 = vld [vmem:[#allocation4 + $0xb98] sm:$0xff] }
 0x139   :  { %3637 = vmatpush1.msra.mxu0 %v3543_v53  ;;  %3711 = vmatpush1.msra.mxu1 %v3551_v55  ;;  %v3600_v53 = vld [vmem:[#allocation4 + $0xbd8] sm:$0xff] }
 0x13a   :  { %3638 = vmatprep.subr.mxu0 %v3542_v56  ;;  %3712 = vmatprep.subr.mxu1 %v3550_v58  ;;  %v3599_v56 = vld [vmem:[#allocation4 + $0xbd0] sm:$0xff]  ;;  %v3590_v58 = vld [vmem:[#allocation4 + $0xb88] sm:$0xff] }
 0x13b   :  { %3639 = vmatpush1.msra.mxu0 %v3541_v59  ;;  %3672 = vmatprep.mubr.f32.mxu0 %v6066_v1  ;;  %v3598_v59 = vld [vmem:[#allocation4 + $0xbc8] sm:$0xff] }
 0x13c   :  { %3713 = vmatpush1.msra.mxu1 %v3549_v36  ;;  %3746 = vmatprep.mubr.f32.mxu1 %v6066_v1 }
 0x13d   :  { %5690 = vmatmul.mubr.msk.f32.vlgmr.msra.gmra.mxu0 %vm292_vm0, %v6308_v21  ;;  %5691 = vmatmul.mubr.msk.f32.vlgmr.msra.gmra.mxu1 %vm292_vm0, %v6318_v4  ;;  %v3558_v21 = vld [vmem:[#allocation4 + $0xa88] sm:$0xff] }
 0x13e   :  { %3780 = vmatprep.subr.mxu0 %v3564_v60  ;;  %3854 = vmatprep.subr.mxu1 %v3572_v39  ;;  %v6375_v35 = vpop.f32.mrf.mxu0  ;;  %v3589_v39 = vld [vmem:[#allocation4 + $0xb80] sm:$0xff] }
 0x13f   :  { %3781 = vmatpush1.msra.mxu0 %v3563_v61  ;;  %3855 = vmatpush1.msra.mxu1 %v3571_v62  ;;  %v3597_v61 = vld [vmem:[#allocation4 + $0xbc0] sm:$0xff] }
 0x140   :  { %3782 = vmatprep.subr.mxu0 %v3562_v63  ;;  %3856 = vmatprep.subr.mxu1 %v3570_v0  ;;  %v6373_v30 = vpop.f32.mrf.mxu1  ;;  %v6380_v44 = vpop.f32.mrf.mxu0  ;;  %v6402_v63 = vld [vmem:[%s6779_s0 + $0x60] sm:$0xff] }
 0x141   :  { %3783 = vmatpush1.msra.mxu0 %v3561_v2  ;;  %3857 = vmatpush1.msra.mxu1 %v3569_v3  ;;  %v4232_v0 = vld [vmem:[#allocation4 + $0xc38] sm:$0xff] }
 0x142   :  { %3784 = vmatprep.subr.mxu0 %v3560_v6  ;;  %3858 = vmatprep.subr.mxu1 %v3568_v7  ;;  %v6377_v40 = vpop.f32.mrf.mxu1  ;;  %v4240_v2 = vld [vmem:[#allocation4 + $0xc78] sm:$0xff]  ;;  %v4231_v6 = vld [vmem:[#allocation4 + $0xc30] sm:$0xff] }
 0x143   :  { %3785 = vmatpush1.msra.mxu0 %v3559_v8  ;;  %3859 = vmatpush1.msra.mxu1 %v3567_v10  ;;  %v4239_v7 = vld [vmem:[#allocation4 + $0xc70] sm:$0xff]  ;;  %v4230_v8 = vld [vmem:[#allocation4 + $0xc28] sm:$0xff] }
 0x144   :  { %3786 = vmatprep.subr.mxu0 %v3558_v21  ;;  %3860 = vmatprep.subr.mxu1 %v3566_v11  ;;  %v4238_v10 = vld [vmem:[#allocation4 + $0xc68] sm:$0xff]  ;;  %v4229_v11 = vld [vmem:[#allocation4 + $0xc20] sm:$0xff] }
 0x145   :  { %3787 = vmatpush1.msra.mxu0 %v3557_v54  ;;  %3820 = vmatprep.mubr.f32.mxu0 %v6066_v1  ;;  %v4237_v54 = vld [vmem:[#allocation4 + $0xc60] sm:$0xff] }
 0x146   :  { %3861 = vmatpush1.msra.mxu1 %v3565_v13  ;;  %3894 = vmatprep.mubr.f32.mxu1 %v6066_v1  ;;  %v4228_v13 = vld [vmem:[#allocation4 + $0xc18] sm:$0xff] }
 0x147   :  { %5692 = vmatmul.mubr.msk.f32.vlgmr.msra.gmra.mxu0 %vm292_vm0, %v6323_v5  ;;  %5693 = vmatmul.mubr.msk.f32.vlgmr.msra.gmra.mxu1 %vm292_vm0, %v6334_v24 }
 0x148   :  { %3928 = vmatprep.subr.mxu0 %v3580_v14  ;;  %4002 = vmatprep.subr.mxu1 %v3588_v15  ;;  %v6389_v49 = vpop.f32.mrf.mxu0  ;;  %v4236_v14 = vld [vmem:[#allocation4 + $0xc58] sm:$0xff] }
 0x149   :  { %3929 = vmatpush1.msra.mxu0 %v3579_v17  ;;  %4003 = vmatpush1.msra.mxu1 %v3587_v19  ;;  %v4227_v19 = vld [vmem:[#allocation4 + $0xc10] sm:$0xff] }
 0x14a   :  { %3930 = vmatprep.subr.mxu0 %v3578_v20  ;;  %4004 = vmatprep.subr.mxu1 %v3586_v22  ;;  %v6382_v45 = vpop.f32.mrf.mxu1  ;;  %v6393_v36 = vpop.f32.mrf.mxu0  ;;  %v4235_v20 = vld [vmem:[#allocation4 + $0xc50] sm:$0xff] }
 0x14b   :  { %3931 = vmatpush1.msra.mxu0 %v3577_v25  ;;  %4005 = vmatpush1.msra.mxu1 %v3585_v26  ;;  %v4226_v26 = vld [vmem:[#allocation4 + $0xc08] sm:$0xff] }
 0x14c   :  { %3932 = vmatprep.subr.mxu0 %v3576_v27  ;;  %4006 = vmatprep.subr.mxu1 %v3584_v28  ;;  %v6391_v55 = vpop.f32.mrf.mxu1  ;;  %v4234_v27 = vld [vmem:[#allocation4 + $0xc48] sm:$0xff] }
 0x14d   :  { %3933 = vmatpush1.msra.mxu0 %v3575_v12  ;;  %4007 = vmatpush1.msra.mxu1 %v3583_v31  ;;  %v4225_v31 = vld [vmem:[#allocation4 + $0xc00] sm:$0xff] }
 0x14e   :  { %3934 = vmatprep.subr.mxu0 %v3574_v33  ;;  %4008 = vmatprep.subr.mxu1 %v3582_v34 }
 0x14f   :  { %3935 = vmatpush1.msra.mxu0 %v3573_v37  ;;  %3968 = vmatprep.mubr.f32.mxu0 %v6066_v1  ;;  %v4256_v37 = vld [vmem:[#allocation4 + $0xcf8] sm:$0xff] }
 0x150   :  { %4009 = vmatpush1.msra.mxu1 %v3581_v38  ;;  %4042 = vmatprep.mubr.f32.mxu1 %v6066_v1  ;;  %v4247_v38 = vld [vmem:[#allocation4 + $0xcb0] sm:$0xff] }
 0x151   :  { %5694 = vmatmul.mubr.msk.f32.vlgmr.msra.gmra.mxu0 %vm292_vm0, %v6265_v29  ;;  %5695 = vmatmul.mubr.msk.f32.vlgmr.msra.gmra.mxu1 %vm292_vm0, %v6294_v32  ;;  %v3591_v29 = vld [vmem:[#allocation4 + $0xb90] sm:$0xff] }
 0x152   :  { %4076 = vmatprep.subr.mxu0 %v3596_v41  ;;  %4150 = vmatprep.subr.mxu1 %v3604_v42  ;;  %v6397_v62 = vpop.f32.mrf.mxu0  ;;  %v4255_v41 = vld [vmem:[#allocation4 + $0xcf0] sm:$0xff]  ;;  %v4245_v42 = vld [vmem:[#allocation4 + $0xca0] sm:$0xff] }
 0x153   :  { %4077 = vmatpush1.msra.mxu0 %v3595_v18  ;;  %4151 = vmatpush1.msra.mxu1 %v3603_v46  ;;  %v4253_v18 = vld [vmem:[#allocation4 + $0xce0] sm:$0xff]  ;;  %v4244_v46 = vld [vmem:[#allocation4 + $0xc98] sm:$0xff] }
 0x154   :  { %4078 = vmatprep.subr.mxu0 %v3594_v47  ;;  %4152 = vmatprep.subr.mxu1 %v3602_v48  ;;  %v6395_v60 = vpop.f32.mrf.mxu1  ;;  %v6412_v21 = vpop.f32.mrf.mxu0  ;;  %v4252_v47 = vld [vmem:[#allocation4 + $0xcd8] sm:$0xff] }
 0x155   :  { %4079 = vmatpush1.msra.mxu0 %v3593_v50  ;;  %4153 = vmatpush1.msra.mxu1 %v3601_v51  ;;  %v4243_v51 = vld [vmem:[#allocation4 + $0xc90] sm:$0xff] }
 0x156   :  { %4080 = vmatprep.subr.mxu0 %v3592_v52  ;;  %4154 = vmatprep.subr.mxu1 %v3600_v53  ;;  %v6405_v3 = vpop.f32.mrf.mxu1  ;;  %v4251_v52 = vld [vmem:[#allocation4 + $0xcd0] sm:$0xff]  ;;  %v4242_v53 = vld [vmem:[#allocation4 + $0xc88] sm:$0xff] }
 0x157   :  { %4081 = vmatpush1.msra.mxu0 %v3591_v29  ;;  %4155 = vmatpush1.msra.mxu1 %v3599_v56  ;;  %v4250_v29 = vld [vmem:[#allocation4 + $0xcc8] sm:$0xff] }
 0x158   :  { %4082 = vmatprep.subr.mxu0 %v3590_v58  ;;  %4156 = vmatprep.subr.mxu1 %v3598_v59  ;;  %v4241_v59 = vld [vmem:[#allocation4 + $0xc80] sm:$0xff] }
 0x159   :  { %4083 = vmatpush1.msra.mxu0 %v3589_v39  ;;  %4116 = vmatprep.mubr.f32.mxu0 %v6066_v1 }
 0x15a   :  { %4157 = vmatpush1.msra.mxu1 %v3597_v61  ;;  %4190 = vmatprep.mubr.f32.mxu1 %v6066_v1 }
 0x15b   :  { %5696 = vmatmul.mubr.msk.f32.vlgmr.msra.gmra.mxu0 %vm292_vm0, %v6345_v43  ;;  %5697 = vmatmul.mubr.msk.f32.vlgmr.msra.gmra.mxu1 %vm292_vm0, %v6402_v63 }
 0x15c   :  { %4316 = vmatprep.subr.mxu0 %v4232_v0  ;;  %4390 = vmatprep.subr.mxu1 %v4240_v2  ;;  %v4264_v0 = vld [vmem:[#allocation4 + $0xd38] sm:$0xff] }
 0x15d   :  { %4317 = vmatpush1.msra.mxu0 %v4231_v6  ;;  %4391 = vmatpush1.msra.mxu1 %v4239_v7  ;;  %v954_v15 = vpop.f32.mrf.mxu0  ;;  %v1028_v17 = vpop.f32.mrf.mxu1  ;;  %v4272_v2 = vld [vmem:[#allocation4 + $0xd78] sm:$0xff]  ;;  %v4262_v6 = vld [vmem:[#allocation4 + $0xd28] sm:$0xff] }
 0x15e   :  { %4318 = vmatprep.subr.mxu0 %v4230_v8  ;;  %4392 = vmatprep.subr.mxu1 %v4238_v10  ;;  %v6415_v22 = vadd.f32 %v954_v15, %v6362_v16  ;;  %v6418_v25 = vadd.f32 %v1028_v17, %v6359_v57  ;;  %v4233_v16 = vld [vmem:[#allocation4 + $0xc40] sm:$0xff]  ;;  %v4248_v57 = vld [vmem:[#allocation4 + $0xcb8] sm:$0xff]  ;;  %v4270_v7 = vld [vmem:[#allocation4 + $0xd68] sm:$0xff] }
 0x15f   :  { %4319 = vmatpush1.msra.mxu0 %v4229_v11  ;;  %4393 = vmatpush1.msra.mxu1 %v4237_v54  ;;  %v956_v28 = vpop.f32.mrf.mxu0  ;;  %v1030_v12 = vpop.f32.mrf.mxu1  ;;  %v4261_v8 = vld [vmem:[#allocation4 + $0xd20] sm:$0xff]  ;;  %v4260_v11 = vld [vmem:[#allocation4 + $0xd18] sm:$0xff]  ;;  %v4259_v15 = vld [vmem:[#allocation4 + $0xd10] sm:$0xff] }
 0x160   :  { %4320 = vmatprep.subr.mxu0 %v4228_v13  ;;  %4394 = vmatprep.subr.mxu1 %v4236_v14  ;;  %v6421_v33 = vadd.f32 %v956_v28, %v6371_v9  ;;  %v6424_v34 = vadd.f32 %v1030_v12, %v6369_v23  ;;  %v4246_v23 = vld [vmem:[#allocation4 + $0xca8] sm:$0xff]  ;;  %v4269_v10 = vld [vmem:[#allocation4 + $0xd60] sm:$0xff]  ;;  %v4268_v54 = vld [vmem:[#allocation4 + $0xd58] sm:$0xff] }
 0x161   :  { %4321 = vmatpush1.msra.mxu0 %v4227_v19  ;;  %4395 = vmatpush1.msra.mxu1 %v4235_v20  ;;  %v4254_v9 = vld [vmem:[#allocation4 + $0xce8] sm:$0xff]  ;;  %v4267_v17 = vld [vmem:[#allocation4 + $0xd50] sm:$0xff]  ;;  %v4257_v12 = vld [vmem:[#allocation4 + $0xd00] sm:$0xff] }
 0x162   :  { %4322 = vmatprep.subr.mxu0 %v4226_v26  ;;  %4396 = vmatprep.subr.mxu1 %v4234_v27  ;;  %v4258_v20 = vld [vmem:[#allocation4 + $0xd08] sm:$0xff] }
 0x163   :  { %4323 = vmatpush1.msra.mxu0 %v4225_v31  ;;  %4356 = vmatprep.mubr.f32.mxu0 %v6066_v1  ;;  %v4266_v26 = vld [vmem:[#allocation4 + $0xd48] sm:$0xff] }
 0x164   :  { %4397 = vmatpush1.msra.mxu1 %v4233_v16  ;;  %4430 = vmatprep.mubr.f32.mxu1 %v6066_v1 }
 0x165   :  { %5706 = vmatmul.mubr.msk.f32.vlgmr.msra.gmra.mxu0 %vm292_vm0, %v6318_v4  ;;  %5707 = vmatmul.mubr.msk.f32.vlgmr.msra.gmra.mxu1 %vm292_vm0, %v6323_v5 }
 0x166   :  { %4464 = vmatprep.subr.mxu0 %v4248_v57  ;;  %4538 = vmatprep.subr.mxu1 %v4256_v37  ;;  %v4288_v57 = vld [vmem:[#allocation4 + $0xdf8] sm:$0xff]  ;;  %v4279_v37 = vld [vmem:[#allocation4 + $0xdb0] sm:$0xff] }
 0x167   :  { %4465 = vmatpush1.msra.mxu0 %v4247_v38  ;;  %4539 = vmatpush1.msra.mxu1 %v4255_v41  ;;  %v1102_v48 = vpop.f32.mrf.mxu0  ;;  %v1176_v50 = vpop.f32.mrf.mxu1  ;;  %v4287_v38 = vld [vmem:[#allocation4 + $0xdf0] sm:$0xff]  ;;  %v4277_v41 = vld [vmem:[#allocation4 + $0xda0] sm:$0xff] }
 0x168   :  { %4466 = vmatprep.subr.mxu0 %v4246_v23  ;;  %4540 = vmatprep.subr.mxu1 %v4254_v9  ;;  %v6433_v4 = vadd.f32 %v1102_v48, %v6375_v35  ;;  %v6436_v5 = vadd.f32 %v1176_v50, %v6373_v30  ;;  %v4249_v35 = vld [vmem:[#allocation4 + $0xcc0] sm:$0xff]  ;;  %v4276_v9 = vld [vmem:[#allocation4 + $0xd98] sm:$0xff]  ;;  %v4283_v48 = vld [vmem:[#allocation4 + $0xdd0] sm:$0xff] }
 0x169   :  { %4467 = vmatpush1.msra.mxu0 %v4245_v42  ;;  %4541 = vmatpush1.msra.mxu1 %v4253_v18  ;;  %v1104_v56 = vpop.f32.mrf.mxu0  ;;  %v1178_v58 = vpop.f32.mrf.mxu1  ;;  %v5701_v30 = vld [vmem:[%s6779_s0 + $0x48] sm:$0xff]  ;;  %v4284_v42 = vld [vmem:[#allocation4 + $0xdd8] sm:$0xff] }
 0x16a   :  { %4468 = vmatprep.subr.mxu0 %v4244_v46  ;;  %4542 = vmatprep.subr.mxu1 %v4252_v47  ;;  %v6439_v39 = vadd.f32 %v1104_v56, %v6380_v44  ;;  %v6442_v61 = vadd.f32 %v1178_v58, %v6377_v40  ;;  %v4263_v44 = vld [vmem:[#allocation4 + $0xd30] sm:$0xff]  ;;  %v4285_v23 = vld [vmem:[#allocation4 + $0xde0] sm:$0xff]  ;;  %v4274_v50 = vld [vmem:[#allocation4 + $0xd88] sm:$0xff] }
 0x16b   :  { %4469 = vmatpush1.msra.mxu0 %v4243_v51  ;;  %4543 = vmatpush1.msra.mxu1 %v4251_v52  ;;  %v4271_v40 = vld [vmem:[#allocation4 + $0xd70] sm:$0xff]  ;;  %v4282_v51 = vld [vmem:[#allocation4 + $0xdc8] sm:$0xff] }
 0x16c   :  { %4470 = vmatprep.subr.mxu0 %v4242_v53  ;;  %4544 = vmatprep.subr.mxu1 %v4250_v29  ;;  %v4275_v47 = vld [vmem:[#allocation4 + $0xd90] sm:$0xff]  ;;  %v4273_v29 = vld [vmem:[#allocation4 + $0xd80] sm:$0xff] }
 0x16d   :  { %4471 = vmatpush1.msra.mxu0 %v4241_v59  ;;  %4504 = vmatprep.mubr.f32.mxu0 %v6066_v1  ;;  %v5038_v59 = vld [vmem:[#allocation8 + $0x68] sm:$0xff] }
 0x16e   :  { %4545 = vmatpush1.msra.mxu1 %v4249_v35  ;;  %4578 = vmatprep.mubr.f32.mxu1 %v6066_v1  ;;  %v5037_v35 = vld [vmem:[#allocation8 + $0x60] sm:$0xff] }
 0x16f   :  { %5708 = vmatmul.mubr.msk.f32.vlgmr.msra.gmra.mxu0 %vm292_vm0, %v6334_v24  ;;  %5709 = vmatmul.mubr.msk.f32.vlgmr.msra.gmra.mxu1 %vm292_vm0, %v5701_v30 }
 0x170   :  { %4612 = vmatprep.subr.mxu0 %v4264_v0  ;;  %4686 = vmatprep.subr.mxu1 %v4272_v2  ;;  %v5035_v2 = vld [vmem:[#allocation8 + $0x50] sm:$0xff] }
 0x171   :  { %4613 = vmatpush1.msra.mxu0 %v4263_v44  ;;  %4687 = vmatpush1.msra.mxu1 %v4271_v40  ;;  %v1250_v13 = vpop.f32.mrf.mxu0  ;;  %v1324_v14 = vpop.f32.mrf.mxu1 }
 0x172   :  { %4614 = vmatprep.subr.mxu0 %v4262_v6  ;;  %4688 = vmatprep.subr.mxu1 %v4270_v7  ;;  %v6453_v24 = vadd.f32 %v1250_v13, %v6389_v49  ;;  %v6456_v19 = vadd.f32 %v1324_v14, %v6382_v45  ;;  %v4265_v49 = vld [vmem:[#allocation4 + $0xd40] sm:$0xff]  ;;  %v4280_v45 = vld [vmem:[#allocation4 + $0xdb8] sm:$0xff]  ;;  %v5032_v13 = vld [vmem:[#allocation8 + $0x38] sm:$0xff] }
 0x173   :  { %4615 = vmatpush1.msra.mxu0 %v4261_v8  ;;  %4689 = vmatpush1.msra.mxu1 %v4269_v10  ;;  %v1252_v27 = vpop.f32.mrf.mxu0  ;;  %v1326_v28 = vpop.f32.mrf.mxu1  ;;  %v5034_v6 = vld [vmem:[#allocation8 + $0x48] sm:$0xff]  ;;  %v5031_v14 = vld [vmem:[#allocation8 + $0x30] sm:$0xff] }
 0x174   :  { %4616 = vmatprep.subr.mxu0 %v4260_v11  ;;  %4690 = vmatprep.subr.mxu1 %v4268_v54  ;;  %v6459_v31 = vadd.f32 %v1252_v27, %v6393_v36  ;;  %v6462_v16 = vadd.f32 %v1326_v28, %v6391_v55  ;;  %v4278_v55 = vld [vmem:[#allocation4 + $0xda8] sm:$0xff]  ;;  %v5033_v54 = vld [vmem:[#allocation8 + $0x40] sm:$0xff] }
 0x175   :  { %4617 = vmatpush1.msra.mxu0 %v4259_v15  ;;  %4691 = vmatpush1.msra.mxu1 %v4267_v17  ;;  %v4286_v36 = vld [vmem:[#allocation4 + $0xde8] sm:$0xff]  ;;  %v5030_v15 = vld [vmem:[#allocation8 + $0x28] sm:$0xff] }
 0x176   :  { %4618 = vmatprep.subr.mxu0 %v4258_v20  ;;  %4692 = vmatprep.subr.mxu1 %v4266_v26 }
 0x177   :  { %4619 = vmatpush1.msra.mxu0 %v4257_v12  ;;  %4652 = vmatprep.mubr.f32.mxu0 %v6066_v1  ;;  %v5028_v12 = vld [vmem:[#allocation8 + $0x18] sm:$0xff] }
 0x178   :  { %4693 = vmatpush1.msra.mxu1 %v4265_v49  ;;  %4726 = vmatprep.mubr.f32.mxu1 %v6066_v1 }
 0x179   :  { %5710 = vmatmul.mubr.msk.f32.vlgmr.msra.gmra.mxu0 %vm292_vm0, %v6294_v32  ;;  %5711 = vmatmul.mubr.msk.f32.vlgmr.msra.gmra.mxu1 %vm292_vm0, %v6345_v43 }
 0x17a   :  { %4760 = vmatprep.subr.mxu0 %v4280_v45  ;;  %4834 = vmatprep.subr.mxu1 %v4288_v57 }
 0x17b   :  { %4761 = vmatpush1.msra.mxu0 %v4279_v37  ;;  %4835 = vmatpush1.msra.mxu1 %v4287_v38  ;;  %v1398_v18 = vpop.f32.mrf.mxu0  ;;  %v1472_v46 = vpop.f32.mrf.mxu1  ;;  %v5027_v38 = vld [vmem:[#allocation8 + $0x10] sm:$0xff] }
 0x17c   :  { %4762 = vmatprep.subr.mxu0 %v4278_v55  ;;  %4836 = vmatprep.subr.mxu1 %v4286_v36  ;;  %v6471_v32 = vadd.f32 %v1398_v18, %v6397_v62  ;;  %v6474_v43 = vadd.f32 %v1472_v46, %v6395_v60  ;;  %v4281_v62 = vld [vmem:[#allocation4 + $0xdc0] sm:$0xff]  ;;  %v5048_v55 = vld [vmem:[#allocation8 + $0xb8] sm:$0xff] }
 0x17d   :  { %4763 = vmatpush1.msra.mxu0 %v4277_v41  ;;  %4837 = vmatpush1.msra.mxu1 %v4285_v23  ;;  %v1400_v52 = vpop.f32.mrf.mxu0  ;;  %v1474_v53 = vpop.f32.mrf.mxu1  ;;  %v5705_v60 = vld [vmem:[%s6779_s0 + $0x68] sm:$0xff] }
 0x17e   :  { %4764 = vmatprep.subr.mxu0 %v4276_v9  ;;  %4838 = vmatprep.subr.mxu1 %v4284_v42  ;;  %v6477_v56 = vadd.f32 %v1400_v52, %v6412_v21  ;;  %v6480_v58 = vadd.f32 %v1474_v53, %v6405_v3  ;;  %v5040_v21 = vld [vmem:[#allocation8 + $0x78] sm:$0xff]  ;;  %v5039_v3 = vld [vmem:[#allocation8 + $0x70] sm:$0xff] }
 0x17f   :  { %4765 = vmatpush1.msra.mxu0 %v4275_v47  ;;  %4839 = vmatpush1.msra.mxu1 %v4283_v48  ;;  %v5047_v23 = vld [vmem:[#allocation8 + $0xb0] sm:$0xff]  ;;  %v5046_v47 = vld [vmem:[#allocation8 + $0xa8] sm:$0xff]  ;;  %v5045_v48 = vld [vmem:[#allocation8 + $0xa0] sm:$0xff] }
 0x180   :  { %4766 = vmatprep.subr.mxu0 %v4274_v50  ;;  %4840 = vmatprep.subr.mxu1 %v4282_v51  ;;  %v5042_v50 = vld [vmem:[#allocation8 + $0x88] sm:$0xff]  ;;  %v5041_v51 = vld [vmem:[#allocation8 + $0x80] sm:$0xff] }
 0x181   :  { %4767 = vmatpush1.msra.mxu0 %v4273_v29  ;;  %4800 = vmatprep.mubr.f32.mxu0 %v6066_v1 }
 0x182   :  { %4841 = vmatpush1.msra.mxu1 %v4281_v62  ;;  %4874 = vmatprep.mubr.f32.mxu1 %v6066_v1 }
 0x183   :  { %5712 = vmatmul.mubr.msk.f32.vlgmr.msra.gmra.mxu0 %vm292_vm0, %v6402_v63  ;;  %5713 = vmatmul.mubr.msk.f32.vlgmr.msra.gmra.mxu1 %vm292_vm0, %v5705_v60  ;;  %v5036_v63 = vld [vmem:[#allocation8 + $0x58] sm:$0xff] }
 0x184   :  { %5074 = vmatprep.subr.mxu0 %v6066_v1 }
 0x185   :  { %5075 = vmatpush1.msra.mxu0 %v5040_v21  ;;  %v6493_v30 = vpop.f32.mrf.mxu0  ;;  %v6495_v0 = vpop.f32.mrf.mxu1 }
 0x186   :  { %5076 = vmatprep.subr.mxu0 %v6066_v1 }
 0x187   :  { %5077 = vmatpush1.msra.mxu0 %v5039_v3  ;;  %v6499_v44 = vpop.f32.mrf.mxu0  ;;  %v6501_v40 = vpop.f32.mrf.mxu1 }
 0x188   :  { %5078 = vmatprep.subr.mxu0 %v6066_v1 }
 0x189   :  { %5079 = vmatpush1.msra.mxu0 %v5038_v59 }
 0x18a   :  { %5080 = vmatprep.subr.mxu0 %v6066_v1 }
 0x18b   :  { %5081 = vmatpush1.msra.mxu0 %v5037_v35 }
 0x18c   :  { %5082 = vmatprep.subr.mxu0 %v6066_v1 }
 0x18d   :  { %5083 = vmatpush1.msra.mxu0 %v5036_v63 }
 0x18e   :  { %5084 = vmatprep.subr.mxu0 %v6066_v1 }
 0x18f   :  { %v1770_v7 = vpop.f32.mrf.mxu0  ;;  %v1844_v8 = vpop.f32.mrf.mxu1  ;;  %5085 = vmatpush1.msra.mxu0 %v5035_v2 }
 0x190   :  { %v6505_v10 = vadd.f32 %v1770_v7, %v6433_v4  ;;  %v6508_v11 = vadd.f32 %v1844_v8, %v6436_v5  ;;  %5086 = vmatprep.subr.mxu0 %v6066_v1  ;;  %v5029_v5 = vld [vmem:[#allocation8 + $0x20] sm:$0xff] }
 0x191   :  { %5087 = vmatpush1.msra.mxu0 %v5034_v6  ;;  %v6514_v4 = vpop.f32.mrf.mxu0  ;;  %v6516_v17 = vpop.f32.mrf.mxu1 }
 0x192   :  { %5088 = vmatprep.subr.mxu0 %v6066_v1 }
 0x193   :  { %5089 = vmatpush1.msra.mxu0 %v5033_v54 }
 0x194   :  { %5090 = vmatprep.subr.mxu0 %v6066_v1 }
 0x195   :  { %5091 = vmatpush1.msra.mxu0 %v5032_v13 }
 0x196   :  { %5092 = vmatprep.subr.mxu0 %v6066_v1 }
 0x197   :  { %5093 = vmatpush1.msra.mxu0 %v5031_v14 }
 0x198   :  { %5094 = vmatprep.subr.mxu0 %v6066_v1 }
 0x199   :  { %v1918_v20 = vpop.f32.mrf.mxu0  ;;  %v1992_v26 = vpop.f32.mrf.mxu1  ;;  %5095 = vmatpush1.msra.mxu0 %v5030_v15 }
 0x19a   :  { %v6520_v27 = vadd.f32 %v1918_v20, %v6453_v24  ;;  %v6523_v28 = vadd.f32 %v1992_v26, %v6456_v19  ;;  %5096 = vmatprep.subr.mxu0 %v6066_v1  ;;  %v5026_v24 = vld [vmem:[#allocation8 + $0x8] sm:$0xff]  ;;  %v5025_v19 = vld [vmem:[#allocation8] sm:$0xff] }
 0x19b   :  { %v1920_v49 = vpop.f32.mrf.mxu0  ;;  %v1994_v45 = vpop.f32.mrf.mxu1  ;;  %5097 = vmatpush1.msra.mxu0 %v5029_v5 }
 0x19c   :  { %v6527_v57 = vadd.f32 %v1920_v49, %v6459_v31  ;;  %v6530_v37 = vadd.f32 %v1994_v45, %v6462_v16  ;;  %5098 = vmatprep.subr.mxu0 %v6066_v1 }
 0x19d   :  { %5099 = vmatpush1.msra.mxu0 %v5028_v12 }
 0x19e   :  { %5100 = vmatprep.subr.mxu0 %v6066_v1 }
 0x19f   :  { %5101 = vmatpush1.msra.mxu0 %v5027_v38 }
 0x1a0   :  { %5102 = vmatprep.subr.mxu0 %v6066_v1 }
 0x1a1   :  { %5103 = vmatpush1.msra.mxu0 %v5026_v24 }
 0x1a2   :  { %5104 = vmatprep.subr.mxu0 %v6066_v1 }
 0x1a3   :  { %v2066_v31 = vpop.f32.mrf.mxu0  ;;  %v2140_v36 = vpop.f32.mrf.mxu1  ;;  %5105 = vmatpush1.msra.mxu0 %v5025_v19 }
 0x1a4   :  { %v6537_v16 = vadd.f32 %v2066_v31, %v6471_v32  ;;  %v2159_v41 = vadd.f32 %v2140_v36, %v6474_v43  ;;  %5122 = vmatprep.subr.mxu0 %v6066_v1  ;;  %v5044_v32 = vld [vmem:[#allocation8 + $0x98] sm:$0xff]  ;;  %v5043_v43 = vld [vmem:[#allocation8 + $0x90] sm:$0xff] }
 0x1a5   :  { %v2068_v9 = vpop.f32.mrf.mxu0  ;;  %v2142_v42 = vpop.f32.mrf.mxu1  ;;  %5123 = vmatpush2.msra.mxu0 %v5048_v55 }
 0x1a6   :  { %6791 = vst [vmem:[#allocation22_spill] sm:$0xff] %v6537_v16  ;;  %v6542_v18 = vadd.f32 %v2068_v9, %v6477_v56  ;;  %v6545_v46 = vadd.f32 %v2142_v42, %v6480_v58  ;;  %5124 = vmatprep.subr.mxu0 %v6066_v1 }
 0x1a7   :  { %5125 = vmatpush2.msra.mxu0 %v5047_v23 }
 0x1a8   :  { %6792 = vst [vmem:[#allocation23_spill] sm:$0xff] %v6542_v18  ;;  %6793 = vst [vmem:[#allocation24_spill] sm:$0xff] %v6545_v46  ;;  %5126 = vmatprep.subr.mxu0 %v6066_v1  ;;  %v2146_v46 = vadd.f32 %v6499_v44, %v6421_v33 }
 0x1a9   :  { %5127 = vmatpush2.msra.mxu0 %v5046_v47 }
 0x1aa   :  { %5128 = vmatprep.subr.mxu0 %v6066_v1 }
 0x1ab   :  { %5129 = vmatpush2.msra.mxu0 %v5045_v48 }
 0x1ac   :  { %5130 = vmatprep.subr.mxu0 %v6066_v1 }
 0x1ad   :  { %5131 = vmatpush2.msra.mxu0 %v5044_v32  ;;  %v2380_v52 = vpop.f32.mrf.mxu1  ;;  %v2306_v3 = vpop.f32.mrf.mxu0 }
 0x1ae   :  { %5132 = vmatprep.subr.mxu0 %v6066_v1 }
 0x1af   :  { %5133 = vmatpush2.msra.mxu0 %v5043_v43  ;;  %v2382_v53 = vpop.f32.mrf.mxu1  ;;  %v2308_v59 = vpop.f32.mrf.mxu0 }
 0x1b0   :  { %5134 = vmatprep.subr.mxu0 %v6066_v1 }
 0x1b1   :  { %5135 = vmatpush2.msra.mxu0 %v5042_v50 }
 0x1b2   :  { %5136 = vmatprep.subr.mxu0 %v6066_v1 }
 0x1b3   :  { %5137 = vmatpush2.msra.mxu0 %v5041_v51 }
 0x1b7   :  { %v6554_v29 = vpop.f32.mrf.mxu1  ;;  %v6564_v35 = vpop.f32.mrf.mxu0 }
 0x1b9   :  { %v6556_v56 = vpop.f32.mrf.mxu1  ;;  %v6566_v1 = vpop.f32.mrf.mxu0 }
 0x1c1   :  { %v6558_v58 = vpop.f32.mrf.mxu1  ;;  %v6568_v63 = vpop.f32.mrf.mxu0 }
 0x1c3   :  { %v6560_v62 = vpop.f32.mrf.mxu1  ;;  %v6570_v2 = vpop.f32.mrf.mxu0 }
 0x1cb   :  { %v2824_v60 = vpop.f32.mrf.mxu1  ;;  %v6572_v6 = vpop.f32.mrf.mxu0 }
 0x1cc   :  { %v6562_v21 = vadd.f32 %v2824_v60, %v2159_v41  ;;  %6795 = vst [vmem:[#allocation26_spill] sm:$0xff] %v6572_v6  ;;  %v4913_v60 = vlaneseq  ;;  %v2147_v6 = vadd.f32 %v6495_v0, %v6418_v25 }
 0x1cd   :  { %v6574_v7 = vpop.f32.mrf.mxu0  ;;  %v6576_v8 = vpop.f32.mrf.mxu1 }
 0x1ce   :  { %6794 = vst [vmem:[#allocation25_spill] sm:$0xff] %v6562_v21  ;;  %6796 = vst [vmem:[#allocation27_spill] sm:$0xff] %v6574_v7  ;;  %v2148_v7 = vadd.f32 %v6501_v40, %v6424_v34 }
 0x1cf   :  { %6797 = vst [vmem:[#allocation28_spill] sm:$0xff] %v6576_v8 }
 0x1d5   :  { %v2990_v54 = vpop.f32.mrf.mxu0  ;;  %v3064_v13 = vpop.f32.mrf.mxu1 }
 0x1d7   :  { %v2992_v14 = vpop.f32.mrf.mxu0  ;;  %v3066_v15 = vpop.f32.mrf.mxu1 }
 0x1df   :  { %v6578_v5 = vpop.f32.mrf.mxu0  ;;  %v6580_v20 = vpop.f32.mrf.mxu1 }
 0x1e1   :  { %v6582_v26 = vpop.f32.mrf.mxu0  ;;  %v6584_v12 = vpop.f32.mrf.mxu1 }
 0x1e9   :  { %v6586_v49 = vpop.f32.mrf.mxu0  ;;  %v6588_v45 = vpop.f32.mrf.mxu1 }
 0x1eb   :  { %v6590_v38 = vpop.f32.mrf.mxu0  ;;  %v6592_v24 = vpop.f32.mrf.mxu1 }
 0x1f3   :  { %v6594_v19 = vpop.f32.mrf.mxu0  ;;  %v6596_v55 = vpop.f32.mrf.mxu1 }
 0x1f4   :  { %6798 = vst [vmem:[#allocation29_spill] sm:$0xff] %v6594_v19  ;;  %6799 = vst [vmem:[#allocation30_spill] sm:$0xff] %v6596_v55 }
 0x1f5   :  { %v6598_v31 = vpop.f32.mrf.mxu0  ;;  %v6600_v36 = vpop.f32.mrf.mxu1 }
 0x1f6   :  { %6800 = vst [vmem:[#allocation31_spill] sm:$0xff] %v6598_v31  ;;  %6801 = vst [vmem:[#allocation32_spill] sm:$0xff] %v6600_v36  ;;  %v4914_v36 = vshrl.u32 %v4913_v60, 7  ;;  %v2145_v31 = vadd.f32 %v6493_v30, %v6415_v22  ;;  %v2832_v22 = vadd.f32 %v2382_v53, %v2148_v7 }
 0x1f8   :  { %v2829_v18 = vadd.f32 %v2306_v3, %v2145_v31  ;;  %v6630_v16 = vsub.s32 0, %v4914_v36  ;;  %v6632_v60 = vsub.s32 1, %v4914_v36  ;;  %v3516_v44 = vadd.f32 %v3066_v15, %v2832_v22  ;;  %v4898_v31 = vld [vmem:[#allocation6 + $0x2] sm:$0x3] }
 0x1fa   :  { %v3513_v30 = vadd.f32 %v2990_v54, %v2829_v18 }
 0x1fd   :  { %v3674_v41 = vpop.f32.mrf.mxu0  ;;  %v3748_v23 = vpop.f32.mrf.mxu1 }
 0x1fe   :  { %v4197_v34 = vadd.f32 %v3674_v41, %v3513_v30  ;;  %v4924_v41 = vrot.slane %v4898_v31, %v6630_v16 }
 0x1ff   :  { %v3676_v9 = vpop.f32.mrf.mxu0  ;;  %v3750_v42 = vpop.f32.mrf.mxu1 }
 0x200   :  { %v4200_v53 = vadd.f32 %v3750_v42, %v3516_v44 }
 0x207   :  { %v6602_v47 = vpop.f32.mrf.mxu0  ;;  %v6604_v48 = vpop.f32.mrf.mxu1 }
 0x209   :  { %v6606_v32 = vpop.f32.mrf.mxu0  ;;  %v6608_v43 = vpop.f32.mrf.mxu1 }
 0x211   :  { %v6610_v50 = vpop.f32.mrf.mxu0  ;;  %v6612_v51 = vpop.f32.mrf.mxu1 }
 0x212   :  { %6802 = vst [vmem:[#allocation33_spill] sm:$0xff] %v6612_v51  ;;  %v2830_v51 = vadd.f32 %v2308_v59, %v2146_v46 }
 0x213   :  { %v6614_v55 = vpop.f32.mrf.mxu0  ;;  %v6616_v21 = vpop.f32.mrf.mxu1 }
 0x214   :  { %6803 = vst [vmem:[#allocation34_spill] sm:$0xff] %v6614_v55  ;;  %6804 = vst [vmem:[#allocation35_spill] sm:$0xff] %v6616_v21  ;;  %v2831_v21 = vadd.f32 %v2380_v52, %v2147_v6  ;;  %v3514_v33 = vadd.f32 %v2992_v14, %v2830_v51  ;;  %v4928_v52 = vrot.slane %v4898_v31, %v6632_v60 }
 0x216   :  { %v3515_v40 = vadd.f32 %v3064_v13, %v2831_v21  ;;  %v4198_v46 = vadd.f32 %v3676_v9, %v3514_v33  ;;  %v2150_v21 = vadd.f32 %v6514_v4, %v6439_v39  ;;  %v2833_v9 = vadd.f32 %v6564_v35, %v6505_v10  ;;  %v4899_v4 = vld [vmem:[#allocation6 + $0x4] sm:$0x3] }
 0x217   :  { %v2835_v33 = vadd.f32 %v6554_v29, %v6508_v11  ;;  %v4936_v11 = vrot.slane %v4899_v4, %v6632_v60 }
 0x218   :  { %v4199_v59 = vadd.f32 %v3748_v23, %v3515_v40  ;;  %v2834_v23 = vadd.f32 %v6566_v1, %v2150_v21  ;;  %v3517_v30 = vadd.f32 %v6578_v5, %v2833_v9  ;;  %v4932_v5 = vrot.slane %v4899_v4, %v6630_v16 }
 0x219   :  { %v2839_v21 = vadd.f32 %v6558_v58, %v6523_v28 }
 0x21b   :  { %v6620_v19 = vpop.f32.mrf.mxu0  ;;  %v6622_v8 = vpop.f32.mrf.mxu1  ;;  %v6807_v58 = vld [vmem:[#allocation34_spill] sm:$0xff] }
 0x21c   :  { %6805 = vst [vmem:[#allocation36_spill] sm:$0xff] %v6620_v19  ;;  %6806 = vst [vmem:[#allocation37_spill] sm:$0xff] %v6622_v8  ;;  %v4897_v19 = vld [vmem:[#allocation6] sm:$0x3] }
 0x21d   :  { %v6634_v8 = vpop.f32.mrf.mxu0  ;;  %v6636_v55 = vpop.f32.mrf.mxu1  ;;  %v4916_v25 = vrot.slane %v4897_v19, %v6630_v16  ;;  %v4920_v36 = vrot.slane %v4897_v19, %v6632_v60  ;;  %v2152_v19 = vadd.f32 %v6516_v17, %v6442_v61  ;;  %v3518_v61 = vadd.f32 %v6582_v26, %v2834_v23 }
 0x21e   :  { %v4201_v17 = vadd.f32 %v6602_v47, %v3517_v30 }
 0x21f   :  { %v2836_v22 = vadd.f32 %v6556_v56, %v2152_v19  ;;  %v3519_v56 = vadd.f32 %v6580_v20, %v2835_v33  ;;  %v4202_v29 = vadd.f32 %v6606_v32, %v3518_v61  ;;  %v2837_v32 = vadd.f32 %v6568_v63, %v6520_v27  ;;  %v6810_v61 = vld [vmem:[#allocation22_spill] sm:$0xff] }
 0x221   :  { %v3520_v10 = vadd.f32 %v6584_v12, %v2836_v22 }
 0x223   :  { %v4204_v26 = vadd.f32 %v6608_v43, %v3520_v10  ;;  %v6811_v10 = vld [vmem:[#allocation26_spill] sm:$0xff] }
 0x225   :  { %v4358_v3 = vpop.f32.mrf.mxu0  ;;  %v4432_v0 = vpop.f32.mrf.mxu1 }
 0x226   :  { %v4881_v18 = vadd.f32 %v4358_v3, %v4197_v34  ;;  %v4883_v15 = vadd.f32 %v4432_v0, %v4199_v59  ;;  %v4900_v3 = vld [vmem:[#allocation6 + $0x6] sm:$0x3] }
 0x227   :  { %v4360_v6 = vpop.f32.mrf.mxu0  ;;  %v4434_v7 = vpop.f32.mrf.mxu1  ;;  %v4944_v47 = vrot.slane %v4900_v3, %v6632_v60 }
 0x228   :  { %v4882_v54 = vadd.f32 %v4360_v6, %v4198_v46  ;;  %v4884_v14 = vadd.f32 %v4434_v7, %v4200_v53  ;;  %v4993_v13 = vadd.f32 %v4916_v25, %v4881_v18  ;;  %v4995_v34 = vadd.f32 %v4924_v41, %v4883_v15 }
 0x229   :  { %v4203_v25 = vadd.f32 %v6604_v48, %v3519_v56  ;;  %v2838_v6 = vadd.f32 %v6570_v2, %v6527_v57  ;;  %v2840_v48 = vadd.f32 %v6560_v62, %v6530_v37  ;;  %v3521_v7 = vadd.f32 %v6586_v49, %v2837_v32  ;;  %v4902_v49 = vld [vmem:[#allocation6 + $0xa] sm:$0x3] }
 0x22a   :  { %v4994_v42 = vadd.f32 %v4920_v36, %v4882_v54  ;;  %v4996_v51 = vadd.f32 %v4928_v52, %v4884_v14  ;;  %v5009_v44 = vmax.f32 %v4993_v13, 0.0  ;;  %v5011_v20 = vmax.f32 %v4995_v34, 0.0  ;;  %v4901_v14 = vld [vmem:[#allocation6 + $0x8] sm:$0x3] }
 0x22b   :  { %v4940_v52 = vrot.slane %v4900_v3, %v6630_v16  ;;  %v3522_v41 = vadd.f32 %v6590_v38, %v2838_v6  ;;  %v3524_v27 = vadd.f32 %v6592_v24, %v2840_v48  ;;  %v4205_v63 = vadd.f32 %v6610_v50, %v3521_v7  ;;  %v6808_v38 = vld [vmem:[#allocation35_spill] sm:$0xff]  ;;  %v6814_v3 = vld [vmem:[#allocation24_spill] sm:$0xff] }
 0x22c   :  { %v5010_v39 = vmax.f32 %v4994_v42, 0.0  ;;  %v5012_v35 = vmax.f32 %v4996_v51, 0.0  ;;  %v3523_v57 = vadd.f32 %v6588_v45, %v2839_v21  ;;  %v4948_v62 = vrot.slane %v4901_v14, %v6630_v16  ;;  %v6809_v51 = vld [vmem:[#allocation33_spill] sm:$0xff] }
 0x22d   :  { %v4952_v28 = vrot.slane %v4901_v14, %v6632_v60  ;;  %v4206_v9 = vadd.f32 %v6807_v58, %v3522_v41  ;;  %v4208_v42 = vadd.f32 %v6808_v38, %v3524_v27  ;;  %v4960_v50 = vrot.slane %v4902_v49, %v6632_v60  ;;  %v4904_v14 = vld [vmem:[#allocation6 + $0xe] sm:$0x3] }
 0x22e   :  { %5714 = vmatprep.mubr.msk.f32.mxu0 %vm5049_vm1, %v5010_v39  ;;  %v4207_v23 = vadd.f32 %v6809_v51, %v3523_v57  ;;  %v4956_v34 = vrot.slane %v4902_v49, %v6630_v16  ;;  %v4976_v27 = vrot.slane %v4904_v14, %v6632_v60  ;;  %v5253_v51 = vld [vmem:[#allocation11 + $0x78] sm:$0xff] }
 0x22f   :  { %v4506_v1 = vpop.f32.mrf.mxu0  ;;  %v4580_v40 = vpop.f32.mrf.mxu1  ;;  %5139 = vmatmul.mubr.f32.vlgmr.msra.gmra.mxu0 %v5009_v44  ;;  %5775 = vmatprep.subr.mxu1 %v5253_v51 }
 0x230   :  { %v4885_v12 = vadd.f32 %v4506_v1, %v4201_v17  ;;  %5715 = vmatprep.mubr.msk.f32.mxu0 %vm5049_vm1, %v5012_v35  ;;  %v4887_v18 = vadd.f32 %v4580_v40, %v4203_v25  ;;  %v2841_v17 = vadd.f32 %v6811_v10, %v6810_v61  ;;  %v6812_v1 = vld [vmem:[#allocation23_spill] sm:$0xff]  ;;  %v4903_v25 = vld [vmem:[#allocation6 + $0xc] sm:$0x3]  ;;  %5776 = vmatpush3.msra.mxu1 %v5253_v51  ;;  %v5242_v61 = vld [vmem:[#allocation11 + $0x20] sm:$0xff] }
 0x231   :  { %v4508_v0 = vpop.f32.mrf.mxu0  ;;  %v4582_v31 = vpop.f32.mrf.mxu1  ;;  %v4964_v7 = vrot.slane %v4903_v25, %v6630_v16  ;;  %v4968_v21 = vrot.slane %v4903_v25, %v6632_v60  ;;  %v5241_v10 = vld [vmem:[#allocation11 + $0x18] sm:$0xff]  ;;  %v5381_v51 = vld [vmem:[%s6786_s7 + $0x38] sm:$0xff] }
 0x232   :  { %v4886_v36 = vadd.f32 %v4508_v0, %v4202_v29  ;;  %v4888_v46 = vadd.f32 %v4582_v31, %v4204_v26  ;;  %v4997_v53 = vadd.f32 %v4932_v5, %v4885_v12  ;;  %v4999_v15 = vadd.f32 %v4940_v52, %v4887_v18  ;;  %v6813_v5 = vld [vmem:[#allocation27_spill] sm:$0xff]  ;;  %v6816_v26 = vld [vmem:[#allocation29_spill] sm:$0xff]  ;;  %v6819_v18 = vld [vmem:[#allocation36_spill] sm:$0xff] }
 0x233   :  { %5144 = vmatmul.mubr.f32.gmra.mxu0 %v5011_v20  ;;  %v2842_v40 = vadd.f32 %v6813_v5, %v6812_v1  ;;  %v3525_v12 = vadd.f32 %v6816_v26, %v2841_v17  ;;  %v6817_v31 = vld [vmem:[#allocation31_spill] sm:$0xff]  ;;  %v5389_v1 = vld [vmem:[%s6786_s7 + $0x78] sm:$0xff] }
 0x234   :  { %v4998_v43 = vadd.f32 %v4936_v11, %v4886_v36  ;;  %v5000_v59 = vadd.f32 %v4944_v47, %v4888_v46  ;;  %v5013_v13 = vmax.f32 %v4997_v53, 0.0  ;;  %v5015_v45 = vmax.f32 %v4999_v15, 0.0  ;;  %v6815_v11 = vld [vmem:[#allocation28_spill] sm:$0xff] }
 0x235   :  { %v2844_v29 = vadd.f32 %v6815_v11, %v6814_v3  ;;  %v3526_v36 = vadd.f32 %v6817_v31, %v2842_v40  ;;  %v6818_v46 = vld [vmem:[#allocation32_spill] sm:$0xff]  ;;  %v4209_v52 = vadd.f32 %v6819_v18, %v3525_v12 }
 0x236   :  { %v5014_v54 = vmax.f32 %v4998_v43, 0.0  ;;  %v5016_v19 = vmax.f32 %v5000_v59, 0.0  ;;  %v6820_v43 = vld [vmem:[#allocation25_spill] sm:$0xff]  ;;  %v6821_v59 = vld [vmem:[#allocation30_spill] sm:$0xff]  ;;  %v5240_v17 = vld [vmem:[#allocation11 + $0x10] sm:$0xff] }
 0x237   :  { %v3528_v53 = vadd.f32 %v6818_v46, %v2844_v29  ;;  %v3527_v6 = vadd.f32 %v6821_v59, %v6820_v43 }
 0x238   :  { %5716 = vmatprep.mubr.msk.f32.mxu0 %vm5049_vm1, %v5014_v54 }
 0x239   :  { %v4654_v37 = vpop.f32.mrf.mxu0  ;;  %v4728_v2 = vpop.f32.mrf.mxu1  ;;  %5149 = vmatmul.mubr.f32.gmra.mxu0 %v5013_v13  ;;  %v4210_v13 = vadd.f32 %v6634_v8, %v3526_v36  ;;  %v4212_v15 = vadd.f32 %v6636_v55, %v3528_v53 }
 0x23a   :  { %v4889_v24 = vadd.f32 %v4654_v37, %v4205_v63  ;;  %5717 = vmatprep.mubr.msk.f32.mxu0 %vm5049_vm1, %v5016_v19  ;;  %v4891_v44 = vadd.f32 %v4728_v2, %v4207_v23  ;;  %v6822_v63 = vld [vmem:[#allocation37_spill] sm:$0xff]  ;;  %v5252_v23 = vld [vmem:[#allocation11 + $0x70] sm:$0xff] }
 0x23b   :  { %v4656_v22 = vpop.f32.mrf.mxu0  ;;  %v4730_v30 = vpop.f32.mrf.mxu1  ;;  %v4211_v19 = vadd.f32 %v6822_v63, %v3527_v6  ;;  %5777 = vmatprep.subr.mxu1 %v5252_v23 }
 0x23c   :  { %v4890_v39 = vadd.f32 %v4656_v22, %v4206_v9  ;;  %v4892_v4 = vadd.f32 %v4730_v30, %v4208_v42  ;;  %v5001_v33 = vadd.f32 %v4948_v62, %v4889_v24  ;;  %v5003_v0 = vadd.f32 %v4956_v34, %v4891_v44  ;;  %5778 = vmatpush3.msra.mxu1 %v5252_v23  ;;  %v5249_v22 = vld [vmem:[#allocation11 + $0x58] sm:$0xff]  ;;  %v5248_v30 = vld [vmem:[#allocation11 + $0x50] sm:$0xff]  ;;  %v5243_v34 = vld [vmem:[#allocation11 + $0x28] sm:$0xff] }
 0x23d   :  { %5154 = vmatmul.mubr.f32.gmra.mxu0 %v5015_v45  ;;  %v4972_v9 = vrot.slane %v4904_v14, %v6630_v16  ;;  %v5251_v16 = vld [vmem:[#allocation11 + $0x68] sm:$0xff]  ;;  %v5250_v45 = vld [vmem:[#allocation11 + $0x60] sm:$0xff]  ;;  %v5244_v44 = vld [vmem:[#allocation11 + $0x30] sm:$0xff] }
 0x23e   :  { %v5002_v35 = vadd.f32 %v4952_v28, %v4890_v39  ;;  %v5004_v56 = vadd.f32 %v4960_v50, %v4892_v4  ;;  %v5017_v20 = vmax.f32 %v5001_v33, 0.0  ;;  %v5019_v57 = vmax.f32 %v5003_v0, 0.0  ;;  %5779 = vmatprep.subr.mxu1 %v5251_v16  ;;  %v5247_v39 = vld [vmem:[#allocation11 + $0x48] sm:$0xff]  ;;  %v5246_v4 = vld [vmem:[#allocation11 + $0x40] sm:$0xff]  ;;  %v5245_v33 = vld [vmem:[#allocation11 + $0x38] sm:$0xff] }
 0x23f   :  { %5780 = vmatpush3.msra.mxu1 %v5251_v16  ;;  %v5380_v23 = vld [vmem:[%s6786_s7 + $0x30] sm:$0xff]  ;;  %v5379_v16 = vld [vmem:[%s6786_s7 + $0x28] sm:$0xff] }
 0x240   :  { %v5018_v47 = vmax.f32 %v5002_v35, 0.0  ;;  %v5020_v32 = vmax.f32 %v5004_v56, 0.0  ;;  %5781 = vmatprep.subr.mxu1 %v5250_v45  ;;  %v5239_v35 = vld [vmem:[#allocation11 + $0x8] sm:$0xff]  ;;  %v5238_v56 = vld [vmem:[#allocation11] sm:$0xff] }
 0x241   :  { %5782 = vmatpush3.msra.mxu1 %v5250_v45  ;;  %v5378_v45 = vld [vmem:[%s6786_s7 + $0x20] sm:$0xff] }
 0x242   :  { %5718 = vmatprep.mubr.msk.f32.mxu0 %vm5049_vm1, %v5018_v47  ;;  %5783 = vmatprep.subr.mxu1 %v5249_v22 }
 0x243   :  { %v4802_v48 = vpop.f32.mrf.mxu0  ;;  %v4876_v54 = vpop.f32.mrf.mxu1  ;;  %5159 = vmatmul.mubr.f32.gmra.mxu0 %v5017_v20  ;;  %5784 = vmatpush3.msra.mxu1 %v5249_v22  ;;  %v5377_v22 = vld [vmem:[%s6786_s7 + $0x18] sm:$0xff] }
 0x244   :  { %v4893_v41 = vadd.f32 %v4802_v48, %v4209_v52  ;;  %5719 = vmatprep.mubr.msk.f32.mxu0 %vm5049_vm1, %v5020_v32  ;;  %v4895_v58 = vadd.f32 %v4876_v54, %v4211_v19  ;;  %5785 = vmatprep.subr.mxu1 %v5248_v30  ;;  %v5722_v54 = vld [vmem:[#allocation9] ss:$0 sm:$0xff] }
 0x245   :  { %v4804_v37 = vpop.f32.mrf.mxu0  ;;  %v4878_v62 = vpop.f32.mrf.mxu1  ;;  %5786 = vmatpush3.msra.mxu1 %v5248_v30  ;;  %v5376_v30 = vld [vmem:[%s6786_s7 + $0x10] sm:$0xff] }
 0x246   :  { %v4894_v2 = vadd.f32 %v4804_v37, %v4210_v13  ;;  %v4896_v49 = vadd.f32 %v4878_v62, %v4212_v15  ;;  %v5005_v28 = vadd.f32 %v4964_v7, %v4893_v41  ;;  %v5007_v24 = vadd.f32 %v4972_v9, %v4895_v58  ;;  %5787 = vmatprep.subr.mxu1 %v5247_v39  ;;  %v5387_v37 = vld [vmem:[%s6786_s7 + $0x68] sm:$0xff]  ;;  %v5386_v58 = vld [vmem:[%s6786_s7 + $0x60] sm:$0xff]  ;;  %v5385_v9 = vld [vmem:[%s6786_s7 + $0x58] sm:$0xff] }
 0x247   :  { %5164 = vmatmul.mubr.f32.gmra.mxu0 %v5019_v57  ;;  %5788 = vmatpush3.msra.mxu1 %v5247_v39  ;;  %v5388_v57 = vld [vmem:[%s6786_s7 + $0x70] sm:$0xff]  ;;  %v5375_v39 = vld [vmem:[%s6786_s7 + $0x8] sm:$0xff] }
 0x248   :  { %v5006_v8 = vadd.f32 %v4968_v21, %v4894_v2  ;;  %v5008_v38 = vadd.f32 %v4976_v27, %v4896_v49  ;;  %v5021_v42 = vmax.f32 %v5005_v28, 0.0  ;;  %v5023_v50 = vmax.f32 %v5007_v24, 0.0  ;;  %5789 = vmatprep.subr.mxu1 %v5246_v4  ;;  %v5383_v24 = vld [vmem:[%s6786_s7 + $0x48] sm:$0xff] }
 0x249   :  { %5790 = vmatpush3.msra.mxu1 %v5246_v4  ;;  %v5374_v4 = vld [vmem:[%s6786_s7] sm:$0xff] }
 0x24a   :  { %v5022_v55 = vmax.f32 %v5006_v8, 0.0  ;;  %v5024_v60 = vmax.f32 %v5008_v38, 0.0  ;;  %5791 = vmatprep.subr.mxu1 %v5245_v33 }
 0x24b   :  { %5792 = vmatpush3.msra.mxu1 %v5245_v33  ;;  %v5723_v33 = vld [vmem:[#allocation12] ss:$0 sm:$0xff] }
 0x24c   :  { %5720 = vmatprep.mubr.msk.f32.mxu0 %vm5049_vm1, %v5022_v55  ;;  %5793 = vmatprep.subr.mxu1 %v5244_v44 }
 0x24d   :  { %5169 = vmatmul.mubr.f32.gmra.mxu0 %v5021_v42  ;;  %5794 = vmatpush3.msra.mxu1 %v5244_v44  ;;  %v5384_v42 = vld [vmem:[%s6786_s7 + $0x50] sm:$0xff] }
 0x24e   :  { %5721 = vmatprep.mubr.msk.f32.mxu0 %vm5049_vm1, %v5024_v60  ;;  %5795 = vmatprep.subr.mxu1 %v5243_v34 }
 0x24f   :  { %5796 = vmatpush3.msra.mxu1 %v5243_v34 }
 0x250   :  { %5797 = vmatprep.subr.mxu1 %v5242_v61 }
 0x251   :  { %5174 = vmatmul.mubr.f32.gmra.mxu0 %v5023_v50  ;;  %5798 = vmatpush3.msra.mxu1 %v5242_v61  ;;  %v5382_v50 = vld [vmem:[%s6786_s7 + $0x40] sm:$0xff] }
 0x252   :  { %5799 = vmatprep.subr.mxu1 %v5241_v10 }
 0x253   :  { %5800 = vmatpush3.msra.mxu1 %v5241_v10 }
 0x254   :  { %5801 = vmatprep.subr.mxu1 %v5240_v17 }
 0x255   :  { %5802 = vmatpush3.msra.mxu1 %v5240_v17 }
 0x256   :  { %5803 = vmatprep.subr.mxu1 %v5239_v35 }
 0x257   :  { %5804 = vmatpush3.msra.mxu1 %v5239_v35 }
 0x258   :  { %5805 = vmatprep.subr.mxu1 %v5238_v56 }
 0x259   :  { %5806 = vmatpush3.msra.mxu1 %v5238_v56 }
 0x25a   :  { %5819 = vmatprep.subr.mxu1 %v5389_v1 }
 0x2ef   :  { %v5140_v5 = vpop.f32.mrf.mxu0 }
 0x2f1   :  { %v5142_v40 = vpop.f32.mrf.mxu0 }
 0x2f3   :  { %v5145_v3 = vpop.f32.mrf.mxu0 }
 0x2f5   :  { %v5147_v11 = vpop.f32.mrf.mxu0 }
 0x2f9   :  { %v5150_v29 = vpop.f32.mrf.mxu0 }
 0x2fb   :  { %v5152_v26 = vpop.f32.mrf.mxu0 }
 0x2fd   :  { %v5155_v12 = vpop.f32.mrf.mxu0 }
 0x2ff   :  { %v5157_v47 = vpop.f32.mrf.mxu0 }
 0x303   :  { %v5160_v25 = vpop.f32.mrf.mxu0 }
 0x304   :  { %v5208_v52 = vmax.f32 %v5140_v5, %v5160_v25 }
 0x305   :  { %v5162_v20 = vpop.f32.mrf.mxu0 }
 0x307   :  { %v5165_v0 = vpop.f32.mrf.mxu0 }
 0x308   :  { %v5209_v53 = vmax.f32 %v5145_v3, %v5165_v0 }
 0x309   :  { %v5167_v31 = vpop.f32.mrf.mxu0 }
 0x30a   :  { %v5212_v6 = vmax.f32 %v5208_v52, %v5209_v53  ;;  %v5724_v52 = vld [vmem:[#allocation14] ss:$0 sm:$0xff] }
 0x30d   :  { %v5170_v36 = vpop.f32.mrf.mxu0 }
 0x30e   :  { %v5210_v32 = vmax.f32 %v5150_v29, %v5170_v36 }
 0x30f   :  { %v5172_v46 = vpop.f32.mrf.mxu0 }
 0x311   :  { %v5175_v18 = vpop.f32.mrf.mxu0 }
 0x312   :  { %v5211_v43 = vmax.f32 %v5155_v12, %v5175_v18 }
 0x313   :  { %v5177_v59 = vpop.f32.mrf.mxu0 }
 0x314   :  { %v5213_v48 = vmax.f32 %v5210_v32, %v5211_v43 }
 0x316   :  { %v5214_v7 = vmax.f32 %v5212_v6, %v5213_v48  ;;  %v5725_v6 = vld [vmem:[#allocation15] ss:$0 sm:$0xff] }
 0x318   :  { %v5215_v14 = vadd.f32 %v5214_v7, %v5140_v5  ;;  %v5216_v21 = vadd.f32 %v5214_v7, %v5145_v3  ;;  %v5217_v13 = vadd.f32 %v5214_v7, %v5150_v29  ;;  %v5218_v27 = vadd.f32 %v5214_v7, %v5155_v12 }
 0x319   :  { %v5219_v19 = vadd.f32 %v5214_v7, %v5160_v25  ;;  %v5220_v2 = vadd.f32 %v5214_v7, %v5165_v0  ;;  %v5221_v28 = vadd.f32 %v5214_v7, %v5170_v36  ;;  %v5222_v8 = vadd.f32 %v5214_v7, %v5175_v18 }
 0x31a   :  { %v5230_v15 = vadd.f32 %v5722_v54, %v5215_v14  ;;  %v5231_v41 = vadd.f32 %v5722_v54, %v5216_v21  ;;  %v5232_v63 = vadd.f32 %v5722_v54, %v5217_v13  ;;  %v5233_v62 = vadd.f32 %v5722_v54, %v5218_v27 }
 0x31b   :  { %v5234_v49 = vadd.f32 %v5722_v54, %v5219_v19  ;;  %v5235_v38 = vadd.f32 %v5722_v54, %v5220_v2  ;;  %v5236_v55 = vadd.f32 %v5722_v54, %v5221_v28  ;;  %v5237_v60 = vadd.f32 %v5722_v54, %v5222_v8 }
 0x31c   :  { %5807 = vmatprep.mubr.f32.mxu1 %v5230_v15 }
 0x31d   :  { %5808 = vmatmul.mubr.f32.vlgmr.msra.gmra.mxu1 %v5231_v41 }
 0x31e   :  { %5810 = vmatprep.mubr.f32.mxu1 %v5232_v63  ;;  %5820 = vmatpush3.msra.mxu1 %v5389_v1 }
 0x31f   :  { %5821 = vmatprep.subr.mxu1 %v5388_v57 }
 0x320   :  { %5822 = vmatpush3.msra.mxu1 %v5388_v57 }
 0x321   :  { %5811 = vmatmul.mubr.f32.gmra.mxu1 %v5233_v62  ;;  %5823 = vmatprep.subr.mxu1 %v5387_v37 }
 0x322   :  { %5813 = vmatprep.mubr.f32.mxu1 %v5234_v49  ;;  %5824 = vmatpush3.msra.mxu1 %v5387_v37 }
 0x323   :  { %5825 = vmatprep.subr.mxu1 %v5386_v58 }
 0x324   :  { %5826 = vmatpush3.msra.mxu1 %v5386_v58 }
 0x325   :  { %5814 = vmatmul.mubr.f32.gmra.mxu1 %v5235_v38  ;;  %5827 = vmatprep.subr.mxu1 %v5385_v9 }
 0x326   :  { %5816 = vmatprep.mubr.f32.mxu1 %v5236_v55  ;;  %5828 = vmatpush3.msra.mxu1 %v5385_v9 }
 0x327   :  { %5829 = vmatprep.subr.mxu1 %v5384_v42 }
 0x328   :  { %5830 = vmatpush3.msra.mxu1 %v5384_v42 }
 0x329   :  { %5817 = vmatmul.mubr.f32.gmra.mxu1 %v5237_v60  ;;  %5831 = vmatprep.subr.mxu1 %v5383_v24 }
 0x32a   :  { %5832 = vmatpush3.msra.mxu1 %v5383_v24 }
 0x32b   :  { %5833 = vmatprep.subr.mxu1 %v5382_v50 }
 0x32c   :  { %5834 = vmatpush3.msra.mxu1 %v5382_v50 }
 0x32d   :  { %5835 = vmatprep.subr.mxu1 %v5381_v51 }
 0x32e   :  { %5836 = vmatpush3.msra.mxu1 %v5381_v51 }
 0x32f   :  { %5837 = vmatprep.subr.mxu1 %v5380_v23 }
 0x330   :  { %5838 = vmatpush3.msra.mxu1 %v5380_v23 }
 0x331   :  { %5839 = vmatprep.subr.mxu1 %v5379_v16 }
 0x332   :  { %5840 = vmatpush3.msra.mxu1 %v5379_v16 }
 0x333   :  { %5841 = vmatprep.subr.mxu1 %v5378_v45 }
 0x334   :  { %5842 = vmatpush3.msra.mxu1 %v5378_v45 }
 0x335   :  { %5843 = vmatprep.subr.mxu1 %v5377_v22 }
 0x336   :  { %5844 = vmatpush3.msra.mxu1 %v5377_v22 }
 0x337   :  { %5845 = vmatprep.subr.mxu1 %v5376_v30 }
 0x338   :  { %5846 = vmatpush3.msra.mxu1 %v5376_v30 }
 0x339   :  { %5847 = vmatprep.subr.mxu1 %v5375_v39 }
 0x33a   :  { %5848 = vmatpush3.msra.mxu1 %v5375_v39 }
 0x33b   :  { %5849 = vmatprep.subr.mxu1 %v5374_v4 }
 0x33c   :  { %5850 = vmatpush3.msra.mxu1 %v5374_v4 }
 0x3dd   :  { %v5809_v44 = vpop.f32.mrf.mxu1 }
 0x3de   :  { %v5333_v34 = vadd.f32 %v5809_v44, %v5723_v33 }
 0x3df   :  { %v5327_v61 = vpop.f32.mrf.mxu1 }
 0x3e0   :  { %v5328_v10 = vadd.f32 %v5723_v33, %v5327_v61  ;;  %v5367_v56 = vmax.f32 %v5333_v34, 0.0 }
 0x3e1   :  { %v5812_v17 = vpop.f32.mrf.mxu1 }
 0x3e2   :  { %v5366_v35 = vmax.f32 %v5328_v10, 0.0  ;;  %v5343_v1 = vadd.f32 %v5812_v17, %v5723_v33 }
 0x3e3   :  { %v5337_v5 = vpop.f32.mrf.mxu1 }
 0x3e4   :  { %v5338_v40 = vadd.f32 %v5723_v33, %v5337_v5  ;;  %5851 = vmatprep.mubr.f32.mxu1 %v5366_v35  ;;  %v5369_v29 = vmax.f32 %v5343_v1, 0.0 }
 0x3e5   :  { %v5815_v3 = vpop.f32.mrf.mxu1  ;;  %5852 = vmatmul.mubr.f32.vlgmr.msra.gmra.mxu1 %v5367_v56  ;;  %v5726_v56 = vld [vmem:[#allocation3] ss:$0 sm:$0xff] }
 0x3e6   :  { %v5368_v11 = vmax.f32 %v5338_v40, 0.0  ;;  %v5353_v26 = vadd.f32 %v5815_v3, %v5723_v33 }
 0x3e7   :  { %v5347_v12 = vpop.f32.mrf.mxu1 }
 0x3e8   :  { %v5348_v47 = vadd.f32 %v5723_v33, %v5347_v12  ;;  %5854 = vmatprep.mubr.f32.mxu1 %v5368_v11  ;;  %v5371_v0 = vmax.f32 %v5353_v26, 0.0 }
 0x3e9   :  { %v5818_v25 = vpop.f32.mrf.mxu1  ;;  %5855 = vmatmul.mubr.f32.gmra.mxu1 %v5369_v29 }
 0x3ea   :  { %v5370_v20 = vmax.f32 %v5348_v47, 0.0  ;;  %v5363_v31 = vadd.f32 %v5818_v25, %v5723_v33 }
 0x3eb   :  { %v5357_v36 = vpop.f32.mrf.mxu1 }
 0x3ec   :  { %v5358_v46 = vadd.f32 %v5723_v33, %v5357_v36  ;;  %5857 = vmatprep.mubr.f32.mxu1 %v5370_v20  ;;  %v5373_v18 = vmax.f32 %v5363_v31, 0.0 }
 0x3ed   :  { %5858 = vmatmul.mubr.f32.gmra.mxu1 %v5371_v0 }
 0x3ee   :  { %v5372_v53 = vmax.f32 %v5358_v46, 0.0 }
 0x3f0   :  { %5860 = vmatprep.mubr.f32.mxu1 %v5372_v53 }
 0x3f1   :  { %5861 = vmatmul.mubr.f32.gmra.mxu1 %v5373_v18 }
 0x4a5   :  { %v5853_v32 = vpop.f32.mrf.mxu1 }
 0x4a6   :  { %v5469_v43 = vadd.f32 %v5853_v32, %v5724_v52 }
 0x4a7   :  { %v5463_v59 = vpop.f32.mrf.mxu1 }
 0x4a8   :  { %v5503_v48 = vmax.f32 %v5469_v43, 0.0  ;;  %v5464_v7 = vadd.f32 %v5724_v52, %v5463_v59 }
 0x4a9   :  { %v5856_v54 = vpop.f32.mrf.mxu1 }
 0x4aa   :  { %v5502_v14 = vmax.f32 %v5464_v7, 0.0  ;;  %v5479_v21 = vadd.f32 %v5856_v54, %v5724_v52  ;;  %v5518_v13 = vmul.f32 %v5725_v6, %v5503_v48 }
 0x4ab   :  { %v5473_v15 = vpop.f32.mrf.mxu1 }
 0x4ac   :  { %v5505_v41 = vmax.f32 %v5479_v21, 0.0  ;;  %v5474_v27 = vadd.f32 %v5724_v52, %v5473_v15  ;;  %v5528_v63 = vsel %vm292_vm0, %v5518_v13, 0.0  ;;  %v5517_v19 = vmul.f32 %v5725_v6, %v5502_v14 }
 0x4ad   :  { %5529 = vadd.xlane.f32.xlu0 %v5528_v63  ;;  %v5859_v57 = vpop.f32.mrf.mxu1 }
 0x4ae   :  { %v5504_v37 = vmax.f32 %v5474_v27, 0.0  ;;  %v5489_v62 = vadd.f32 %v5859_v57, %v5724_v52  ;;  %v5520_v2 = vmul.f32 %v5725_v6, %v5505_v41  ;;  %v5525_v28 = vsel %vm292_vm0, %v5517_v19, 0.0 }
 0x4af   :  { %v5483_v49 = vpop.f32.mrf.mxu1 }
 0x4b0   :  { %v5507_v58 = vmax.f32 %v5489_v62, 0.0  ;;  %v5484_v9 = vadd.f32 %v5724_v52, %v5483_v49  ;;  %v5534_v8 = vsel %vm292_vm0, %v5520_v2, 0.0  ;;  %v5519_v38 = vmul.f32 %v5725_v6, %v5504_v37 }
 0x4b1   :  { %5535 = vadd.xlane.f32.xlu1 %v5534_v8  ;;  %v5862_v55 = vpop.f32.mrf.mxu1  ;;  %5526 = vadd.xlane.f32.xlu0 %v5525_v28 }
 0x4b2   :  { %v5506_v42 = vmax.f32 %v5484_v9, 0.0  ;;  %v5499_v24 = vadd.f32 %v5862_v55, %v5724_v52  ;;  %v5531_v50 = vsel %vm292_vm0, %v5519_v38, 0.0  ;;  %v5522_v45 = vmul.f32 %v5725_v6, %v5507_v58 }
 0x4b3   :  { %v5493_v60 = vpop.f32.mrf.mxu1 }
 0x4b4   :  { %v5509_v51 = vmax.f32 %v5499_v24, 0.0  ;;  %v5494_v23 = vadd.f32 %v5724_v52, %v5493_v60  ;;  %v5521_v16 = vmul.f32 %v5725_v6, %v5506_v42  ;;  %v5540_v39 = vsel %vm292_vm0, %v5522_v45, 0.0 }
 0x4b5   :  { %5532 = vadd.xlane.f32.xlu1 %v5531_v50 }
 0x4b6   :  { %v5508_v22 = vmax.f32 %v5494_v23, 0.0  ;;  %v5537_v30 = vsel %vm292_vm0, %v5521_v16, 0.0  ;;  %v5524_v33 = vmul.f32 %v5725_v6, %v5509_v51 }
 0x4b7   :  { %5538 = vadd.xlane.f32.xlu0 %v5537_v30 }
 0x4b8   :  { %v5523_v4 = vmul.f32 %v5725_v6, %v5508_v22  ;;  %v5546_v34 = vsel %vm292_vm0, %v5524_v33, 0.0 }
 0x4b9   :  { %5541 = vadd.xlane.f32.xlu1 %v5540_v39 }
 0x4ba   :  { %v5543_v44 = vsel %vm292_vm0, %v5523_v4, 0.0 }
 0x4bb   :  { %5544 = vadd.xlane.f32.xlu0 %v5543_v44 }
 0x4bd   :  { %5547 = vadd.xlane.f32.xlu1 %v5546_v34 }
 0x536   :  { %v5530_v61 = vpop.xlane.xlu0 %5529 }
 0x537   :  { %v5557_v40 = vadd.f32 %v5726_v56, %v5530_v61 }
 0x539   :  { %v5574_v31 = vsel %vm5572_vm2, %v5557_v40, -inf }
 0x53a   :  { %v5536_v10 = vpop.xlane.xlu1 %5535  ;;  %v5527_v17 = vpop.xlane.xlu0 %5526 }
 0x53b   :  { %v5559_v29 = vadd.f32 %v5726_v56, %v5536_v10  ;;  %v5556_v12 = vadd.f32 %v5726_v56, %v5527_v17 }
 0x53d   :  { %v5576_v52 = vsel %vm5572_vm2, %v5559_v29, -inf  ;;  %v5573_v32 = vsel %vm5572_vm2, %v5556_v12, -inf }
 0x53e   :  { %v5533_v35 = vpop.xlane.xlu1 %5532 }
 0x53f   :  { %v5558_v47 = vadd.f32 %v5726_v56, %v5533_v35 }
 0x540   :  { %v5539_v1 = vpop.xlane.xlu0 %5538 }
 0x541   :  { %v5560_v3 = vadd.f32 %v5726_v56, %v5539_v1  ;;  %v5575_v43 = vsel %vm5572_vm2, %v5558_v47, -inf }
 0x542   :  { %v5542_v5 = vpop.xlane.xlu1 %5541 }
 0x543   :  { %v5561_v11 = vadd.f32 %v5726_v56, %v5542_v5  ;;  %v5577_v36 = vsel %vm5572_vm2, %v5560_v3, -inf }
 0x544   :  { %v5545_v26 = vpop.xlane.xlu0 %5544  ;;  %v5578_v6 = vmax.f32 %v5573_v32, %v5577_v36 }
 0x545   :  { %v5579_v25 = vsel %vm5572_vm2, %v5561_v11, -inf  ;;  %v5562_v20 = vadd.f32 %v5726_v56, %v5545_v26 }
 0x546   :  { %v5548_v0 = vpop.xlane.xlu1 %5547  ;;  %v5580_v18 = vmax.f32 %v5574_v31, %v5579_v25 }
 0x547   :  { %v5581_v46 = vsel %vm5572_vm2, %v5562_v20, -inf  ;;  %v5563_v53 = vadd.f32 %v5726_v56, %v5548_v0 }
 0x548   :  { %v5582_v48 = vmax.f32 %v5575_v43, %v5581_v46  ;;  %v5585_v54 = vmax.f32 %v5578_v6, %v5580_v18 }
 0x549   :  { %v5583_v59 = vsel %vm5572_vm2, %v5563_v53, -inf }
 0x54a   :  { %v5584_v7 = vmax.f32 %v5576_v52, %v5583_v59 }
 0x54c   :  { %v5586_v14 = vmax.f32 %v5582_v48, %v5584_v7 }
 0x54e   :  { %v5587_v21 = vmax.f32 %v5585_v54, %v5586_v14 }
 0x550   :  { %v5588_v13 = vsub.f32 0.0, %v5587_v21 }
 0x552   :  { %v5589_v15 = vmul.f32 1.442695, %v5588_v13 }
 0x554   :  { %5878 = vpow2.f32 %v5589_v15 }
 0x561   :  { %v5879_v41 = vpop.eup %5878 }
 0x562   :  { %v5591_v27 = vadd.f32 1.0, %v5879_v41 }
 0x564   :  { %5880 = vrcp.f32 %v5591_v27 }
 0x571   :  { %v5881_v63 = vpop.eup %5880 }
 0x572   :  { %5594 = vst.msk [vmem:[%s6790_s11] sm:$0xff] %vm5572_vm2, %v5881_v63 }
 0x573   :  { %5599 = vsyncpa [#allocation5], 1 }
 0x574   :  { %5600 = vsyncpa [#allocation7], 1 }
 0x575   :  { %5601 = vsyncpa [#allocation10], 1 }
 0x576   :  { %5602 = vsyncpa [#allocation13], 1 }
 0x577   :  { %5603 = vsyncpa [#allocation16], 1 }

</bundles_post_ra>
